<compile_context>
chip_gen: v6e
topology: v6e:2x2x1
jax: 0.10.0
libtpu: 0.0.40
codegen_flags: <defaults>
</compile_context>

<pallas_src>
import jax
import jax.numpy as jnp
from jax.experimental import pallas as pl
from jax.experimental.pallas import tpu as pltpu


def _lr(p):
    # F.pad-style (left, right) = (ceil(p/2), floor(p/2))
    return (p // 2 + p % 2, p // 2)


def _cdiv(a, b):
    return -(-a // b)


def _make_kernel(nplanes, phase_info, kpd, kph, kpw, Wp, Rp):
    """Fused im2col + matmul kernel body.

    Ref layout: [plane_0 .. plane_{nplanes-1}, w_ref, b_ref, out_ref]
      plane_j : (HWp, Cin)      bf16  flattened (H*W) channels-last plane qd+j
      w_ref   : (P, Kred, Cout) bf16  all-phase weight, resident in VMEM
      b_ref   : (1, Cout)       f32   resident
      out_ref : (Rp, Cout)      bf16  rows = OPh * Wp for this (n, qd, phase)
    """

    def kernel(*refs):
        planes = refs[:nplanes]
        w_ref = refs[nplanes]
        b_ref = refs[nplanes + 1]
        out_ref = refs[nplanes + 2]
        p = pl.program_id(2)

        # One statically-specialized branch per output phase (<= sd*sh*sw).
        for pidx, (bd, bh, bw) in enumerate(phase_info):

            @pl.when(p == pidx)
            def _(pidx=pidx, bd=bd, bh=bh, bw=bw):
                taps = []
                for md in range(kpd):
                    pr = planes[bd + md]               # (HWp, Cin) ref
                    for mh in range(kph):
                        for mw in range(kpw):
                            start = (bh + mh) * Wp + (bw + mw)   # static
                            taps.append(pr[start:start + Rp, :])
                # (Rp, Kred) column tile built in VMEM -- never touches HBM.
                cols = jnp.concatenate(taps, axis=-1)
                acc = jnp.dot(cols, w_ref[pidx],
                              preferred_element_type=jnp.float32)
                out_ref[...] = (acc + b_ref[...]).astype(out_ref.dtype)

    return kernel


def same_pad_conv_transpose3d(x, weight, bias, kernel_size, stride):
    """Pallas implementation of SamePadConvTranspose3d.forward (NCDHW).

    x:      (N, Cin, D, H, W)
    weight: (Cin, Cout, kD, kH, kW)   (nn.ConvTranspose3d layout)
    bias:   (Cout,)
    """
    kd, kh, kw = kernel_size
    sd, sh, sw = stride
    N, Cin, D, H, W = x.shape
    Cout = weight.shape[1]
    assert kd >= sd and kh >= sh and kw >= sw, "module assumes kernel >= stride"

    # ---- 1) "same" pre-pad (F.pad semantics, total pad = k - s per dim) ----
    xp = jnp.pad(x, ((0, 0), (0, 0), _lr(kd - sd), _lr(kh - sh), _lr(kw - sw)))
    Ipd, Iph, Ipw = xp.shape[2:]

    # Output sizes of ConvTranspose3d(stride=s, padding=k-1) applied to xp.
    OD = (Ipd - 1) * sd - kd + 2
    OH = (Iph - 1) * sh - kh + 2
    OW = (Ipw - 1) * sw - kw + 2

    # ---- 2) phase-decomposition parameters ---------------------------------
    kpd, kph, kpw = _cdiv(kd, sd), _cdiv(kh, sh), _cdiv(kw, sw)   # taps / dim
    OPd, OPh, OPw = _cdiv(OD, sd), _cdiv(OH, sh), _cdiv(OW, sw)   # rows / dim
    exd, exh, exw = int(sd > 1), int(sh > 1), int(sw > 1)         # base in {0,1}

    # right pad so every (base + tap) access is in-bounds
    padD = max(0, OPd + kpd - 1 + exd - Ipd)
    padH = max(0, OPh + kph - 1 + exh - Iph)
    padW = max(0, OPw + kpw - 1 + exw - Ipw)
    xp = jnp.pad(xp, ((0, 0), (0, 0), (0, padD), (0, padH), (0, padW)))
    Dp, Hp, Wp = xp.shape[2:]

    # channels-last bf16; flatten H*W so each tap is one contiguous 2-D slice
    x_cl = jnp.transpose(xp, (0, 2, 3, 4, 1)).astype(jnp.bfloat16)
    x_flat = x_cl.reshape(N, Dp, Hp * Wp, Cin)

    Rp = OPh * Wp                                  # rows per grid step
    max_start = (kph - 1 + exh) * Wp + (kpw - 1 + exw)
    HWp = Hp * Wp
    pad_flat = max(0, max_start + Rp - HWp)        # junk rows only; zero pad
    if pad_flat:
        x_flat = jnp.pad(x_flat, ((0, 0), (0, 0), (0, pad_flat), (0, 0)))
    HWp += pad_flat

    # ---- 3) per-phase weights (all taps x Cin folded into one contraction) --
    P = sd * sh * sw
    Kred = kpd * kph * kpw * Cin
    wf = weight[:, :, ::-1, ::-1, ::-1]            # flipped (Cin,Cout,kd,kh,kw)
    wf = jnp.pad(wf, ((0, 0), (0, 0),
                      (0, kpd * sd - kd), (0, kph * sh - kh), (0, kpw * sw - kw)))
    w_phases, phase_info = [], []
    for pd in range(sd):
        t0d, bd = (sd - pd) % sd, (0 if pd == 0 else 1)
        for ph in range(sh):
            t0h, bh = (sh - ph) % sh, (0 if ph == 0 else 1)
            for pw_ in range(sw):
                t0w, bw = (sw - pw_) % sw, (0 if pw_ == 0 else 1)
                w_p = wf[:, :, t0d::sd, t0h::sh, t0w::sw]  # (Cin,Cout,kpd,kph,kpw)
                w_p = jnp.transpose(w_p, (2, 3, 4, 0, 1)).reshape(Kred, Cout)
                w_phases.append(w_p)
                phase_info.append((bd, bh, bw))
    w_all = jnp.stack(w_phases, axis=0).astype(jnp.bfloat16)    # (P, Kred, Cout)
    b2 = bias.astype(jnp.float32).reshape(1, Cout)

    nplanes = kpd + exd           # D planes needed to cover both base offsets

    kernel = _make_kernel(nplanes, phase_info, kpd, kph, kpw, Wp, Rp)

    # ---- 4) BlockSpecs / grid -----------------------------------------------
    # Input D-planes: same array passed nplanes times; index maps don't depend
    # on the (innermost) phase index -> planes stay resident across phases.
    in_specs = [
        pl.BlockSpec((None, None, HWp, Cin),
                     (lambda n, qd, p, j=j: (n, qd + j, 0, 0)))
        for j in range(nplanes)
    ]
    in_specs += [
        pl.BlockSpec((P, Kred, Cout), lambda n, qd, p: (0, 0, 0)),  # weight, 1 DMA
        pl.BlockSpec((1, Cout), lambda n, qd, p: (0, 0)),           # bias, 1 DMA
    ]
    out_spec = pl.BlockSpec((None, None, None, Rp, Cout),
                            lambda n, qd, p: (p, n, qd, 0, 0))

    # per-generation VMEM budget (v5e/v6e: 128 MiB, v7x: 64 MiB per TC)
    est = (2 * nplanes * HWp * Cin * 2        # double-buffered input planes
           + 2 * P * Kred * Cout * 2          # resident weight (2 buffers)
           + 2 * Cout * 4                     # bias
           + 2 * Rp * Cout * 2                # output blocks
           + Rp * Kred * 2 + Rp * Cout * 4)   # in-kernel cols / f32 accumulator
    try:
        cap = int(getattr(pltpu.get_tpu_info(), "vmem_capacity_bytes",
                          128 << 20))
    except Exception:
        cap = 128 << 20
    vmem_limit = int(min(max(2 * est + (8 << 20), 32 << 20), int(cap * 0.8)))

    out_pal = pl.pallas_call(
        kernel,
        out_shape=jax.ShapeDtypeStruct((P, N, OPd, Rp, Cout), jnp.bfloat16),
        grid_spec=pltpu.PrefetchScalarGridSpec(
            num_scalar_prefetch=0,
            grid=(N, OPd, P),
            in_specs=in_specs,
            out_specs=out_spec),
        compiler_params=pltpu.CompilerParams(
            dimension_semantics=("parallel", "parallel", "arbitrary"),
            vmem_limit_bytes=vmem_limit),
    )(*([x_flat] * nplanes), w_all, b2)

    # ---- 5) un-flatten W, drop pad columns, interleave phases, NCDHW --------
    out = out_pal.reshape(sd, sh, sw, N, OPd, OPh, Wp, Cout)[..., :OPw, :]
    out = jnp.transpose(out, (3, 4, 0, 5, 1, 6, 2, 7)).reshape(
        N, OPd * sd, OPh * sh, OPw * sw, Cout)
    out = out[:, :OD, :OH, :OW, :]
    return jnp.transpose(out, (0, 4, 1, 2, 3)).astype(x.dtype)   # NCDHW


def same_pad_conv_transpose3d_ref(x, weight, bias, kernel_size, stride):
    """Pure-JAX (XLA conv) reference for the same forward pass."""
    kd, kh, kw = kernel_size
    sd, sh, sw = stride
    xp = jnp.pad(x, ((0, 0), (0, 0), _lr(kd - sd), _lr(kh - sh), _lr(kw - sw)))
    wf = weight[:, :, ::-1, ::-1, ::-1]
    w_oi = jnp.transpose(wf, (1, 0, 2, 3, 4))             # (Cout, Cin, kd, kh, kw)
    y = jax.lax.conv_general_dilated(
        xp, w_oi, window_strides=(1, 1, 1), padding=[(0, 0)] * 3,
        lhs_dilation=(sd, sh, sw),
        dimension_numbers=('NCDHW', 'OIDHW', 'NCDHW'),
        precision=jax.lax.Precision.HIGHEST)
    return y + bias.reshape(1, -1, 1, 1, 1)


if __name__ == "__main__":
    key = jax.random.PRNGKey(0)
    k1, k2, k3 = jax.random.split(key, 3)

    # Small shapes consistent with the module (in_ch=4, out_ch=6, k=4, s=2).
    N, Cin, Cout = 2, 4, 6
    D, H, W = 4, 6, 6
    kernel_size = (4, 4, 4)
    stride = (2, 2, 2)

    x = jax.random.normal(k1, (N, Cin, D, H, W), jnp.float32)
    weight = 0.1 * jax.random.normal(k2, (Cin, Cout) + kernel_size, jnp.float32)
    bias = 0.1 * jax.random.normal(k3, (Cout,), jnp.float32)

    out = same_pad_conv_transpose3d(x, weight, bias, kernel_size, stride)
    out = jax.block_until_ready(out)
    # "same pad" transposed conv with k=2s: spatial dims scale by exactly s.
    assert out.shape == (N, Cout, 2 * D, 2 * H, 2 * W), out.shape

    ref = same_pad_conv_transpose3d_ref(x, weight, bias, kernel_size, stride)
    max_err = float(jnp.max(jnp.abs(out - ref)))
    # bf16 operands / bf16 output with f32 accumulation -> loosened tolerance.
    assert jnp.allclose(out, ref, atol=3e-2, rtol=3e-2), max_err

    # Mixed-stride / odd-kernel sanity check (review correctness concern).
    ks2, st2 = (3, 4, 3), (2, 1, 2)
    w2 = 0.1 * jax.random.normal(k2, (Cin, Cout) + ks2, jnp.float32)
    out2 = same_pad_conv_transpose3d(x, w2, bias, ks2, st2)
    out2 = jax.block_until_ready(out2)
    ref2 = same_pad_conv_transpose3d_ref(x, w2, bias, ks2, st2)
    max_err2 = float(jnp.max(jnp.abs(out2 - ref2)))
    assert out2.shape == ref2.shape, (out2.shape, ref2.shape)
    assert jnp.allclose(out2, ref2, atol=3e-2, rtol=3e-2), max_err2

    print("KERNEL_OK")
</pallas_src>

<mosaic_0001>
module attributes {stable_mosaic.version = 11 : i64} {
  func.func @kernel(%arg0: i32, %arg1: i32, %arg2: i32, %arg3: memref<1x1x66x4xbf16, #tpu.memory_space<vmem>>, %arg4: memref<1x1x66x4xbf16, #tpu.memory_space<vmem>>, %arg5: memref<1x1x66x4xbf16, #tpu.memory_space<vmem>>, %arg6: memref<8x32x6xbf16, #tpu.memory_space<vmem>>, %arg7: memref<1x6xf32, #tpu.memory_space<vmem>>, %arg8: memref<1x1x1x48x6xbf16, #tpu.memory_space<vmem>>) attributes {dimension_semantics = [#tpu.dimension_semantics<parallel>, #tpu.dimension_semantics<parallel>, #tpu.dimension_semantics<arbitrary>], iteration_bounds = array<i64: 2, 4, 8>, scalar_prefetch = 0 : i64, scratch_operands = 0 : i64, tpu.core_type = #tpu.core_type<tc>, window_params = [{transform_indices = @transform_0, window_bounds = array<i64: 1, 1, 66, 4>}, {transform_indices = @transform_1, window_bounds = array<i64: 1, 1, 66, 4>}, {transform_indices = @transform_2, window_bounds = array<i64: 1, 1, 66, 4>}, {pipeline_mode = #tpu.pipeline_mode<synchronous>, transform_indices = @transform_3, window_bounds = array<i64: 8, 32, 6>}, {pipeline_mode = #tpu.pipeline_mode<synchronous>, transform_indices = @transform_4, window_bounds = array<i64: 1, 6>}, {transform_indices = @transform_5, window_bounds = array<i64: 1, 1, 1, 48, 6>}]} {
    %c0_i32 = arith.constant 0 : i32
    %0 = arith.cmpi eq, %arg2, %c0_i32 : i32
    %1 = arith.extui %0 : i1 to i32
    %c0_i32_0 = arith.constant 0 : i32
    %2 = arith.cmpi ne, %1, %c0_i32_0 : i32
    scf.if %2 {
      %c0 = arith.constant 0 : index
      %c0_8 = arith.constant 0 : index
      %c0_9 = arith.constant 0 : index
      %c0_10 = arith.constant 0 : index
      %24 = vector.load %arg3[%c0, %c0_8, %c0_9, %c0_10] : memref<1x1x66x4xbf16, #tpu.memory_space<vmem>>, vector<1x1x48x4xbf16>
      %25 = vector.shape_cast %24 : vector<1x1x48x4xbf16> to vector<48x4xbf16>
      %c0_11 = arith.constant 0 : index
      %c0_12 = arith.constant 0 : index
      %c1 = arith.constant 1 : index
      %c0_13 = arith.constant 0 : index
      %26 = vector.load %arg3[%c0_11, %c0_12, %c1, %c0_13] : memref<1x1x66x4xbf16, #tpu.memory_space<vmem>>, vector<1x1x48x4xbf16>
      %27 = vector.shape_cast %26 : vector<1x1x48x4xbf16> to vector<48x4xbf16>
      %c0_14 = arith.constant 0 : index
      %c0_15 = arith.constant 0 : index
      %c8 = arith.constant 8 : index
      %c0_16 = arith.constant 0 : index
      %28 = vector.load %arg3[%c0_14, %c0_15, %c8, %c0_16] : memref<1x1x66x4xbf16, #tpu.memory_space<vmem>>, vector<1x1x48x4xbf16>
      %29 = vector.shape_cast %28 : vector<1x1x48x4xbf16> to vector<48x4xbf16>
      %c0_17 = arith.constant 0 : index
      %c0_18 = arith.constant 0 : index
      %c9 = arith.constant 9 : index
      %c0_19 = arith.constant 0 : index
      %30 = vector.load %arg3[%c0_17, %c0_18, %c9, %c0_19] : memref<1x1x66x4xbf16, #tpu.memory_space<vmem>>, vector<1x1x48x4xbf16>
      %31 = vector.shape_cast %30 : vector<1x1x48x4xbf16> to vector<48x4xbf16>
      %c0_20 = arith.constant 0 : index
      %c0_21 = arith.constant 0 : index
      %c0_22 = arith.constant 0 : index
      %c0_23 = arith.constant 0 : index
      %32 = vector.load %arg4[%c0_20, %c0_21, %c0_22, %c0_23] : memref<1x1x66x4xbf16, #tpu.memory_space<vmem>>, vector<1x1x48x4xbf16>
      %33 = vector.shape_cast %32 : vector<1x1x48x4xbf16> to vector<48x4xbf16>
      %c0_24 = arith.constant 0 : index
      %c0_25 = arith.constant 0 : index
      %c1_26 = arith.constant 1 : index
      %c0_27 = arith.constant 0 : index
      %34 = vector.load %arg4[%c0_24, %c0_25, %c1_26, %c0_27] : memref<1x1x66x4xbf16, #tpu.memory_space<vmem>>, vector<1x1x48x4xbf16>
      %35 = vector.shape_cast %34 : vector<1x1x48x4xbf16> to vector<48x4xbf16>
      %c0_28 = arith.constant 0 : index
      %c0_29 = arith.constant 0 : index
      %c8_30 = arith.constant 8 : index
      %c0_31 = arith.constant 0 : index
      %36 = vector.load %arg4[%c0_28, %c0_29, %c8_30, %c0_31] : memref<1x1x66x4xbf16, #tpu.memory_space<vmem>>, vector<1x1x48x4xbf16>
      %37 = vector.shape_cast %36 : vector<1x1x48x4xbf16> to vector<48x4xbf16>
      %c0_32 = arith.constant 0 : index
      %c0_33 = arith.constant 0 : index
      %c9_34 = arith.constant 9 : index
      %c0_35 = arith.constant 0 : index
      %38 = vector.load %arg4[%c0_32, %c0_33, %c9_34, %c0_35] : memref<1x1x66x4xbf16, #tpu.memory_space<vmem>>, vector<1x1x48x4xbf16>
      %39 = vector.shape_cast %38 : vector<1x1x48x4xbf16> to vector<48x4xbf16>
      %40 = tpu.concatenate %25, %27, %29, %31, %33, %35, %37, %39 in 1 : vector<48x4xbf16>, vector<48x4xbf16>, vector<48x4xbf16>, vector<48x4xbf16>, vector<48x4xbf16>, vector<48x4xbf16>, vector<48x4xbf16>, vector<48x4xbf16> -> vector<48x32xbf16>
      %c0_36 = arith.constant 0 : index
      %c0_37 = arith.constant 0 : index
      %c0_38 = arith.constant 0 : index
      %41 = vector.load %arg6[%c0_36, %c0_37, %c0_38] : memref<8x32x6xbf16, #tpu.memory_space<vmem>>, vector<1x32x6xbf16>
      %42 = vector.shape_cast %41 : vector<1x32x6xbf16> to vector<32x6xbf16>
      %cst = arith.constant dense<0.000000e+00> : vector<48x6xf32>
      %43 = tpu.matmul %40, %42, %cst {dimension_numbers = #tpu.dot_dimension_numbers<[1], [0], [0], [1], [0, 0, 1, 1], [], []>} : vector<48x32xbf16>, vector<32x6xbf16>, vector<48x6xf32> -> vector<48x6xf32>
      %c0_39 = arith.constant 0 : index
      %c0_40 = arith.constant 0 : index
      %44 = vector.load %arg7[%c0_39, %c0_40] : memref<1x6xf32, #tpu.memory_space<vmem>>, vector<1x6xf32>
      %45 = vector.broadcast %44 : vector<1x6xf32> to vector<48x6xf32>
      %46 = arith.addf %43, %45 : vector<48x6xf32>
      %47 = arith.truncf %46 : vector<48x6xf32> to vector<48x6xbf16>
      %c0_41 = arith.constant 0 : index
      %c0_42 = arith.constant 0 : index
      %c0_43 = arith.constant 0 : index
      %c0_44 = arith.constant 0 : index
      %c0_45 = arith.constant 0 : index
      %48 = vector.load %arg8[%c0_41, %c0_42, %c0_43, %c0_44, %c0_45] : memref<1x1x1x48x6xbf16, #tpu.memory_space<vmem>>, vector<1x1x1x48x6xbf16>
      %49 = vector.shape_cast %48 : vector<1x1x1x48x6xbf16> to vector<48x6xbf16>
      %50 = vector.shape_cast %47 : vector<48x6xbf16> to vector<1x1x1x48x6xbf16>
      tpu.vector_store %arg8[%c0_41, %c0_42, %c0_43, %c0_44, %c0_45], %50 {strides = array<i32>} : memref<1x1x1x48x6xbf16, #tpu.memory_space<vmem>>, vector<1x1x1x48x6xbf16>,
    } else {
    }
    %c1_i32 = arith.constant 1 : i32
    %3 = arith.cmpi eq, %arg2, %c1_i32 : i32
    %4 = arith.extui %3 : i1 to i32
    %c0_i32_1 = arith.constant 0 : i32
    %5 = arith.cmpi ne, %4, %c0_i32_1 : i32
    scf.if %5 {
      %c0 = arith.constant 0 : index
      %c0_8 = arith.constant 0 : index
      %c1 = arith.constant 1 : index
      %c0_9 = arith.constant 0 : index
      %24 = vector.load %arg3[%c0, %c0_8, %c1, %c0_9] : memref<1x1x66x4xbf16, #tpu.memory_space<vmem>>, vector<1x1x48x4xbf16>
      %25 = vector.shape_cast %24 : vector<1x1x48x4xbf16> to vector<48x4xbf16>
      %c0_10 = arith.constant 0 : index
      %c0_11 = arith.constant 0 : index
      %c2 = arith.constant 2 : index
      %c0_12 = arith.constant 0 : index
      %26 = vector.load %arg3[%c0_10, %c0_11, %c2, %c0_12] : memref<1x1x66x4xbf16, #tpu.memory_space<vmem>>, vector<1x1x48x4xbf16>
      %27 = vector.shape_cast %26 : vector<1x1x48x4xbf16> to vector<48x4xbf16>
      %c0_13 = arith.constant 0 : index
      %c0_14 = arith.constant 0 : index
      %c9 = arith.constant 9 : index
      %c0_15 = arith.constant 0 : index
      %28 = vector.load %arg3[%c0_13, %c0_14, %c9, %c0_15] : memref<1x1x66x4xbf16, #tpu.memory_space<vmem>>, vector<1x1x48x4xbf16>
      %29 = vector.shape_cast %28 : vector<1x1x48x4xbf16> to vector<48x4xbf16>
      %c0_16 = arith.constant 0 : index
      %c0_17 = arith.constant 0 : index
      %c10 = arith.constant 10 : index
      %c0_18 = arith.constant 0 : index
      %30 = vector.load %arg3[%c0_16, %c0_17, %c10, %c0_18] : memref<1x1x66x4xbf16, #tpu.memory_space<vmem>>, vector<1x1x48x4xbf16>
      %31 = vector.shape_cast %30 : vector<1x1x48x4xbf16> to vector<48x4xbf16>
      %c0_19 = arith.constant 0 : index
      %c0_20 = arith.constant 0 : index
      %c1_21 = arith.constant 1 : index
      %c0_22 = arith.constant 0 : index
      %32 = vector.load %arg4[%c0_19, %c0_20, %c1_21, %c0_22] : memref<1x1x66x4xbf16, #tpu.memory_space<vmem>>, vector<1x1x48x4xbf16>
      %33 = vector.shape_cast %32 : vector<1x1x48x4xbf16> to vector<48x4xbf16>
      %c0_23 = arith.constant 0 : index
      %c0_24 = arith.constant 0 : index
      %c2_25 = arith.constant 2 : index
      %c0_26 = arith.constant 0 : index
      %34 = vector.load %arg4[%c0_23, %c0_24, %c2_25, %c0_26] : memref<1x1x66x4xbf16, #tpu.memory_space<vmem>>, vector<1x1x48x4xbf16>
      %35 = vector.shape_cast %34 : vector<1x1x48x4xbf16> to vector<48x4xbf16>
      %c0_27 = arith.constant 0 : index
      %c0_28 = arith.constant 0 : index
      %c9_29 = arith.constant 9 : index
      %c0_30 = arith.constant 0 : index
      %36 = vector.load %arg4[%c0_27, %c0_28, %c9_29, %c0_30] : memref<1x1x66x4xbf16, #tpu.memory_space<vmem>>, vector<1x1x48x4xbf16>
      %37 = vector.shape_cast %36 : vector<1x1x48x4xbf16> to vector<48x4xbf16>
      %c0_31 = arith.constant 0 : index
      %c0_32 = arith.constant 0 : index
      %c10_33 = arith.constant 10 : index
      %c0_34 = arith.constant 0 : index
      %38 = vector.load %arg4[%c0_31, %c0_32, %c10_33, %c0_34] : memref<1x1x66x4xbf16, #tpu.memory_space<vmem>>, vector<1x1x48x4xbf16>
      %39 = vector.shape_cast %38 : vector<1x1x48x4xbf16> to vector<48x4xbf16>
      %40 = tpu.concatenate %25, %27, %29, %31, %33, %35, %37, %39 in 1 : vector<48x4xbf16>, vector<48x4xbf16>, vector<48x4xbf16>, vector<48x4xbf16>, vector<48x4xbf16>, vector<48x4xbf16>, vector<48x4xbf16>, vector<48x4xbf16> -> vector<48x32xbf16>
      %c1_35 = arith.constant 1 : index
      %c0_36 = arith.constant 0 : index
      %c0_37 = arith.constant 0 : index
      %41 = vector.load %arg6[%c1_35, %c0_36, %c0_37] : memref<8x32x6xbf16, #tpu.memory_space<vmem>>, vector<1x32x6xbf16>
      %42 = vector.shape_cast %41 : vector<1x32x6xbf16> to vector<32x6xbf16>
      %cst = arith.constant dense<0.000000e+00> : vector<48x6xf32>
      %43 = tpu.matmul %40, %42, %cst {dimension_numbers = #tpu.dot_dimension_numbers<[1], [0], [0], [1], [0, 0, 1, 1], [], []>} : vector<48x32xbf16>, vector<32x6xbf16>, vector<48x6xf32> -> vector<48x6xf32>
      %c0_38 = arith.constant 0 : index
      %c0_39 = arith.constant 0 : index
      %44 = vector.load %arg7[%c0_38, %c0_39] : memref<1x6xf32, #tpu.memory_space<vmem>>, vector<1x6xf32>
      %45 = vector.broadcast %44 : vector<1x6xf32> to vector<48x6xf32>
      %46 = arith.addf %43, %45 : vector<48x6xf32>
      %47 = arith.truncf %46 : vector<48x6xf32> to vector<48x6xbf16>
      %c0_40 = arith.constant 0 : index
      %c0_41 = arith.constant 0 : index
      %c0_42 = arith.constant 0 : index
      %c0_43 = arith.constant 0 : index
      %c0_44 = arith.constant 0 : index
      %48 = vector.load %arg8[%c0_40, %c0_41, %c0_42, %c0_43, %c0_44] : memref<1x1x1x48x6xbf16, #tpu.memory_space<vmem>>, vector<1x1x1x48x6xbf16>
      %49 = vector.shape_cast %48 : vector<1x1x1x48x6xbf16> to vector<48x6xbf16>
      %50 = vector.shape_cast %47 : vector<48x6xbf16> to vector<1x1x1x48x6xbf16>
      tpu.vector_store %arg8[%c0_40, %c0_41, %c0_42, %c0_43, %c0_44], %50 {strides = array<i32>} : memref<1x1x1x48x6xbf16, #tpu.memory_space<vmem>>, vector<1x1x1x48x6xbf16>,
    } else {
    }
    %c2_i32 = arith.constant 2 : i32
    %6 = arith.cmpi eq, %arg2, %c2_i32 : i32
    %7 = arith.extui %6 : i1 to i32
    %c0_i32_2 = arith.constant 0 : i32
    %8 = arith.cmpi ne, %7, %c0_i32_2 : i32
    scf.if %8 {
      %c0 = arith.constant 0 : index
      %c0_8 = arith.constant 0 : index
      %c8 = arith.constant 8 : index
      %c0_9 = arith.constant 0 : index
      %24 = vector.load %arg3[%c0, %c0_8, %c8, %c0_9] : memref<1x1x66x4xbf16, #tpu.memory_space<vmem>>, vector<1x1x48x4xbf16>
      %25 = vector.shape_cast %24 : vector<1x1x48x4xbf16> to vector<48x4xbf16>
      %c0_10 = arith.constant 0 : index
      %c0_11 = arith.constant 0 : index
      %c9 = arith.constant 9 : index
      %c0_12 = arith.constant 0 : index
      %26 = vector.load %arg3[%c0_10, %c0_11, %c9, %c0_12] : memref<1x1x66x4xbf16, #tpu.memory_space<vmem>>, vector<1x1x48x4xbf16>
      %27 = vector.shape_cast %26 : vector<1x1x48x4xbf16> to vector<48x4xbf16>
      %c0_13 = arith.constant 0 : index
      %c0_14 = arith.constant 0 : index
      %c16 = arith.constant 16 : index
      %c0_15 = arith.constant 0 : index
      %28 = vector.load %arg3[%c0_13, %c0_14, %c16, %c0_15] : memref<1x1x66x4xbf16, #tpu.memory_space<vmem>>, vector<1x1x48x4xbf16>
      %29 = vector.shape_cast %28 : vector<1x1x48x4xbf16> to vector<48x4xbf16>
      %c0_16 = arith.constant 0 : index
      %c0_17 = arith.constant 0 : index
      %c17 = arith.constant 17 : index
      %c0_18 = arith.constant 0 : index
      %30 = vector.load %arg3[%c0_16, %c0_17, %c17, %c0_18] : memref<1x1x66x4xbf16, #tpu.memory_space<vmem>>, vector<1x1x48x4xbf16>
      %31 = vector.shape_cast %30 : vector<1x1x48x4xbf16> to vector<48x4xbf16>
      %c0_19 = arith.constant 0 : index
      %c0_20 = arith.constant 0 : index
      %c8_21 = arith.constant 8 : index
      %c0_22 = arith.constant 0 : index
      %32 = vector.load %arg4[%c0_19, %c0_20, %c8_21, %c0_22] : memref<1x1x66x4xbf16, #tpu.memory_space<vmem>>, vector<1x1x48x4xbf16>
      %33 = vector.shape_cast %32 : vector<1x1x48x4xbf16> to vector<48x4xbf16>
      %c0_23 = arith.constant 0 : index
      %c0_24 = arith.constant 0 : index
      %c9_25 = arith.constant 9 : index
      %c0_26 = arith.constant 0 : index
      %34 = vector.load %arg4[%c0_23, %c0_24, %c9_25, %c0_26] : memref<1x1x66x4xbf16, #tpu.memory_space<vmem>>, vector<1x1x48x4xbf16>
      %35 = vector.shape_cast %34 : vector<1x1x48x4xbf16> to vector<48x4xbf16>
      %c0_27 = arith.constant 0 : index
      %c0_28 = arith.constant 0 : index
      %c16_29 = arith.constant 16 : index
      %c0_30 = arith.constant 0 : index
      %36 = vector.load %arg4[%c0_27, %c0_28, %c16_29, %c0_30] : memref<1x1x66x4xbf16, #tpu.memory_space<vmem>>, vector<1x1x48x4xbf16>
      %37 = vector.shape_cast %36 : vector<1x1x48x4xbf16> to vector<48x4xbf16>
      %c0_31 = arith.constant 0 : index
      %c0_32 = arith.constant 0 : index
      %c17_33 = arith.constant 17 : index
      %c0_34 = arith.constant 0 : index
      %38 = vector.load %arg4[%c0_31, %c0_32, %c17_33, %c0_34] : memref<1x1x66x4xbf16, #tpu.memory_space<vmem>>, vector<1x1x48x4xbf16>
      %39 = vector.shape_cast %38 : vector<1x1x48x4xbf16> to vector<48x4xbf16>
      %40 = tpu.concatenate %25, %27, %29, %31, %33, %35, %37, %39 in 1 : vector<48x4xbf16>, vector<48x4xbf16>, vector<48x4xbf16>, vector<48x4xbf16>, vector<48x4xbf16>, vector<48x4xbf16>, vector<48x4xbf16>, vector<48x4xbf16> -> vector<48x32xbf16>
      %c2 = arith.constant 2 : index
      %c0_35 = arith.constant 0 : index
      %c0_36 = arith.constant 0 : index
      %41 = vector.load %arg6[%c2, %c0_35, %c0_36] : memref<8x32x6xbf16, #tpu.memory_space<vmem>>, vector<1x32x6xbf16>
      %42 = vector.shape_cast %41 : vector<1x32x6xbf16> to vector<32x6xbf16>
      %cst = arith.constant dense<0.000000e+00> : vector<48x6xf32>
      %43 = tpu.matmul %40, %42, %cst {dimension_numbers = #tpu.dot_dimension_numbers<[1], [0], [0], [1], [0, 0, 1, 1], [], []>} : vector<48x32xbf16>, vector<32x6xbf16>, vector<48x6xf32> -> vector<48x6xf32>
      %c0_37 = arith.constant 0 : index
      %c0_38 = arith.constant 0 : index
      %44 = vector.load %arg7[%c0_37, %c0_38] : memref<1x6xf32, #tpu.memory_space<vmem>>, vector<1x6xf32>
      %45 = vector.broadcast %44 : vector<1x6xf32> to vector<48x6xf32>
      %46 = arith.addf %43, %45 : vector<48x6xf32>
      %47 = arith.truncf %46 : vector<48x6xf32> to vector<48x6xbf16>
      %c0_39 = arith.constant 0 : index
      %c0_40 = arith.constant 0 : index
      %c0_41 = arith.constant 0 : index
      %c0_42 = arith.constant 0 : index
      %c0_43 = arith.constant 0 : index
      %48 = vector.load %arg8[%c0_39, %c0_40, %c0_41, %c0_42, %c0_43] : memref<1x1x1x48x6xbf16, #tpu.memory_space<vmem>>, vector<1x1x1x48x6xbf16>
      %49 = vector.shape_cast %48 : vector<1x1x1x48x6xbf16> to vector<48x6xbf16>
      %50 = vector.shape_cast %47 : vector<48x6xbf16> to vector<1x1x1x48x6xbf16>
      tpu.vector_store %arg8[%c0_39, %c0_40, %c0_41, %c0_42, %c0_43], %50 {strides = array<i32>} : memref<1x1x1x48x6xbf16, #tpu.memory_space<vmem>>, vector<1x1x1x48x6xbf16>,
    } else {
    }
    %c3_i32 = arith.constant 3 : i32
    %9 = arith.cmpi eq, %arg2, %c3_i32 : i32
    %10 = arith.extui %9 : i1 to i32
    %c0_i32_3 = arith.constant 0 : i32
    %11 = arith.cmpi ne, %10, %c0_i32_3 : i32
    scf.if %11 {
      %c0 = arith.constant 0 : index
      %c0_8 = arith.constant 0 : index
      %c9 = arith.constant 9 : index
      %c0_9 = arith.constant 0 : index
      %24 = vector.load %arg3[%c0, %c0_8, %c9, %c0_9] : memref<1x1x66x4xbf16, #tpu.memory_space<vmem>>, vector<1x1x48x4xbf16>
      %25 = vector.shape_cast %24 : vector<1x1x48x4xbf16> to vector<48x4xbf16>
      %c0_10 = arith.constant 0 : index
      %c0_11 = arith.constant 0 : index
      %c10 = arith.constant 10 : index
      %c0_12 = arith.constant 0 : index
      %26 = vector.load %arg3[%c0_10, %c0_11, %c10, %c0_12] : memref<1x1x66x4xbf16, #tpu.memory_space<vmem>>, vector<1x1x48x4xbf16>
      %27 = vector.shape_cast %26 : vector<1x1x48x4xbf16> to vector<48x4xbf16>
      %c0_13 = arith.constant 0 : index
      %c0_14 = arith.constant 0 : index
      %c17 = arith.constant 17 : index
      %c0_15 = arith.constant 0 : index
      %28 = vector.load %arg3[%c0_13, %c0_14, %c17, %c0_15] : memref<1x1x66x4xbf16, #tpu.memory_space<vmem>>, vector<1x1x48x4xbf16>
      %29 = vector.shape_cast %28 : vector<1x1x48x4xbf16> to vector<48x4xbf16>
      %c0_16 = arith.constant 0 : index
      %c0_17 = arith.constant 0 : index
      %c18 = arith.constant 18 : index
      %c0_18 = arith.constant 0 : index
      %30 = vector.load %arg3[%c0_16, %c0_17, %c18, %c0_18] : memref<1x1x66x4xbf16, #tpu.memory_space<vmem>>, vector<1x1x48x4xbf16>
      %31 = vector.shape_cast %30 : vector<1x1x48x4xbf16> to vector<48x4xbf16>
      %c0_19 = arith.constant 0 : index
      %c0_20 = arith.constant 0 : index
      %c9_21 = arith.constant 9 : index
      %c0_22 = arith.constant 0 : index
      %32 = vector.load %arg4[%c0_19, %c0_20, %c9_21, %c0_22] : memref<1x1x66x4xbf16, #tpu.memory_space<vmem>>, vector<1x1x48x4xbf16>
      %33 = vector.shape_cast %32 : vector<1x1x48x4xbf16> to vector<48x4xbf16>
      %c0_23 = arith.constant 0 : index
      %c0_24 = arith.constant 0 : index
      %c10_25 = arith.constant 10 : index
      %c0_26 = arith.constant 0 : index
      %34 = vector.load %arg4[%c0_23, %c0_24, %c10_25, %c0_26] : memref<1x1x66x4xbf16, #tpu.memory_space<vmem>>, vector<1x1x48x4xbf16>
      %35 = vector.shape_cast %34 : vector<1x1x48x4xbf16> to vector<48x4xbf16>
      %c0_27 = arith.constant 0 : index
      %c0_28 = arith.constant 0 : index
      %c17_29 = arith.constant 17 : index
      %c0_30 = arith.constant 0 : index
      %36 = vector.load %arg4[%c0_27, %c0_28, %c17_29, %c0_30] : memref<1x1x66x4xbf16, #tpu.memory_space<vmem>>, vector<1x1x48x4xbf16>
      %37 = vector.shape_cast %36 : vector<1x1x48x4xbf16> to vector<48x4xbf16>
      %c0_31 = arith.constant 0 : index
      %c0_32 = arith.constant 0 : index
      %c18_33 = arith.constant 18 : index
      %c0_34 = arith.constant 0 : index
      %38 = vector.load %arg4[%c0_31, %c0_32, %c18_33, %c0_34] : memref<1x1x66x4xbf16, #tpu.memory_space<vmem>>, vector<1x1x48x4xbf16>
      %39 = vector.shape_cast %38 : vector<1x1x48x4xbf16> to vector<48x4xbf16>
      %40 = tpu.concatenate %25, %27, %29, %31, %33, %35, %37, %39 in 1 : vector<48x4xbf16>, vector<48x4xbf16>, vector<48x4xbf16>, vector<48x4xbf16>, vector<48x4xbf16>, vector<48x4xbf16>, vector<48x4xbf16>, vector<48x4xbf16> -> vector<48x32xbf16>
      %c3 = arith.constant 3 : index
      %c0_35 = arith.constant 0 : index
      %c0_36 = arith.constant 0 : index
      %41 = vector.load %arg6[%c3, %c0_35, %c0_36] : memref<8x32x6xbf16, #tpu.memory_space<vmem>>, vector<1x32x6xbf16>
      %42 = vector.shape_cast %41 : vector<1x32x6xbf16> to vector<32x6xbf16>
      %cst = arith.constant dense<0.000000e+00> : vector<48x6xf32>
      %43 = tpu.matmul %40, %42, %cst {dimension_numbers = #tpu.dot_dimension_numbers<[1], [0], [0], [1], [0, 0, 1, 1], [], []>} : vector<48x32xbf16>, vector<32x6xbf16>, vector<48x6xf32> -> vector<48x6xf32>
      %c0_37 = arith.constant 0 : index
      %c0_38 = arith.constant 0 : index
      %44 = vector.load %arg7[%c0_37, %c0_38] : memref<1x6xf32, #tpu.memory_space<vmem>>, vector<1x6xf32>
      %45 = vector.broadcast %44 : vector<1x6xf32> to vector<48x6xf32>
      %46 = arith.addf %43, %45 : vector<48x6xf32>
      %47 = arith.truncf %46 : vector<48x6xf32> to vector<48x6xbf16>
      %c0_39 = arith.constant 0 : index
      %c0_40 = arith.constant 0 : index
      %c0_41 = arith.constant 0 : index
      %c0_42 = arith.constant 0 : index
      %c0_43 = arith.constant 0 : index
      %48 = vector.load %arg8[%c0_39, %c0_40, %c0_41, %c0_42, %c0_43] : memref<1x1x1x48x6xbf16, #tpu.memory_space<vmem>>, vector<1x1x1x48x6xbf16>
      %49 = vector.shape_cast %48 : vector<1x1x1x48x6xbf16> to vector<48x6xbf16>
      %50 = vector.shape_cast %47 : vector<48x6xbf16> to vector<1x1x1x48x6xbf16>
      tpu.vector_store %arg8[%c0_39, %c0_40, %c0_41, %c0_42, %c0_43], %50 {strides = array<i32>} : memref<1x1x1x48x6xbf16, #tpu.memory_space<vmem>>, vector<1x1x1x48x6xbf16>,
    } else {
    }
    %c4_i32 = arith.constant 4 : i32
    %12 = arith.cmpi eq, %arg2, %c4_i32 : i32
    %13 = arith.extui %12 : i1 to i32
    %c0_i32_4 = arith.constant 0 : i32
    %14 = arith.cmpi ne, %13, %c0_i32_4 : i32
    scf.if %14 {
      %c0 = arith.constant 0 : index
      %c0_8 = arith.constant 0 : index
      %c0_9 = arith.constant 0 : index
      %c0_10 = arith.constant 0 : index
      %24 = vector.load %arg4[%c0, %c0_8, %c0_9, %c0_10] : memref<1x1x66x4xbf16, #tpu.memory_space<vmem>>, vector<1x1x48x4xbf16>
      %25 = vector.shape_cast %24 : vector<1x1x48x4xbf16> to vector<48x4xbf16>
      %c0_11 = arith.constant 0 : index
      %c0_12 = arith.constant 0 : index
      %c1 = arith.constant 1 : index
      %c0_13 = arith.constant 0 : index
      %26 = vector.load %arg4[%c0_11, %c0_12, %c1, %c0_13] : memref<1x1x66x4xbf16, #tpu.memory_space<vmem>>, vector<1x1x48x4xbf16>
      %27 = vector.shape_cast %26 : vector<1x1x48x4xbf16> to vector<48x4xbf16>
      %c0_14 = arith.constant 0 : index
      %c0_15 = arith.constant 0 : index
      %c8 = arith.constant 8 : index
      %c0_16 = arith.constant 0 : index
      %28 = vector.load %arg4[%c0_14, %c0_15, %c8, %c0_16] : memref<1x1x66x4xbf16, #tpu.memory_space<vmem>>, vector<1x1x48x4xbf16>
      %29 = vector.shape_cast %28 : vector<1x1x48x4xbf16> to vector<48x4xbf16>
      %c0_17 = arith.constant 0 : index
      %c0_18 = arith.constant 0 : index
      %c9 = arith.constant 9 : index
      %c0_19 = arith.constant 0 : index
      %30 = vector.load %arg4[%c0_17, %c0_18, %c9, %c0_19] : memref<1x1x66x4xbf16, #tpu.memory_space<vmem>>, vector<1x1x48x4xbf16>
      %31 = vector.shape_cast %30 : vector<1x1x48x4xbf16> to vector<48x4xbf16>
      %c0_20 = arith.constant 0 : index
      %c0_21 = arith.constant 0 : index
      %c0_22 = arith.constant 0 : index
      %c0_23 = arith.constant 0 : index
      %32 = vector.load %arg5[%c0_20, %c0_21, %c0_22, %c0_23] : memref<1x1x66x4xbf16, #tpu.memory_space<vmem>>, vector<1x1x48x4xbf16>
      %33 = vector.shape_cast %32 : vector<1x1x48x4xbf16> to vector<48x4xbf16>
      %c0_24 = arith.constant 0 : index
      %c0_25 = arith.constant 0 : index
      %c1_26 = arith.constant 1 : index
      %c0_27 = arith.constant 0 : index
      %34 = vector.load %arg5[%c0_24, %c0_25, %c1_26, %c0_27] : memref<1x1x66x4xbf16, #tpu.memory_space<vmem>>, vector<1x1x48x4xbf16>
      %35 = vector.shape_cast %34 : vector<1x1x48x4xbf16> to vector<48x4xbf16>
      %c0_28 = arith.constant 0 : index
      %c0_29 = arith.constant 0 : index
      %c8_30 = arith.constant 8 : index
      %c0_31 = arith.constant 0 : index
      %36 = vector.load %arg5[%c0_28, %c0_29, %c8_30, %c0_31] : memref<1x1x66x4xbf16, #tpu.memory_space<vmem>>, vector<1x1x48x4xbf16>
      %37 = vector.shape_cast %36 : vector<1x1x48x4xbf16> to vector<48x4xbf16>
      %c0_32 = arith.constant 0 : index
      %c0_33 = arith.constant 0 : index
      %c9_34 = arith.constant 9 : index
      %c0_35 = arith.constant 0 : index
      %38 = vector.load %arg5[%c0_32, %c0_33, %c9_34, %c0_35] : memref<1x1x66x4xbf16, #tpu.memory_space<vmem>>, vector<1x1x48x4xbf16>
      %39 = vector.shape_cast %38 : vector<1x1x48x4xbf16> to vector<48x4xbf16>
      %40 = tpu.concatenate %25, %27, %29, %31, %33, %35, %37, %39 in 1 : vector<48x4xbf16>, vector<48x4xbf16>, vector<48x4xbf16>, vector<48x4xbf16>, vector<48x4xbf16>, vector<48x4xbf16>, vector<48x4xbf16>, vector<48x4xbf16> -> vector<48x32xbf16>
      %c4 = arith.constant 4 : index
      %c0_36 = arith.constant 0 : index
      %c0_37 = arith.constant 0 : index
      %41 = vector.load %arg6[%c4, %c0_36, %c0_37] : memref<8x32x6xbf16, #tpu.memory_space<vmem>>, vector<1x32x6xbf16>
      %42 = vector.shape_cast %41 : vector<1x32x6xbf16> to vector<32x6xbf16>
      %cst = arith.constant dense<0.000000e+00> : vector<48x6xf32>
      %43 = tpu.matmul %40, %42, %cst {dimension_numbers = #tpu.dot_dimension_numbers<[1], [0], [0], [1], [0, 0, 1, 1], [], []>} : vector<48x32xbf16>, vector<32x6xbf16>, vector<48x6xf32> -> vector<48x6xf32>
      %c0_38 = arith.constant 0 : index
      %c0_39 = arith.constant 0 : index
      %44 = vector.load %arg7[%c0_38, %c0_39] : memref<1x6xf32, #tpu.memory_space<vmem>>, vector<1x6xf32>
      %45 = vector.broadcast %44 : vector<1x6xf32> to vector<48x6xf32>
      %46 = arith.addf %43, %45 : vector<48x6xf32>
      %47 = arith.truncf %46 : vector<48x6xf32> to vector<48x6xbf16>
      %c0_40 = arith.constant 0 : index
      %c0_41 = arith.constant 0 : index
      %c0_42 = arith.constant 0 : index
      %c0_43 = arith.constant 0 : index
      %c0_44 = arith.constant 0 : index
      %48 = vector.load %arg8[%c0_40, %c0_41, %c0_42, %c0_43, %c0_44] : memref<1x1x1x48x6xbf16, #tpu.memory_space<vmem>>, vector<1x1x1x48x6xbf16>
      %49 = vector.shape_cast %48 : vector<1x1x1x48x6xbf16> to vector<48x6xbf16>
      %50 = vector.shape_cast %47 : vector<48x6xbf16> to vector<1x1x1x48x6xbf16>
      tpu.vector_store %arg8[%c0_40, %c0_41, %c0_42, %c0_43, %c0_44], %50 {strides = array<i32>} : memref<1x1x1x48x6xbf16, #tpu.memory_space<vmem>>, vector<1x1x1x48x6xbf16>,
    } else {
    }
    %c5_i32 = arith.constant 5 : i32
    %15 = arith.cmpi eq, %arg2, %c5_i32 : i32
    %16 = arith.extui %15 : i1 to i32
    %c0_i32_5 = arith.constant 0 : i32
    %17 = arith.cmpi ne, %16, %c0_i32_5 : i32
    scf.if %17 {
      %c0 = arith.constant 0 : index
      %c0_8 = arith.constant 0 : index
      %c1 = arith.constant 1 : index
      %c0_9 = arith.constant 0 : index
      %24 = vector.load %arg4[%c0, %c0_8, %c1, %c0_9] : memref<1x1x66x4xbf16, #tpu.memory_space<vmem>>, vector<1x1x48x4xbf16>
      %25 = vector.shape_cast %24 : vector<1x1x48x4xbf16> to vector<48x4xbf16>
      %c0_10 = arith.constant 0 : index
      %c0_11 = arith.constant 0 : index
      %c2 = arith.constant 2 : index
      %c0_12 = arith.constant 0 : index
      %26 = vector.load %arg4[%c0_10, %c0_11, %c2, %c0_12] : memref<1x1x66x4xbf16, #tpu.memory_space<vmem>>, vector<1x1x48x4xbf16>
      %27 = vector.shape_cast %26 : vector<1x1x48x4xbf16> to vector<48x4xbf16>
      %c0_13 = arith.constant 0 : index
      %c0_14 = arith.constant 0 : index
      %c9 = arith.constant 9 : index
      %c0_15 = arith.constant 0 : index
      %28 = vector.load %arg4[%c0_13, %c0_14, %c9, %c0_15] : memref<1x1x66x4xbf16, #tpu.memory_space<vmem>>, vector<1x1x48x4xbf16>
      %29 = vector.shape_cast %28 : vector<1x1x48x4xbf16> to vector<48x4xbf16>
      %c0_16 = arith.constant 0 : index
      %c0_17 = arith.constant 0 : index
      %c10 = arith.constant 10 : index
      %c0_18 = arith.constant 0 : index
      %30 = vector.load %arg4[%c0_16, %c0_17, %c10, %c0_18] : memref<1x1x66x4xbf16, #tpu.memory_space<vmem>>, vector<1x1x48x4xbf16>
      %31 = vector.shape_cast %30 : vector<1x1x48x4xbf16> to vector<48x4xbf16>
      %c0_19 = arith.constant 0 : index
      %c0_20 = arith.constant 0 : index
      %c1_21 = arith.constant 1 : index
      %c0_22 = arith.constant 0 : index
      %32 = vector.load %arg5[%c0_19, %c0_20, %c1_21, %c0_22] : memref<1x1x66x4xbf16, #tpu.memory_space<vmem>>, vector<1x1x48x4xbf16>
      %33 = vector.shape_cast %32 : vector<1x1x48x4xbf16> to vector<48x4xbf16>
      %c0_23 = arith.constant 0 : index
      %c0_24 = arith.constant 0 : index
      %c2_25 = arith.constant 2 : index
      %c0_26 = arith.constant 0 : index
      %34 = vector.load %arg5[%c0_23, %c0_24, %c2_25, %c0_26] : memref<1x1x66x4xbf16, #tpu.memory_space<vmem>>, vector<1x1x48x4xbf16>
      %35 = vector.shape_cast %34 : vector<1x1x48x4xbf16> to vector<48x4xbf16>
      %c0_27 = arith.constant 0 : index
      %c0_28 = arith.constant 0 : index
      %c9_29 = arith.constant 9 : index
      %c0_30 = arith.constant 0 : index
      %36 = vector.load %arg5[%c0_27, %c0_28, %c9_29, %c0_30] : memref<1x1x66x4xbf16, #tpu.memory_space<vmem>>, vector<1x1x48x4xbf16>
      %37 = vector.shape_cast %36 : vector<1x1x48x4xbf16> to vector<48x4xbf16>
      %c0_31 = arith.constant 0 : index
      %c0_32 = arith.constant 0 : index
      %c10_33 = arith.constant 10 : index
      %c0_34 = arith.constant 0 : index
      %38 = vector.load %arg5[%c0_31, %c0_32, %c10_33, %c0_34] : memref<1x1x66x4xbf16, #tpu.memory_space<vmem>>, vector<1x1x48x4xbf16>
      %39 = vector.shape_cast %38 : vector<1x1x48x4xbf16> to vector<48x4xbf16>
      %40 = tpu.concatenate %25, %27, %29, %31, %33, %35, %37, %39 in 1 : vector<48x4xbf16>, vector<48x4xbf16>, vector<48x4xbf16>, vector<48x4xbf16>, vector<48x4xbf16>, vector<48x4xbf16>, vector<48x4xbf16>, vector<48x4xbf16> -> vector<48x32xbf16>
      %c5 = arith.constant 5 : index
      %c0_35 = arith.constant 0 : index
      %c0_36 = arith.constant 0 : index
      %41 = vector.load %arg6[%c5, %c0_35, %c0_36] : memref<8x32x6xbf16, #tpu.memory_space<vmem>>, vector<1x32x6xbf16>
      %42 = vector.shape_cast %41 : vector<1x32x6xbf16> to vector<32x6xbf16>
      %cst = arith.constant dense<0.000000e+00> : vector<48x6xf32>
      %43 = tpu.matmul %40, %42, %cst {dimension_numbers = #tpu.dot_dimension_numbers<[1], [0], [0], [1], [0, 0, 1, 1], [], []>} : vector<48x32xbf16>, vector<32x6xbf16>, vector<48x6xf32> -> vector<48x6xf32>
      %c0_37 = arith.constant 0 : index
      %c0_38 = arith.constant 0 : index
      %44 = vector.load %arg7[%c0_37, %c0_38] : memref<1x6xf32, #tpu.memory_space<vmem>>, vector<1x6xf32>
      %45 = vector.broadcast %44 : vector<1x6xf32> to vector<48x6xf32>
      %46 = arith.addf %43, %45 : vector<48x6xf32>
      %47 = arith.truncf %46 : vector<48x6xf32> to vector<48x6xbf16>
      %c0_39 = arith.constant 0 : index
      %c0_40 = arith.constant 0 : index
      %c0_41 = arith.constant 0 : index
      %c0_42 = arith.constant 0 : index
      %c0_43 = arith.constant 0 : index
      %48 = vector.load %arg8[%c0_39, %c0_40, %c0_41, %c0_42, %c0_43] : memref<1x1x1x48x6xbf16, #tpu.memory_space<vmem>>, vector<1x1x1x48x6xbf16>
      %49 = vector.shape_cast %48 : vector<1x1x1x48x6xbf16> to vector<48x6xbf16>
      %50 = vector.shape_cast %47 : vector<48x6xbf16> to vector<1x1x1x48x6xbf16>
      tpu.vector_store %arg8[%c0_39, %c0_40, %c0_41, %c0_42, %c0_43], %50 {strides = array<i32>} : memref<1x1x1x48x6xbf16, #tpu.memory_space<vmem>>, vector<1x1x1x48x6xbf16>,
    } else {
    }
    %c6_i32 = arith.constant 6 : i32
    %18 = arith.cmpi eq, %arg2, %c6_i32 : i32
    %19 = arith.extui %18 : i1 to i32
    %c0_i32_6 = arith.constant 0 : i32
    %20 = arith.cmpi ne, %19, %c0_i32_6 : i32
    scf.if %20 {
      %c0 = arith.constant 0 : index
      %c0_8 = arith.constant 0 : index
      %c8 = arith.constant 8 : index
      %c0_9 = arith.constant 0 : index
      %24 = vector.load %arg4[%c0, %c0_8, %c8, %c0_9] : memref<1x1x66x4xbf16, #tpu.memory_space<vmem>>, vector<1x1x48x4xbf16>
      %25 = vector.shape_cast %24 : vector<1x1x48x4xbf16> to vector<48x4xbf16>
      %c0_10 = arith.constant 0 : index
      %c0_11 = arith.constant 0 : index
      %c9 = arith.constant 9 : index
      %c0_12 = arith.constant 0 : index
      %26 = vector.load %arg4[%c0_10, %c0_11, %c9, %c0_12] : memref<1x1x66x4xbf16, #tpu.memory_space<vmem>>, vector<1x1x48x4xbf16>
      %27 = vector.shape_cast %26 : vector<1x1x48x4xbf16> to vector<48x4xbf16>
      %c0_13 = arith.constant 0 : index
      %c0_14 = arith.constant 0 : index
      %c16 = arith.constant 16 : index
      %c0_15 = arith.constant 0 : index
      %28 = vector.load %arg4[%c0_13, %c0_14, %c16, %c0_15] : memref<1x1x66x4xbf16, #tpu.memory_space<vmem>>, vector<1x1x48x4xbf16>
      %29 = vector.shape_cast %28 : vector<1x1x48x4xbf16> to vector<48x4xbf16>
      %c0_16 = arith.constant 0 : index
      %c0_17 = arith.constant 0 : index
      %c17 = arith.constant 17 : index
      %c0_18 = arith.constant 0 : index
      %30 = vector.load %arg4[%c0_16, %c0_17, %c17, %c0_18] : memref<1x1x66x4xbf16, #tpu.memory_space<vmem>>, vector<1x1x48x4xbf16>
      %31 = vector.shape_cast %30 : vector<1x1x48x4xbf16> to vector<48x4xbf16>
      %c0_19 = arith.constant 0 : index
      %c0_20 = arith.constant 0 : index
      %c8_21 = arith.constant 8 : index
      %c0_22 = arith.constant 0 : index
      %32 = vector.load %arg5[%c0_19, %c0_20, %c8_21, %c0_22] : memref<1x1x66x4xbf16, #tpu.memory_space<vmem>>, vector<1x1x48x4xbf16>
      %33 = vector.shape_cast %32 : vector<1x1x48x4xbf16> to vector<48x4xbf16>
      %c0_23 = arith.constant 0 : index
      %c0_24 = arith.constant 0 : index
      %c9_25 = arith.constant 9 : index
      %c0_26 = arith.constant 0 : index
      %34 = vector.load %arg5[%c0_23, %c0_24, %c9_25, %c0_26] : memref<1x1x66x4xbf16, #tpu.memory_space<vmem>>, vector<1x1x48x4xbf16>
      %35 = vector.shape_cast %34 : vector<1x1x48x4xbf16> to vector<48x4xbf16>
      %c0_27 = arith.constant 0 : index
      %c0_28 = arith.constant 0 : index
      %c16_29 = arith.constant 16 : index
      %c0_30 = arith.constant 0 : index
      %36 = vector.load %arg5[%c0_27, %c0_28, %c16_29, %c0_30] : memref<1x1x66x4xbf16, #tpu.memory_space<vmem>>, vector<1x1x48x4xbf16>
      %37 = vector.shape_cast %36 : vector<1x1x48x4xbf16> to vector<48x4xbf16>
      %c0_31 = arith.constant 0 : index
      %c0_32 = arith.constant 0 : index
      %c17_33 = arith.constant 17 : index
      %c0_34 = arith.constant 0 : index
      %38 = vector.load %arg5[%c0_31, %c0_32, %c17_33, %c0_34] : memref<1x1x66x4xbf16, #tpu.memory_space<vmem>>, vector<1x1x48x4xbf16>
      %39 = vector.shape_cast %38 : vector<1x1x48x4xbf16> to vector<48x4xbf16>
      %40 = tpu.concatenate %25, %27, %29, %31, %33, %35, %37, %39 in 1 : vector<48x4xbf16>, vector<48x4xbf16>, vector<48x4xbf16>, vector<48x4xbf16>, vector<48x4xbf16>, vector<48x4xbf16>, vector<48x4xbf16>, vector<48x4xbf16> -> vector<48x32xbf16>
      %c6 = arith.constant 6 : index
      %c0_35 = arith.constant 0 : index
      %c0_36 = arith.constant 0 : index
      %41 = vector.load %arg6[%c6, %c0_35, %c0_36] : memref<8x32x6xbf16, #tpu.memory_space<vmem>>, vector<1x32x6xbf16>
      %42 = vector.shape_cast %41 : vector<1x32x6xbf16> to vector<32x6xbf16>
      %cst = arith.constant dense<0.000000e+00> : vector<48x6xf32>
      %43 = tpu.matmul %40, %42, %cst {dimension_numbers = #tpu.dot_dimension_numbers<[1], [0], [0], [1], [0, 0, 1, 1], [], []>} : vector<48x32xbf16>, vector<32x6xbf16>, vector<48x6xf32> -> vector<48x6xf32>
      %c0_37 = arith.constant 0 : index
      %c0_38 = arith.constant 0 : index
      %44 = vector.load %arg7[%c0_37, %c0_38] : memref<1x6xf32, #tpu.memory_space<vmem>>, vector<1x6xf32>
      %45 = vector.broadcast %44 : vector<1x6xf32> to vector<48x6xf32>
      %46 = arith.addf %43, %45 : vector<48x6xf32>
      %47 = arith.truncf %46 : vector<48x6xf32> to vector<48x6xbf16>
      %c0_39 = arith.constant 0 : index
      %c0_40 = arith.constant 0 : index
      %c0_41 = arith.constant 0 : index
      %c0_42 = arith.constant 0 : index
      %c0_43 = arith.constant 0 : index
      %48 = vector.load %arg8[%c0_39, %c0_40, %c0_41, %c0_42, %c0_43] : memref<1x1x1x48x6xbf16, #tpu.memory_space<vmem>>, vector<1x1x1x48x6xbf16>
      %49 = vector.shape_cast %48 : vector<1x1x1x48x6xbf16> to vector<48x6xbf16>
      %50 = vector.shape_cast %47 : vector<48x6xbf16> to vector<1x1x1x48x6xbf16>
      tpu.vector_store %arg8[%c0_39, %c0_40, %c0_41, %c0_42, %c0_43], %50 {strides = array<i32>} : memref<1x1x1x48x6xbf16, #tpu.memory_space<vmem>>, vector<1x1x1x48x6xbf16>,
    } else {
    }
    %c7_i32 = arith.constant 7 : i32
    %21 = arith.cmpi eq, %arg2, %c7_i32 : i32
    %22 = arith.extui %21 : i1 to i32
    %c0_i32_7 = arith.constant 0 : i32
    %23 = arith.cmpi ne, %22, %c0_i32_7 : i32
    scf.if %23 {
      %c0 = arith.constant 0 : index
      %c0_8 = arith.constant 0 : index
      %c9 = arith.constant 9 : index
      %c0_9 = arith.constant 0 : index
      %24 = vector.load %arg4[%c0, %c0_8, %c9, %c0_9] : memref<1x1x66x4xbf16, #tpu.memory_space<vmem>>, vector<1x1x48x4xbf16>
      %25 = vector.shape_cast %24 : vector<1x1x48x4xbf16> to vector<48x4xbf16>
      %c0_10 = arith.constant 0 : index
      %c0_11 = arith.constant 0 : index
      %c10 = arith.constant 10 : index
      %c0_12 = arith.constant 0 : index
      %26 = vector.load %arg4[%c0_10, %c0_11, %c10, %c0_12] : memref<1x1x66x4xbf16, #tpu.memory_space<vmem>>, vector<1x1x48x4xbf16>
      %27 = vector.shape_cast %26 : vector<1x1x48x4xbf16> to vector<48x4xbf16>
      %c0_13 = arith.constant 0 : index
      %c0_14 = arith.constant 0 : index
      %c17 = arith.constant 17 : index
      %c0_15 = arith.constant 0 : index
      %28 = vector.load %arg4[%c0_13, %c0_14, %c17, %c0_15] : memref<1x1x66x4xbf16, #tpu.memory_space<vmem>>, vector<1x1x48x4xbf16>
      %29 = vector.shape_cast %28 : vector<1x1x48x4xbf16> to vector<48x4xbf16>
      %c0_16 = arith.constant 0 : index
      %c0_17 = arith.constant 0 : index
      %c18 = arith.constant 18 : index
      %c0_18 = arith.constant 0 : index
      %30 = vector.load %arg4[%c0_16, %c0_17, %c18, %c0_18] : memref<1x1x66x4xbf16, #tpu.memory_space<vmem>>, vector<1x1x48x4xbf16>
      %31 = vector.shape_cast %30 : vector<1x1x48x4xbf16> to vector<48x4xbf16>
      %c0_19 = arith.constant 0 : index
      %c0_20 = arith.constant 0 : index
      %c9_21 = arith.constant 9 : index
      %c0_22 = arith.constant 0 : index
      %32 = vector.load %arg5[%c0_19, %c0_20, %c9_21, %c0_22] : memref<1x1x66x4xbf16, #tpu.memory_space<vmem>>, vector<1x1x48x4xbf16>
      %33 = vector.shape_cast %32 : vector<1x1x48x4xbf16> to vector<48x4xbf16>
      %c0_23 = arith.constant 0 : index
      %c0_24 = arith.constant 0 : index
      %c10_25 = arith.constant 10 : index
      %c0_26 = arith.constant 0 : index
      %34 = vector.load %arg5[%c0_23, %c0_24, %c10_25, %c0_26] : memref<1x1x66x4xbf16, #tpu.memory_space<vmem>>, vector<1x1x48x4xbf16>
      %35 = vector.shape_cast %34 : vector<1x1x48x4xbf16> to vector<48x4xbf16>
      %c0_27 = arith.constant 0 : index
      %c0_28 = arith.constant 0 : index
      %c17_29 = arith.constant 17 : index
      %c0_30 = arith.constant 0 : index
      %36 = vector.load %arg5[%c0_27, %c0_28, %c17_29, %c0_30] : memref<1x1x66x4xbf16, #tpu.memory_space<vmem>>, vector<1x1x48x4xbf16>
      %37 = vector.shape_cast %36 : vector<1x1x48x4xbf16> to vector<48x4xbf16>
      %c0_31 = arith.constant 0 : index
      %c0_32 = arith.constant 0 : index
      %c18_33 = arith.constant 18 : index
      %c0_34 = arith.constant 0 : index
      %38 = vector.load %arg5[%c0_31, %c0_32, %c18_33, %c0_34] : memref<1x1x66x4xbf16, #tpu.memory_space<vmem>>, vector<1x1x48x4xbf16>
      %39 = vector.shape_cast %38 : vector<1x1x48x4xbf16> to vector<48x4xbf16>
      %40 = tpu.concatenate %25, %27, %29, %31, %33, %35, %37, %39 in 1 : vector<48x4xbf16>, vector<48x4xbf16>, vector<48x4xbf16>, vector<48x4xbf16>, vector<48x4xbf16>, vector<48x4xbf16>, vector<48x4xbf16>, vector<48x4xbf16> -> vector<48x32xbf16>
      %c7 = arith.constant 7 : index
      %c0_35 = arith.constant 0 : index
      %c0_36 = arith.constant 0 : index
      %41 = vector.load %arg6[%c7, %c0_35, %c0_36] : memref<8x32x6xbf16, #tpu.memory_space<vmem>>, vector<1x32x6xbf16>
      %42 = vector.shape_cast %41 : vector<1x32x6xbf16> to vector<32x6xbf16>
      %cst = arith.constant dense<0.000000e+00> : vector<48x6xf32>
      %43 = tpu.matmul %40, %42, %cst {dimension_numbers = #tpu.dot_dimension_numbers<[1], [0], [0], [1], [0, 0, 1, 1], [], []>} : vector<48x32xbf16>, vector<32x6xbf16>, vector<48x6xf32> -> vector<48x6xf32>
      %c0_37 = arith.constant 0 : index
      %c0_38 = arith.constant 0 : index
      %44 = vector.load %arg7[%c0_37, %c0_38] : memref<1x6xf32, #tpu.memory_space<vmem>>, vector<1x6xf32>
      %45 = vector.broadcast %44 : vector<1x6xf32> to vector<48x6xf32>
      %46 = arith.addf %43, %45 : vector<48x6xf32>
      %47 = arith.truncf %46 : vector<48x6xf32> to vector<48x6xbf16>
      %c0_39 = arith.constant 0 : index
      %c0_40 = arith.constant 0 : index
      %c0_41 = arith.constant 0 : index
      %c0_42 = arith.constant 0 : index
      %c0_43 = arith.constant 0 : index
      %48 = vector.load %arg8[%c0_39, %c0_40, %c0_41, %c0_42, %c0_43] : memref<1x1x1x48x6xbf16, #tpu.memory_space<vmem>>, vector<1x1x1x48x6xbf16>
      %49 = vector.shape_cast %48 : vector<1x1x1x48x6xbf16> to vector<48x6xbf16>
      %50 = vector.shape_cast %47 : vector<48x6xbf16> to vector<1x1x1x48x6xbf16>
      tpu.vector_store %arg8[%c0_39, %c0_40, %c0_41, %c0_42, %c0_43], %50 {strides = array<i32>} : memref<1x1x1x48x6xbf16, #tpu.memory_space<vmem>>, vector<1x1x1x48x6xbf16>,
    } else {
    }
    return
  }
  func.func @transform_0(%arg0: i32, %arg1: i32, %arg2: i32) -> (i32, i32, i32, i32) {
    %c0_i32 = arith.constant 0 : i32
    %0 = arith.addi %arg1, %c0_i32 : i32
    %c0_i32_0 = arith.constant 0 : i32
    %c0_i32_1 = arith.constant 0 : i32
    %c0_i32_2 = arith.constant 0 : i32
    return %arg0, %0, %c0_i32_0, %c0_i32_1 : i32, i32, i32, i32
  }
  func.func @transform_1(%arg0: i32, %arg1: i32, %arg2: i32) -> (i32, i32, i32, i32) {
    %c1_i32 = arith.constant 1 : i32
    %0 = arith.addi %arg1, %c1_i32 : i32
    %c0_i32 = arith.constant 0 : i32
    %c0_i32_0 = arith.constant 0 : i32
    %c0_i32_1 = arith.constant 0 : i32
    return %arg0, %0, %c0_i32, %c0_i32_0 : i32, i32, i32, i32
  }
  func.func @transform_2(%arg0: i32, %arg1: i32, %arg2: i32) -> (i32, i32, i32, i32) {
    %c2_i32 = arith.constant 2 : i32
    %0 = arith.addi %arg1, %c2_i32 : i32
    %c0_i32 = arith.constant 0 : i32
    %c0_i32_0 = arith.constant 0 : i32
    %c0_i32_1 = arith.constant 0 : i32
    return %arg0, %0, %c0_i32, %c0_i32_0 : i32, i32, i32, i32
  }
  func.func @transform_3(%arg0: i32, %arg1: i32, %arg2: i32) -> (i32, i32, i32) {
    %c0_i32 = arith.constant 0 : i32
    %c0_i32_0 = arith.constant 0 : i32
    %c0_i32_1 = arith.constant 0 : i32
    %c0_i32_2 = arith.constant 0 : i32
    return %c0_i32, %c0_i32_0, %c0_i32_1 : i32, i32, i32
  }
  func.func @transform_4(%arg0: i32, %arg1: i32, %arg2: i32) -> (i32, i32) {
    %c0_i32 = arith.constant 0 : i32
    %c0_i32_0 = arith.constant 0 : i32
    %c0_i32_1 = arith.constant 0 : i32
    return %c0_i32, %c0_i32_0 : i32, i32
  }
  func.func @transform_5(%arg0: i32, %arg1: i32, %arg2: i32) -> (i32, i32, i32, i32, i32) {
    %c0_i32 = arith.constant 0 : i32
    %c0_i32_0 = arith.constant 0 : i32
    %c0_i32_1 = arith.constant 0 : i32
    return %arg2, %arg0, %arg1, %c0_i32, %c0_i32_0 : i32, i32, i32, i32, i32
  }
}

</mosaic_0001>

<bundles_post_ra>
// kernel: tpu_custom_call.1
= control target key start
LH: loop header
LB: loop body
LE: loop exit
PB: predicated region body
PF: predicated region fallthrough
CT: control target
= control target key end

     0   :  { %s5003_s18 = smov 0   ;;  %s5005_s19 = smov 0   ;;  %s6498_s0 = inlined_call_operand.vmem [shape: bf16[2,6,66,4], index: 0, kind: input, shape index: {}]   ;;  %s6499_s1 = inlined_call_operand.vmem [shape: bf16[2,6,66,4], index: 1, kind: input, shape index: {}]   ;;  %s6500_s2 = inlined_call_operand.vmem [shape: bf16[2,6,66,4], index: 2, kind: input, shape index: {}]   ;;  %s6501_s3 = inlined_call_operand.vmem [shape: bf16[8,32,6], index: 3, kind: input, shape index: {}]   ;;  %s6502_s4 = inlined_call_operand.vmem [shape: f32[1,6], index: 4, kind: input, shape index: {}]   ;;  %s6503_s5 = inlined_call_operand.vmem [shape: bf16[8,2,4,48,6], index: 5, kind: output, shape index: {}]  }
   0x1   :  { %6505 = sst [smem:[#allocation6_spill]] %s6498_s0  ;;  %s5007_s20 = smov 0  }
   0x2   :  { %s5009_s21 = smov 0   ;;  %s5011_s22 = smov 0  }
   0x3   :  { %s5013_s23 = smov 0   ;;  %s5015_s24 = smov 0  }
   0x4 LB: > { %6506 = sst [smem:[#allocation2_spill]] %s4895_s23  ;;  %s27_s25 = sadd.s32 1, %s4887_s21  ;;  %s4899_s24 = sphi %s5015_s24, %s15_s24   ;;  %s4895_s23 = sphi %s5013_s23, %s6514_s23   ;;  %s4891_s22 = sphi %s5011_s22, %s6518_s22   ;;  %s4887_s21 = sphi %s5009_s21, %s6517_s21   ;;  %s4883_s20 = sphi %s5007_s20, %s6511_s20   ;;  %s4879_s19 = sphi %s5005_s19, %s6516_s19   ;;  %s4875_s18 = sphi %s5003_s18, %s6515_s18  }
   0x5   : > { %p28_p0 = scmp.ge.s32.totalorder %s27_s25, 8  ;;  %s30_s26 = sadd.s32 1, %s4891_s22 }
   0x6   : > { %p4019_p1 = scmp.ge.s32.totalorder %s4899_s24, 1  ;;  %p256_p2 = scmp.lt.s32.totalorder %s4899_s24, 65 }
   0x7   : > { %s6520_s25 = smov (%p28_p0, %s27_s25), 0  ;;  %s6522_s26 = smov (!%p28_p0, %s30_s26), %s4891_s22 }
   0x8   : > { %6507 = sst [smem:[#allocation3_spill]] %s6520_s25  ;;  %p257_p3 = pnand %p4019_p1, %p256_p2 }
   0x9   : > { %p32_p4 = scmp.ge.s32.totalorder %s6522_s26, 4  ;;  %s34_s27 = sadd.s32 1, %s4895_s23 }
   0xa   : > { %p316_p6 = scmp.lt.s32.totalorder (!%p257_p3), %s4883_s20, 1  ;;  %p318_p7 = scmp.lt.s32.totalorder (!%p257_p3), %s4879_s19, 5 }
   0xb   : > { %s6524_s26 = smov (%p32_p4, %s6522_s26), 0  ;;  %s6526_s27 = smov (!%p32_p4, %s34_s27), %s4895_s23 }
   0xc   : > { %6508 = sst [smem:[#allocation4_spill]] %s6524_s26  ;;  %p36_p5 = scmp.ge.s32.totalorder %s6526_s27, 2 }
   0xd   : > { %260 = sbr.rel (%p257_p3) target bundleno = 3077 (0xc05), region = 40  ;;  %s325_s28 = sadd.s32 (!%p257_p3), 1, %s4879_s19 }
   0xe   : > { %s6528_s27 = smov (%p36_p5, %s6526_s27), 0  ;;  %p328_p8 = scmp.lt.s32.totalorder (!%p257_p3), %s325_s28, 5 }
   0xf   : > { %6509 = sst [smem:[#allocation5_spill]] %s6528_s27  ;;  %s336_s7 = sadd.s32 (!%p257_p3), 2, %s4879_s19 }
  0x10   : > { %s6510_s0 = sld [smem:[#allocation6_spill]] (!%p257_p3)  ;;  %p339_p9 = scmp.lt.s32.totalorder (!%p257_p3), %s336_s7, 5 }
  0x11   : > { %p347_p10 = scmp.lt.s32.totalorder (!%p257_p3), %s4875_s18, 7  ;;  %p351_p11 = scmp.lt.s32.totalorder (!%p257_p3), %s4879_s19, 3 }
  0x12   : > { %s6530_s20 = smov (!%p316_p6, %s4883_s20), 1  ;;  %s6532_s28 = smov (!%p328_p8, %s325_s28), 5 }
  0x13   : > { %s319_s29 = scalar_select %p318_p7, %s4879_s19, 5 }
  0x14   : > { %s4551_s30 = smul.u32 54, %s6530_s20  ;;  %s6534_s7 = smov (!%p339_p9, %s336_s7), 5 }
  0x15   : > { %s4550_s6 = smul.u32 9, %s319_s29  ;;  %s6536_s19 = smov (!%p351_p11, %s4879_s19), 3 }
  0x16   : > { %s4552_s10 = smul.u32 9, %s6532_s28  ;;  %p4024_p12 = scmp.ne.s32.totalorder %s4875_s18, 0 }
  0x17   : > { %s322_s8 = sadd.s32 %s4551_s30, %s4550_s6  ;;  %s4555_s27 = smul.u32 24, %s6530_s20 }
  0x18   : > { %s4020_s9 = sshll.u32 %s322_s8, 2  ;;  %s332_s14 = sadd.s32 %s4552_s10, %s4551_s30 }
  0x19   : > { %s5056_s13 = scalar_lea.vmem %s6510_s0, %s4020_s9  ;;  %s4021_s15 = sshll.u32 %s332_s14, 2 }
  0x1a   : > { %s5063_s29 = scalar_lea.vmem %s6499_s1, %s4021_s15  ;;  %s4553_s8 = smul.u32 9, %s6534_s7 }
  0x1b   : > { %s348_s6 = scalar_select %p347_p10, %s4875_s18, 7 }
  0x1c   : > { %s343_s28 = sadd.s32 %s4553_s8, %s4551_s30  ;;  %s4554_s9 = smul.u32 6, %s6536_s19 }
  0x1d   : > { %s4556_s26 = smul.u32 48, %s348_s6  ;;  %s4022_s11 = sshll.u32 %s343_s28, 2 }
  0x1e   : > { %s5070_s10 = scalar_lea.vmem %s6500_s2, %s4022_s11  ;;  %s355_s14 = sadd.s32 %s4555_s27, %s4554_s9 }
  0x1f   : > { %s357_s25 = sadd.s32 %s4556_s26, %s355_s14  ;;  %364 = sbr.rel (%p4024_p12) target bundleno = 402 (0x192), region = 44 }
  0x20   : > { %s4023_s23 = sshll.u32 %s357_s25, 2  ;;  %s4901_s0 = smov (!%p4024_p12), 16  }
  0x21   : > { %s5075_s20 = scalar_lea.vmem %s6503_s5, %s4023_s23  ;;  %s4902_s19 = smov (!%p4024_p12), 8  }
  0x22   : > { %s4903_s23 = smov (!%p4024_p12), 24   ;;  %s4904_s25 = smov (!%p4024_p12), 12  }
  0x23   : > { %s4905_s26 = smov (!%p4024_p12), 4   ;;  %s4906_s27 = smov (!%p4024_p12), 20  }
  0x24   : > { %v5079_v0 = vld [vmem:[%s5063_s29 + $0x8] sm:$0xf]  ;;  %v377_v1 = vld [vmem:[%s5063_s29 + $0xc] sm:$0xf]  ;;  %v369_v4 = vld [vmem:[%s5056_s13 + $0x10] sm:$0xf] }
  0x25   : > { %v4034_v2 = vcombine.low %v5079_v0, %v377_v1  ;;  %v368_v3 = vld [vmem:[%s5056_s13 + $0xc] sm:$0xf]  ;;  %v370_v5 = vld [vmem:[%s5056_s13 + $0x14] sm:$0xf]  ;;  %v372_v6 = vld [vmem:[%s5056_s13 + $0x18] sm:$0xf] }
  0x26   : > { %v5087_v7 = vcombine.low %v369_v4, %v370_v5  ;;  %v4030_v8 = vcombine.low %v368_v3, %v369_v4  ;;  %v367_v9 = vld [vmem:[%s5056_s13 + $0x8] sm:$0xf]  ;;  %v378_v10 = vld [vmem:[%s5063_s29 + $0x10] sm:$0xf]  ;;  %v5092_v12 = vcombine.low %v370_v5, %v372_v6  ;;  %v379_v14 = vld [vmem:[%s5063_s29 + $0x14] sm:$0xf] }
  0x27   : > { %501 = vrot.lane.b32.xlu1 %v4034_v2, %s4901_s0  ;;  %v516_v11 = vshll.u32 %v4034_v2, 16  ;;  %v5094_v13 = vcombine.low %v367_v9, %v368_v3  ;;  %v381_v15 = vld [vmem:[%s5063_s29 + $0x18] sm:$0xf]  ;;  %v4038_v16 = vcombine.low %v377_v1, %v378_v10  ;;  %v5099_v18 = vcombine.low %v378_v10, %v379_v14  ;;  %v365_v28 = vld [vmem:[%s5056_s13] sm:$0xf]  ;;  %s4907_s30 = smov 28  }
  0x28   : > { %443 = vrot.lane.b32.xlu0 %v4030_v8, %s4902_s19  ;;  %v458_v17 = vshll.u32 %v4030_v8, 16  ;;  %v5101_v19 = vcombine.low %v379_v14, %v381_v15  ;;  %vm401_vm0 = vsmask.f32 7424  ;;  %v418_v23 = vshll.u32 %v5087_v7, 16  ;;  %v366_v33 = vld [vmem:[%s5056_s13 + $0x4] sm:$0xf] }
  0x29   : > { %v564_v20 = vshll.u32 %v4038_v16, 16  ;;  %v410_v21 = vshll.u32 %v5094_v13, 16  ;;  %v414_v22 = vshrl.u32 %v5094_v13, 16  ;;  %v462_v25 = vshrl.u32 %v4030_v8, 16  ;;  %v374_v49 = vld [vmem:[%s5063_s29] sm:$0xf] }
  0x2a   : > { %v5106_v24 = vrot.slane %v458_v17, 1  ;;  %v466_v26 = vshll.u32 %v5092_v12, 16  ;;  %v5109_v27 = vrot.slane %v516_v11, 1  ;;  %v420_v30 = vrot.slane %v418_v23, 1  ;;  %v375_v50 = vld [vmem:[%s5063_s29 + $0x4] sm:$0xf] }
  0x2b   : > { %549 = vrot.lane.b32.xlu1 %v4038_v16, %s4903_s23  ;;  %v412_v29 = vrot.slane %v410_v21, 1  ;;  %v520_v31 = vshrl.u32 %v4034_v2, 16  ;;  %v524_v32 = vshll.u32 %v5099_v18, 16  ;;  %v5116_v36 = vcombine.low %v365_v28, %v366_v33  ;;  %v4695_v42 = vld [vmem:[%s5056_s13 + $0x18] ss:$0 sps:$4 sm:$0x11]  }
  0x2c   : > { %v464_v34 = vor.u32 %v462_v25, %v5106_v24  ;;  %v468_v35 = vrot.slane %v466_v26, 1  ;;  %v5118_v37 = vrot.slane %v564_v20, 1  ;;  %v568_v41 = vshrl.u32 %v4038_v16, 16  ;;  %v4697_v3 = vld [vmem:[%s5056_s13 + $0x1c] ss:$0 sps:$4 sm:$0x11]  }
  0x2d   : > { %v416_v38 = vor.u32 %v414_v22, %v412_v29  ;;  %v522_v39 = vor.u32 %v520_v31, %v5109_v27  ;;  %v5121_v40 = vrot.slane %v524_v32, 1  ;;  %v403_v44 = vshrl.u32 %v5116_v36, 16  ;;  %v4701_v6 = vld [vmem:[%s6501_s3 + $0x8] sm:$0xff]   ;;  %v4702_v20 = vld [vmem:[%s6501_s3] sm:$0xff]  }
  0x2e   : > { %v469_v43 = vsel %vm401_vm0, %v464_v34, %v468_v35  ;;  %v405_v45 = vshll.u32 %v5116_v36, 16  ;;  %v572_v46 = vshll.u32 %v5101_v19, 16  ;;  %v4029_v48 = vcombine.low %v366_v33, %v367_v9  ;;  %v4699_v23 = vld [vmem:[%s5063_s29 + $0x18] ss:$0 sps:$4 sm:$0x11]  }
  0x2f   : > { %v421_v47 = vsel %vm401_vm0, %v416_v38, %v420_v30  ;;  %480 = vrot.lane.b32.xlu1 %v469_v43, %s4904_s25  ;;  %v527_v51 = vsel %vm401_vm0, %v522_v39, %v5121_v40  ;;  %v570_v53 = vor.u32 %v568_v41, %v5118_v37  ;;  %v422_v56 = vshrl.u32 %v5087_v7, 16  ;;  %v4700_v33 = vld [vmem:[%s5063_s29 + $0x1c] ss:$0 sps:$4 sm:$0x11]  }
  0x30   : > { %432 = vrot.lane.b32.xlu0 %v421_v47, %s4905_s26  ;;  %v407_v52 = vrot.slane %v405_v45, 1  ;;  %v5136_v54 = vrot.slane %v572_v46, 1  ;;  %v453_v55 = vshll.u32 %v4029_v48, 16  ;;  %v426_v57 = vshll.u32 %v4695_v42, 16 }
  0x31   : > { %v451_v59 = vshrl.u32 %v4029_v48, 16  ;;  %v4033_v60 = vcombine.low %v374_v49, %v375_v50  ;;  %v424_v1 = vor.u32 %v422_v56, %v420_v30  ;;  %v470_v9 = vshrl.u32 %v5092_v12, 16 }
  0x32   : > { %v408_v58 = vor.u32 %v407_v52, %v403_v44  ;;  %v455_v61 = vrot.slane %v453_v55, 1  ;;  %v575_v63 = vsel %vm401_vm0, %v570_v53, %v5136_v54  ;;  %v428_v2 = vrot.slane %v426_v57, 1 }
  0x33   : > { %v511_v5 = vshll.u32 %v4033_v60, 16  ;;  %v474_v10 = vshll.u32 %v4697_v3, 16  ;;  %v509_v11 = vshrl.u32 %v4033_v60, 16  ;;  %v4037_v16 = vcombine.low %v375_v50, %v5079_v0 }
  0x34   : > { %538 = vrot.lane.b32.xlu0 %v527_v51, %s4906_s27  ;;  %v413_v62 = vsel %vm401_vm0, %v408_v58, %v412_v29  ;;  %v456_v4 = vor.u32 %v455_v61, %v451_v59  ;;  %v429_v8 = vsel %vm401_vm0, %v424_v1, %v428_v2  ;;  %v4908_v17 = vmov 0.0  }
  0x35   : > { %430 = vrot.lane.b32.xlu1 %v413_v62, %s4905_s26  ;;  %v513_v15 = vrot.slane %v511_v5, 1  ;;  %4518 = vmatprep.subr.bf16.mxu1 %v4908_v17  ;;  %v472_v21 = vor.u32 %v470_v9, %v468_v35  ;;  %v476_v22 = vrot.slane %v474_v10, 1  ;;  %vm4909_vm1 = vmmov 0  }
  0x36   : > { %v461_v14 = vsel %vm401_vm0, %v456_v4, %v5106_v24  ;;  %4390 = vmatprep.subr.bf16.mxu0 %v4908_v17  ;;  %4520 = vmatpush3.bf16.msra.mxu1 %v4701_v6  ;;  %v559_v24 = vshll.u32 %v4037_v16, 16  ;;  %v528_v26 = vshrl.u32 %v5099_v18, 16  ;;  %v532_v28 = vshll.u32 %v4699_v23, 16 }
  0x37   : > { %4519 = vmatprep.subr.bf16.mxu1 %v4908_v17  ;;  %v514_v0 = vor.u32 %v513_v15, %v509_v11  ;;  %4398 = vmatprep.mubr.msk.bf16.mxu1 %vm4909_vm1, %v4908_v17  ;;  %v477_v25 = vsel %vm401_vm0, %v472_v21, %v476_v22  ;;  %v557_v30 = vshrl.u32 %v4037_v16, 16  ;;  %v580_v38 = vshll.u32 %v4700_v33, 16 }
  0x38   : > { %586 = vrot.lane.b32.xlu0 %v575_v63, %s4907_s30  ;;  %4391 = vmatpush3.bf16.msra.mxu0 %v4701_v6  ;;  %v561_v31 = vrot.slane %v559_v24, 1  ;;  %v534_v32 = vrot.slane %v532_v28, 1  ;;  %vm590_vm2 = vcmask 31744   ;;  %vm597_vm3 = vcmask 64512  }
  0x39   : > { %441 = vrot.lane.b32.xlu1 %v4029_v48, %s4902_s19  ;;  %4392 = vmatprep.subr.bf16.mxu0 %v4908_v17  ;;  %v519_v29 = vsel %vm401_vm0, %v514_v0, %v5109_v27  ;;  %v576_v27 = vshrl.u32 %v5101_v19, 16  ;;  %v582_v41 = vrot.slane %v580_v38, 1  ;;  %vm604_vm4 = vcmask 97280  }
  0x3a   : > { %4394 = vmatprep.mubr.msk.bf16.mxu0 %vm4909_vm1, %v4908_v17  ;;  %4521 = vmatpush3.bf16.msra.mxu1 %v4702_v20  ;;  %v562_v34 = vor.u32 %v561_v31, %v557_v30  ;;  %vm611_vm5 = vcmask 130048   ;;  %vm618_vm6 = vcmask 162816   ;;  %vm625_vm7 = vcmask 195584  }
  0x3b   : > { %vm632_vm8 = vcmask 228352   ;;  %vm662_vm9 = vcmask 261120   ;;  %vm750_vm10 = vcmask 44032  }
  0x3c   : > { %434 = vrot.lane.b32.xlu0 %v429_v8, %s4905_s26  ;;  %4393 = vmatpush3.bf16.msra.mxu0 %v4702_v20  ;;  %v567_v39 = vsel %vm401_vm0, %v562_v34, %v5118_v37 }
  0x3d   : > { %478 = vrot.lane.b32.xlu1 %v461_v14, %s4904_s25 }
  0x40   : > { %445 = vrot.lane.b32.xlu0 %v5092_v12, %s4902_s19  ;;  %v530_v12 = vor.u32 %v528_v26, %v5121_v40  ;;  %v578_v40 = vor.u32 %v576_v27, %v5136_v54 }
  0x41   : > { %499 = vrot.lane.b32.xlu1 %v4033_v60, %s4901_s0 }
  0x42   : > { %v535_v35 = vsel %vm401_vm0, %v530_v12, %v534_v32 }
  0x44   : > { %482 = vrot.lane.b32.xlu0 %v477_v25, %s4904_s25 }
  0x45   : > { %536 = vrot.lane.b32.xlu1 %v519_v29, %s4906_s27 }
  0x48   : > { %503 = vrot.lane.b32.xlu0 %v5099_v18, %s4901_s0  ;;  %v583_v18 = vsel %vm401_vm0, %v578_v40, %v582_v41 }
  0x49   : > { %547 = vrot.lane.b32.xlu1 %v4037_v16, %s4903_s23 }
  0x4c   : > { %540 = vrot.lane.b32.xlu0 %v535_v35, %s4906_s27 }
  0x4d   : > { %584 = vrot.lane.b32.xlu1 %v567_v39, %s4907_s30 }
  0x50   : > { %551 = vrot.lane.b32.xlu0 %v5101_v19, %s4903_s23 }
  0x54   : > { %588 = vrot.lane.b32.xlu0 %v583_v18, %s4907_s30 }
  0x99   : > { %v502_v42 = vpop.permute.xlu1 %501 }
  0x9a   : > { %v444_v43 = vpop.permute.xlu0 %443 }
  0x9d   : > { %v550_v44 = vpop.permute.xlu1 %549 }
  0xa1   : > { %v481_v37 = vpop.permute.xlu1 %480 }
  0xa2   : > { %v433_v45 = vpop.permute.xlu0 %432 }
  0xa3   : > { %v594_v46 = vsel %vm590_vm2, %v5094_v13, %v433_v45 }
  0xa4   : > { %v601_v47 = vsel %vm597_vm3, %v594_v46, %v444_v43 }
  0xa5   : > { %v608_v19 = vsel %vm604_vm4, %v601_v47, %v481_v37 }
  0xa6   : > { %v615_v48 = vsel %vm611_vm5, %v608_v19, %v502_v42  ;;  %v539_v49 = vpop.permute.xlu0 %538 }
  0xa7   : > { %v622_v50 = vsel %vm618_vm6, %v615_v48, %v539_v49  ;;  %v431_v51 = vpop.permute.xlu1 %430 }
  0xa8   : > { %v629_v52 = vsel %vm625_vm7, %v622_v50, %v550_v44  ;;  %v592_v59 = vsel %vm590_vm2, %v5116_v36, %v431_v51 }
  0xaa   : > { %v587_v53 = vpop.permute.xlu0 %586 }
  0xab   : > { %v636_v13 = vsel %vm632_vm8, %v629_v52, %v587_v53  ;;  %v442_v54 = vpop.permute.xlu1 %441 }
  0xac   : > { %4399 = vmatmul.mubr.msk.bf16.vlgmr.msra.gmra.mxu1 %vm662_vm9, %v636_v13  ;;  %v599_v62 = vsel %vm597_vm3, %v592_v59, %v442_v54 }
  0xad   : > { %4402 = vmatprep.mubr.msk.bf16.mxu1 %vm4909_vm1, %v4908_v17 }
  0xae   : > { %v435_v55 = vpop.permute.xlu0 %434 }
  0xaf   : > { %v479_v56 = vpop.permute.xlu1 %478  ;;  %v596_v36 = vsel %vm590_vm2, %v5087_v7, %v435_v55  ;;  %v4041_v7 = vld [vmem:[%s6502_s4] ss:$0 sm:$0xff] }
  0xb0   : > { %v606_v2 = vsel %vm604_vm4, %v599_v62, %v479_v56 }
  0xb2   : > { %v446_v57 = vpop.permute.xlu0 %445 }
  0xb3   : > { %v500_v58 = vpop.permute.xlu1 %499  ;;  %v603_v10 = vsel %vm597_vm3, %v596_v36, %v446_v57 }
  0xb4   : > { %v613_v3 = vsel %vm611_vm5, %v606_v2, %v500_v58 }
  0xb6   : > { %v483_v60 = vpop.permute.xlu0 %482 }
  0xb7   : > { %v537_v61 = vpop.permute.xlu1 %536  ;;  %v610_v14 = vsel %vm604_vm4, %v603_v10, %v483_v60 }
  0xb8   : > { %v620_v4 = vsel %vm618_vm6, %v613_v3, %v537_v61 }
  0xba   : > { %v504_v63 = vpop.permute.xlu0 %503 }
  0xbb   : > { %v548_v1 = vpop.permute.xlu1 %547  ;;  %v617_v15 = vsel %vm611_vm5, %v610_v14, %v504_v63 }
  0xbc   : > { %v627_v6 = vsel %vm625_vm7, %v620_v4, %v548_v1 }
  0xbe   : > { %v541_v5 = vpop.permute.xlu0 %540 }
  0xbf   : > { %v585_v8 = vpop.permute.xlu1 %584  ;;  %v624_v16 = vsel %vm618_vm6, %v617_v15, %v541_v5 }
  0xc0   : > { %v634_v9 = vsel %vm632_vm8, %v627_v6, %v585_v8 }
  0xc1   : > { %4395 = vmatmul.mubr.msk.bf16.vlgmr.msra.gmra.mxu0 %vm662_vm9, %v634_v9 }
  0xc2   : > { %v552_v11 = vpop.permute.xlu0 %551 }
  0xc3   : > { %v631_v17 = vsel %vm625_vm7, %v624_v16, %v552_v11 }
  0xc6   : > { %v589_v20 = vpop.permute.xlu0 %588 }
  0xc7   : > { %v638_v21 = vsel %vm632_vm8, %v631_v17, %v589_v20 }
  0xc8   : > { %4403 = vmatmul.mubr.msk.bf16.gmra.mxu1 %vm662_vm9, %v638_v21 }
 0x16c   : > { %v711_v22 = vpop.f32.mrf.mxu1 }
 0x16d   : > { %v712_v23 = vadd.f32 %v4041_v7, %v711_v22 }
 0x16e   : > { %v4400_v0 = vpop.f32.mrf.mxu1 }
 0x16f   : > { %v4304_v24 = vpack.c.bf16 %v712_v23, %v712_v23 }
 0x170   : > { %v714_v25 = vpop.f32.mrf.mxu1 }
 0x171   : > { %753 = vst.msk [vmem:[%s5075_s20 + $0x8] sm:$0xf] %vm750_vm10, %v4304_v24  ;;  %v715_v26 = vadd.f32 %v4041_v7, %v714_v25 }
 0x172   : > { %v4401_v28 = vpop.f32.mrf.mxu1 }
 0x173   : > { %v4305_v29 = vpack.c.bf16 %v715_v26, %v715_v26 }
 0x175   : > { %754 = vst.msk [vmem:[%s5075_s20 + $0xc] sm:$0xf] %vm750_vm10, %v4305_v29 }
 0x181   : > { %v703_v30 = vpop.f32.mrf.mxu0 }
 0x182   : > { %v704_v31 = vadd.f32 %v4041_v7, %v703_v30 }
 0x183   : > { %v4396_v12 = vpop.f32.mrf.mxu0 }
 0x184   : > { %v4302_v32 = vpack.c.bf16 %v704_v31, %v704_v31 }
 0x185   : > { %v706_v33 = vpop.f32.mrf.mxu0 }
 0x186   : > { %751 = vst.msk [vmem:[%s5075_s20] sm:$0xf] %vm750_vm10, %v4302_v32  ;;  %v707_v34 = vadd.f32 %v4041_v7, %v706_v33 }
 0x187   : > { %v4397_v35 = vpop.f32.mrf.mxu0 }
 0x188   : > { %v4303_v27 = vpack.c.bf16 %v707_v34, %v707_v34  ;;  %v719_v38 = vpop.f32.mrf.mxu1 }
 0x189   : > { %v720_v39 = vadd.f32 %v4041_v7, %v719_v38 }
 0x18a   : > { %752 = vst.msk [vmem:[%s5075_s20 + $0x4] sm:$0xf] %vm750_vm10, %v4303_v27  ;;  %v4404_v40 = vpop.f32.mrf.mxu1 }
 0x18b   : > { %v4306_v41 = vpack.c.bf16 %v720_v39, %v720_v39 }
 0x18c   : > { %v722_v18 = vpop.f32.mrf.mxu1 }
 0x18d   : > { %755 = vst.msk [vmem:[%s5075_s20 + $0x10] sm:$0xf] %vm750_vm10, %v4306_v41  ;;  %v723_v42 = vadd.f32 %v4041_v7, %v722_v18 }
 0x18e   : > { %v4405_v43 = vpop.f32.mrf.mxu1 }
 0x18f   : > { %v4307_v44 = vpack.c.bf16 %v723_v42, %v723_v42 }
 0x191   : > { %756 = vst.msk [vmem:[%s5075_s20 + $0x14] sm:$0xf] %vm750_vm10, %v4307_v44 }
 0x192 PF: > { %p4053_p13 = scmp.ne.s32.totalorder %s4875_s18, 1 }
 0x193   : > { %s4910_s9 = smov (!%p4053_p13), 8   ;;  %s4911_s12 = smov (!%p4053_p13), 16  }
 0x194   : > { %760 = sbr.rel (%p4053_p13) target bundleno = 791 (0x317), region = 48  ;;  %s4912_s14 = smov (!%p4053_p13), 4  }
 0x195   : > { %s4913_s16 = smov (!%p4053_p13), 12   ;;  %s4914_s15 = smov (!%p4053_p13), 20  }
 0x196   : > { %s4915_s23 = smov (!%p4053_p13), 24   ;;  %s4917_s27 = smov (!%p4053_p13), 28  }
 0x199   : > { %v764_v37 = vld [vmem:[%s5056_s13 + $0xc] sm:$0xf]  ;;  %v765_v45 = vld [vmem:[%s5056_s13 + $0x10] sm:$0xf]  ;;  %v5242_v47 = vld [vmem:[%s5056_s13 + $0x8] sm:$0xf] }
 0x19a   : > { %v4060_v46 = vcombine.low %v764_v37, %v765_v45  ;;  %v5245_v19 = vld [vmem:[%s5063_s29 + $0x8] sm:$0xf]  ;;  %v775_v48 = vld [vmem:[%s5063_s29 + $0xc] sm:$0xf]  ;;  %v5249_v49 = vcombine.low %v5242_v47, %v764_v37  ;;  %v766_v51 = vld [vmem:[%s5056_s13 + $0x14] sm:$0xf] }
 0x19b   : > { %v4065_v50 = vcombine.low %v5245_v19, %v775_v48  ;;  %v769_v52 = vld [vmem:[%s5056_s13 + $0x18] sm:$0xf]  ;;  %v5255_v13 = vcombine.low %v765_v45, %v766_v51  ;;  %vm804_vm11 = vsmask.f32 7424  ;;  %v776_v11 = vld [vmem:[%s5063_s29 + $0x10] sm:$0xf] }
 0x19c   : > { %853 = vrot.lane.b32.xlu0 %v4060_v46, %s4910_s9  ;;  %v870_v53 = vshll.u32 %v4060_v46, 16  ;;  %v4061_v54 = vcombine.low %v766_v51, %v769_v52  ;;  %v5258_v55 = vld [vmem:[%s5056_s13 + $0x18] ss:$0 sps:$4 sm:$0x11]   ;;  %v813_v57 = vshll.u32 %v5249_v49, 16  ;;  %v817_v58 = vshrl.u32 %v5249_v49, 16 }
 0x19d   : > { %920 = vrot.lane.b32.xlu1 %v4065_v50, %s4911_s12  ;;  %v937_v56 = vshll.u32 %v4065_v50, 16  ;;  %v821_v59 = vshll.u32 %v5255_v13, 16  ;;  %v825_v60 = vshrl.u32 %v5255_v13, 16  ;;  %v829_v61 = vshll.u32 %v5258_v55, 16  ;;  %v777_v14 = vld [vmem:[%s5063_s29 + $0x14] sm:$0xf] }
 0x19e   : > { %v5266_v62 = vrot.slane %v870_v53, 1  ;;  %v5268_v63 = vrot.slane %v813_v57, 1  ;;  %v874_v1 = vshrl.u32 %v4060_v46, 16  ;;  %v878_v2 = vshll.u32 %v4061_v54, 16  ;;  %v780_v7 = vld [vmem:[%s5063_s29 + $0x18] sm:$0xf] }
 0x19f   : > { %v882_v3 = vshrl.u32 %v4061_v54, 16  ;;  %v823_v4 = vrot.slane %v821_v59, 1  ;;  %v831_v5 = vrot.slane %v829_v61, 1  ;;  %v5272_v6 = vld [vmem:[%s5056_s13 + $0x1c] ss:$0 sps:$4 sm:$0x11]   ;;  %v4066_v20 = vcombine.low %v776_v11, %v777_v14 }
 0x1a0   : > { %855 = vrot.lane.b32.xlu0 %v4061_v54, %s4910_s9  ;;  %v5274_v8 = vrot.slane %v937_v56, 1  ;;  %v819_v9 = vor.u32 %v817_v58, %v5268_v63  ;;  %v876_v36 = vor.u32 %v874_v1, %v5266_v62  ;;  %v880_v10 = vrot.slane %v878_v2, 1  ;;  %v5284_v0 = vld [vmem:[%s5063_s29 + $0x18] ss:$0 sps:$4 sm:$0x11]  }
 0x1a1   : > { %v941_v15 = vshrl.u32 %v4065_v50, 16  ;;  %v827_v16 = vor.u32 %v825_v60, %v823_v4  ;;  %v886_v17 = vshll.u32 %v5272_v6, 16  ;;  %v4070_v21 = vcombine.low %v775_v48, %v776_v11  ;;  %v5287_v24 = vld [vmem:[%s5056_s13 + $0x4] sm:$0xf]  ;;  %v768_v30 = vld [vmem:[%s5056_s13] sm:$0xe] }
 0x1a2   : > { %v824_v22 = vsel %vm804_vm11, %v819_v9, %v823_v4  ;;  %v884_v23 = vor.u32 %v882_v3, %v880_v10  ;;  %v881_v26 = vsel %vm804_vm11, %v876_v36, %v880_v10  ;;  %v945_v29 = vshll.u32 %v4066_v20, 16  ;;  %v5303_v42 = vld [vmem:[%s5063_s29 + $0x1c] ss:$0 sps:$4 sm:$0x11]   ;;  %v771_v45 = vld [vmem:[%s5056_s13 + $0x4] sm:$0xe] }
 0x1a3   : > { %v832_v25 = vsel %vm804_vm11, %v827_v16, %v831_v5  ;;  %v888_v28 = vrot.slane %v886_v17, 1  ;;  %v943_v31 = vor.u32 %v941_v15, %v5274_v8  ;;  %v994_v12 = vshll.u32 %v4070_v21, 16  ;;  %v4723_v57 = vld [vmem:[%s6501_s3 + $0x18] sm:$0xff]   ;;  %v773_v2 = vld [vmem:[%s5063_s29 + $0x4] sm:$0xf]  ;;  %v4724_v5 = vld [vmem:[%s6501_s3 + $0x10] sm:$0xff]  }
 0x1a4   : > { %837 = vrot.lane.b32.xlu0 %v824_v22, %s4912_s14  ;;  %839 = vrot.lane.b32.xlu1 %v832_v25, %s4912_s14  ;;  %v949_v32 = vshrl.u32 %v4066_v20, 16  ;;  %v953_v33 = vshll.u32 %v5284_v0, 16  ;;  %v947_v35 = vrot.slane %v945_v29, 1  ;;  %v4071_v27 = vcombine.low %v777_v14, %v780_v7  ;;  %v779_v3 = vld [vmem:[%s5063_s29] sm:$0xe] }
 0x1a5   : > { %v889_v34 = vsel %vm804_vm11, %v884_v23, %v888_v28  ;;  %v4058_v38 = vcombine.low %v768_v30, %v5287_v24  ;;  %v5300_v41 = vrot.slane %v994_v12, 1  ;;  %v998_v18 = vshrl.u32 %v4070_v21, 16  ;;  %v772_v22 = vld [vmem:[%s5063_s29] sm:$0xf] }
 0x1a6   : > { %v951_v39 = vor.u32 %v949_v32, %v947_v35  ;;  %v955_v40 = vrot.slane %v953_v33, 1  ;;  %v948_v43 = vsel %vm804_vm11, %v943_v31, %v947_v35  ;;  %v1002_v44 = vshll.u32 %v4071_v27, 16 }
 0x1a7   : > { %v808_v37 = vshll.u32 %v4058_v38, 16  ;;  %v1000_v48 = vor.u32 %v998_v18, %v5300_v41  ;;  %v1006_v50 = vshrl.u32 %v4071_v27, 16  ;;  %v1010_v51 = vshll.u32 %v5303_v42, 16 }
 0x1a8   : > { %896 = vrot.lane.b32.xlu0 %v889_v34, %s4913_s16  ;;  %894 = vrot.lane.b32.xlu1 %v881_v26, %s4913_s16  ;;  %v956_v46 = vsel %vm804_vm11, %v951_v39, %v955_v40  ;;  %v1004_v52 = vrot.slane %v1002_v44, 1  ;;  %v806_v53 = vshrl.u32 %v4058_v38, 16  ;;  %v4063_v56 = vcombine.low %v771_v45, %v5242_v47 }
 0x1a9   : > { %v810_v54 = vrot.slane %v808_v37, 1  ;;  %v1012_v59 = vrot.slane %v1010_v51, 1  ;;  %v4916_v4 = vmov 0.0   ;;  %v4068_v14 = vcombine.low %v779_v3, %v773_v2 }
 0x1aa   : > { %v1008_v58 = vor.u32 %v1006_v50, %v1004_v52  ;;  %v1005_v60 = vsel %vm804_vm11, %v1000_v48, %v1004_v52  ;;  %v865_v1 = vshll.u32 %v4063_v56, 16  ;;  %4522 = vmatprep.subr.bf16.mxu1 %v4916_v4  ;;  %4406 = vmatprep.subr.bf16.mxu0 %v4916_v4  ;;  %v863_v10 = vshrl.u32 %v4063_v56, 16 }
 0x1ab   : > { %v811_v61 = vor.u32 %v810_v54, %v806_v53  ;;  %4524 = vmatpush3.bf16.msra.mxu1 %v4723_v57  ;;  %vm4918_vm12 = vmmov 0   ;;  %4407 = vmatpush3.bf16.msra.mxu0 %v4723_v57  ;;  %v833_v15 = vshrl.u32 %v5258_v55, 16  ;;  %v932_v17 = vshll.u32 %v4068_v14, 16 }
 0x1ac   : > { %922 = vrot.lane.b32.xlu0 %v4066_v20, %s4911_s12  ;;  %961 = vrot.lane.b32.xlu1 %v948_v43, %s4914_s15  ;;  %v1013_v9 = vsel %vm804_vm11, %v1008_v58, %v1012_v59  ;;  %v867_v11 = vrot.slane %v865_v1, 1  ;;  %v782_v20 = vld [vmem:[%s5063_s29 + $0x4] sm:$0xe]  ;;  %v930_v23 = vshrl.u32 %v4068_v14, 16  ;;  %v4064_v26 = vcombine.low %v772_v22, %v773_v2 }
 0x1ad   : > { %4523 = vmatprep.subr.bf16.mxu1 %v4916_v4  ;;  %v816_v36 = vsel %vm804_vm11, %v811_v61, %v5268_v63  ;;  %4414 = vmatprep.mubr.msk.bf16.mxu1 %vm4918_vm12, %v4916_v4  ;;  %v4059_v63 = vcombine.low %v5287_v24, %v5242_v47  ;;  %v934_v25 = vrot.slane %v932_v17, 1  ;;  %v890_v47 = vshrl.u32 %v5272_v6, 16 }
 0x1ae   : > { %4408 = vmatprep.subr.bf16.mxu0 %v4916_v4  ;;  %4410 = vmatprep.mubr.msk.bf16.mxu0 %vm4918_vm12, %v4916_v4  ;;  %v868_v16 = vor.u32 %v867_v11, %v863_v10  ;;  %v957_v12 = vshrl.u32 %v5284_v0, 16  ;;  %vm1024_vm13 = vcmask 31744   ;;  %vm1034_vm14 = vcmask 64512  }
 0x1af   : > { %4525 = vmatpush3.bf16.msra.mxu1 %v4724_v5  ;;  %4409 = vmatpush3.bf16.msra.mxu0 %v4724_v5  ;;  %v935_v28 = vor.u32 %v934_v25, %v930_v23  ;;  %vm1043_vm15 = vcmask 97280   ;;  %vm1052_vm0 = vcmask 130048   ;;  %vm1061_vm1 = vcmask 162816  }
 0x1b0   : > { %963 = vrot.lane.b32.xlu0 %v956_v46, %s4914_s15  ;;  %977 = vrot.lane.b32.xlu1 %v4070_v21, %s4915_s23  ;;  %v4073_v21 = vcombine.low %v782_v20, %v5245_v19  ;;  %v873_v7 = vsel %vm804_vm11, %v868_v16, %v5266_v62  ;;  %vm1070_vm2 = vcmask 195584   ;;  %vm1079_vm3 = vcmask 228352   ;;  %v761_v16 = vld [vmem:[%s5056_s13] sm:$0xf] }
 0x1b1   : > { %v940_v62 = vsel %vm804_vm11, %v935_v28, %v5274_v8  ;;  %v1014_v8 = vshrl.u32 %v5303_v42, 16  ;;  %vm1136_vm4 = vcmask 261120   ;;  %v4054_v20 = vcombine.low %v761_v16, %v5287_v24 }
 0x1b2   : > { %v989_v29 = vshll.u32 %v4073_v21, 16  ;;  %v987_v30 = vshrl.u32 %v4073_v21, 16  ;;  %vm1227_vm5 = vcmask 44032  }
 0x1b4   : > { %979 = vrot.lane.b32.xlu0 %v4071_v27, %s4915_s23  ;;  %1018 = vrot.lane.b32.xlu1 %v1005_v60, %s4917_s27  ;;  %v991_v31 = vrot.slane %v989_v29, 1 }
 0x1b6   : > { %v992_v32 = vor.u32 %v991_v31, %v987_v30 }
 0x1b8   : > { %1020 = vrot.lane.b32.xlu0 %v1013_v9, %s4917_s27  ;;  %835 = vrot.lane.b32.xlu1 %v816_v36, %s4912_s14  ;;  %v997_v33 = vsel %vm804_vm11, %v992_v32, %v5300_v41 }
 0x1bc   : > { %841 = vrot.lane.b32.xlu0 %v833_v15, %s4912_s14  ;;  %851 = vrot.lane.b32.xlu1 %v4059_v63, %s4910_s9 }
 0x1c0   : > { %857 = vrot.lane.b32.xlu0 %v5272_v6, %s4910_s9  ;;  %892 = vrot.lane.b32.xlu1 %v873_v7, %s4913_s16  ;;  %v4069_v6 = vcombine.low %v773_v2, %v5245_v19 }
 0x1c4   : > { %898 = vrot.lane.b32.xlu0 %v890_v47, %s4913_s16  ;;  %918 = vrot.lane.b32.xlu1 %v4064_v26, %s4911_s12 }
 0x1c8   : > { %924 = vrot.lane.b32.xlu0 %v5284_v0, %s4911_s12  ;;  %959 = vrot.lane.b32.xlu1 %v940_v62, %s4914_s15 }
 0x1cc   : > { %965 = vrot.lane.b32.xlu0 %v957_v12, %s4914_s15  ;;  %975 = vrot.lane.b32.xlu1 %v4069_v6, %s4915_s23 }
 0x1d0   : > { %981 = vrot.lane.b32.xlu0 %v5303_v42, %s4915_s23  ;;  %1016 = vrot.lane.b32.xlu1 %v997_v33, %s4917_s27 }
 0x1d4   : > { %1022 = vrot.lane.b32.xlu1 %v1014_v8, %s4917_s27 }
 0x20e   : > { %v854_v0 = vpop.permute.xlu0 %853 }
 0x20f   : > { %v921_v34 = vpop.permute.xlu1 %920 }
 0x212   : > { %v856_v19 = vpop.permute.xlu0 %855 }
 0x216   : > { %v838_v35 = vpop.permute.xlu0 %837  ;;  %v840_v27 = vpop.permute.xlu1 %839 }
 0x217   : > { %v1029_v40 = vsel %vm1024_vm13, %v5249_v49, %v838_v35  ;;  %v1031_v37 = vsel %vm1024_vm13, %v5255_v13, %v840_v27 }
 0x218   : > { %v1038_v18 = vsel %vm1034_vm14, %v1029_v40, %v854_v0  ;;  %v1040_v49 = vsel %vm1034_vm14, %v1031_v37, %v856_v19 }
 0x21a   : > { %v897_v38 = vpop.permute.xlu0 %896  ;;  %v895_v39 = vpop.permute.xlu1 %894 }
 0x21b   : > { %v1047_v42 = vsel %vm1043_vm15, %v1038_v18, %v895_v39  ;;  %v1049_v51 = vsel %vm1043_vm15, %v1040_v49, %v897_v38 }
 0x21c   : > { %v1056_v46 = vsel %vm1052_vm0, %v1047_v42, %v921_v34  ;;  %v4078_v42 = vld [vmem:[%s6502_s4] ss:$0 sm:$0xff] }
 0x21e   : > { %v923_v41 = vpop.permute.xlu0 %922  ;;  %v962_v43 = vpop.permute.xlu1 %961 }
 0x21f   : > { %v1065_v48 = vsel %vm1061_vm1, %v1056_v46, %v962_v43  ;;  %v1058_v54 = vsel %vm1052_vm0, %v1049_v51, %v923_v41 }
 0x222   : > { %v964_v44 = vpop.permute.xlu0 %963  ;;  %v978_v45 = vpop.permute.xlu1 %977 }
 0x223   : > { %v1074_v52 = vsel %vm1070_vm2, %v1065_v48, %v978_v45  ;;  %v1067_v56 = vsel %vm1061_vm1, %v1058_v54, %v964_v44 }
 0x226   : > { %v980_v50 = vpop.permute.xlu0 %979  ;;  %v1019_v53 = vpop.permute.xlu1 %1018 }
 0x227   : > { %v1083_v13 = vsel %vm1079_vm3, %v1074_v52, %v1019_v53  ;;  %v1076_v58 = vsel %vm1070_vm2, %v1067_v56, %v980_v50 }
 0x228   : > { %v1106_v57 = vshll.u32 %v1083_v13, 16  ;;  %v1110_v2 = vshrl.u32 %v1083_v13, 16 }
 0x22a   : > { %v1021_v59 = vpop.permute.xlu0 %1020  ;;  %v1108_v60 = vrot.slane %v1106_v57, 1  ;;  %v836_v61 = vpop.permute.xlu1 %835 }
 0x22b   : > { %v1085_v1 = vsel %vm1079_vm3, %v1076_v58, %v1021_v59  ;;  %v1027_v22 = vsel %vm1024_vm13, %v4054_v20, %v836_v61 }
 0x22c   : > { %v1113_v3 = vshll.u32 %v1085_v1, 16  ;;  %v1112_v5 = vor.u32 %v1110_v2, %v1108_v60  ;;  %v1117_v27 = vshrl.u32 %v1085_v1, 16 }
 0x22e   : > { %v1115_v9 = vrot.slane %v1113_v3, 1  ;;  %v842_v36 = vpop.permute.xlu0 %841  ;;  %v852_v10 = vpop.permute.xlu1 %851 }
 0x22f   : > { %v1036_v25 = vsel %vm1034_vm14, %v1027_v22, %v852_v10  ;;  %v1033_v26 = vsel %vm1024_vm13, %v5258_v55, %v842_v36 }
 0x230   : > { %v1116_v11 = vsel %vm804_vm11, %v1112_v5, %v1115_v9  ;;  %v1119_v40 = vor.u32 %v1117_v27, %v1115_v9 }
 0x231   : > { %4415 = vmatmul.mubr.msk.bf16.vlgmr.msra.gmra.mxu1 %vm1136_vm4, %v1116_v11 }
 0x232   : > { %v858_v14 = vpop.permute.xlu0 %857  ;;  %4418 = vmatprep.mubr.msk.bf16.mxu1 %vm4918_vm12, %v4916_v4  ;;  %v893_v15 = vpop.permute.xlu1 %892 }
 0x233   : > { %v1045_v28 = vsel %vm1043_vm15, %v1036_v25, %v893_v15  ;;  %v1042_v62 = vsel %vm1034_vm14, %v1033_v26, %v858_v14 }
 0x236   : > { %v899_v63 = vpop.permute.xlu0 %898  ;;  %v919_v17 = vpop.permute.xlu1 %918 }
 0x237   : > { %v1054_v4 = vsel %vm1052_vm0, %v1045_v28, %v919_v17  ;;  %v1051_v31 = vsel %vm1043_vm15, %v1042_v62, %v899_v63 }
 0x23a   : > { %v925_v21 = vpop.permute.xlu0 %924  ;;  %v960_v7 = vpop.permute.xlu1 %959 }
 0x23b   : > { %v1063_v29 = vsel %vm1061_vm1, %v1054_v4, %v960_v7  ;;  %v1060_v32 = vsel %vm1052_vm0, %v1051_v31, %v925_v21 }
 0x23e   : > { %v966_v23 = vpop.permute.xlu0 %965  ;;  %v976_v47 = vpop.permute.xlu1 %975 }
 0x23f   : > { %v1072_v24 = vsel %vm1070_vm2, %v1063_v29, %v976_v47  ;;  %v1069_v55 = vsel %vm1061_vm1, %v1060_v32, %v966_v23 }
 0x242   : > { %v1017_v30 = vpop.permute.xlu1 %1016  ;;  %v982_v6 = vpop.permute.xlu0 %981 }
 0x243   : > { %v1081_v12 = vsel %vm1079_vm3, %v1072_v24, %v1017_v30  ;;  %v1078_v34 = vsel %vm1070_vm2, %v1069_v55, %v982_v6 }
 0x244   : > { %v1102_v33 = vshll.u32 %v1081_v12, 16  ;;  %v1100_v8 = vshrl.u32 %v1081_v12, 16 }
 0x246   : > { %v1104_v0 = vrot.slane %v1102_v33, 1  ;;  %v1023_v19 = vpop.permute.xlu1 %1022 }
 0x247   : > { %v1087_v35 = vsel %vm1079_vm3, %v1078_v34, %v1023_v19 }
 0x248   : > { %v1105_v38 = vor.u32 %v1104_v0, %v1100_v8  ;;  %v1120_v39 = vshll.u32 %v1087_v35, 16 }
 0x24a   : > { %v1122_v41 = vrot.slane %v1120_v39, 1  ;;  %v1109_v18 = vsel %vm804_vm11, %v1105_v38, %v1108_v60 }
 0x24b   : > { %4411 = vmatmul.mubr.msk.bf16.vlgmr.msra.gmra.mxu0 %vm1136_vm4, %v1109_v18 }
 0x24c   : > { %v1123_v43 = vsel %vm804_vm11, %v1119_v40, %v1122_v41 }
 0x24d   : > { %4419 = vmatmul.mubr.msk.bf16.gmra.mxu1 %vm1136_vm4, %v1123_v43 }
 0x2f1   : > { %v1188_v44 = vpop.f32.mrf.mxu1 }
 0x2f2   : > { %v1189_v37 = vadd.f32 %v4078_v42, %v1188_v44 }
 0x2f3   : > { %v4416_v45 = vpop.f32.mrf.mxu1 }
 0x2f4   : > { %v4310_v46 = vpack.c.bf16 %v1189_v37, %v1189_v37 }
 0x2f5   : > { %v1191_v49 = vpop.f32.mrf.mxu1 }
 0x2f6   : > { %1230 = vst.msk [vmem:[%s5075_s20 + $0x8] sm:$0xf] %vm1227_vm5, %v4310_v46  ;;  %v1192_v48 = vadd.f32 %v4078_v42, %v1191_v49 }
 0x2f7   : > { %v4417_v50 = vpop.f32.mrf.mxu1 }
 0x2f8   : > { %v4311_v51 = vpack.c.bf16 %v1192_v48, %v1192_v48 }
 0x2fa   : > { %1231 = vst.msk [vmem:[%s5075_s20 + $0xc] sm:$0xf] %vm1227_vm5, %v4311_v51 }
 0x30b   : > { %v1180_v52 = vpop.f32.mrf.mxu0 }
 0x30c   : > { %v1181_v53 = vadd.f32 %v4078_v42, %v1180_v52 }
 0x30d   : > { %v4412_v54 = vpop.f32.mrf.mxu0  ;;  %v1196_v13 = vpop.f32.mrf.mxu1 }
 0x30e   : > { %v4308_v56 = vpack.c.bf16 %v1181_v53, %v1181_v53  ;;  %v1197_v57 = vadd.f32 %v4078_v42, %v1196_v13 }
 0x30f   : > { %v1183_v58 = vpop.f32.mrf.mxu0  ;;  %v4420_v59 = vpop.f32.mrf.mxu1 }
 0x310   : > { %1228 = vst.msk [vmem:[%s5075_s20] sm:$0xf] %vm1227_vm5, %v4308_v56  ;;  %v4312_v60 = vpack.c.bf16 %v1197_v57, %v1197_v57  ;;  %v1184_v61 = vadd.f32 %v4078_v42, %v1183_v58 }
 0x311   : > { %v4413_v1 = vpop.f32.mrf.mxu0  ;;  %v1199_v2 = vpop.f32.mrf.mxu1 }
 0x312   : > { %1232 = vst.msk [vmem:[%s5075_s20 + $0x10] sm:$0xf] %vm1227_vm5, %v4312_v60  ;;  %v4309_v3 = vpack.c.bf16 %v1184_v61, %v1184_v61  ;;  %v1200_v5 = vadd.f32 %v4078_v42, %v1199_v2 }
 0x313   : > { %v4421_v9 = vpop.f32.mrf.mxu1 }
 0x314   : > { %1229 = vst.msk [vmem:[%s5075_s20 + $0x4] sm:$0xf] %vm1227_vm5, %v4309_v3  ;;  %v4313_v36 = vpack.c.bf16 %v1200_v5, %v1200_v5 }
 0x316   : > { %1233 = vst.msk [vmem:[%s5075_s20 + $0x14] sm:$0xf] %vm1227_vm5, %v4313_v36 }
 0x317 PF: > { %p4090_p0 = scmp.ne.s32.totalorder %s4875_s18, 2 }
 0x318   : > { %s4919_s17 = smov (!%p4090_p0), 16   ;;  %s4920_s6 = smov (!%p4090_p0), 8  }
 0x319   : > { %1237 = sbr.rel (%p4090_p0) target bundleno = 1164 (0x48c), region = 52  ;;  %s4921_s8 = smov (!%p4090_p0), 24  }
 0x31a   : > { %s4922_s28 = smov (!%p4090_p0), 12   ;;  %s4923_s11 = smov (!%p4090_p0), 4  }
 0x31b   : > { %s4924_s9 = smov (!%p4090_p0), 20   ;;  %s4925_s12 = smov (!%p4090_p0), 28  }
 0x31e   : > { %v5429_v10 = vld [vmem:[%s5063_s29 + $0xc] sm:$0xf]  ;;  %v1250_v11 = vld [vmem:[%s5063_s29 + $0x10] sm:$0xf]  ;;  %v1242_v63 = vld [vmem:[%s5056_s13 + $0x14] sm:$0xf] }
 0x31f   : > { %v4100_v14 = vcombine.low %v5429_v10, %v1250_v11  ;;  %v1241_v15 = vld [vmem:[%s5056_s13 + $0x10] sm:$0xf]  ;;  %v1243_v16 = vld [vmem:[%s5056_s13 + $0x18] sm:$0xf]  ;;  %v1245_v17 = vld [vmem:[%s5056_s13 + $0x1c] sm:$0xf] }
 0x320   : > { %v5437_v20 = vcombine.low %v1242_v63, %v1243_v16  ;;  %v4096_v21 = vcombine.low %v1241_v15, %v1242_v63  ;;  %v1240_v7 = vld [vmem:[%s5056_s13 + $0xc] sm:$0xf]  ;;  %v1251_v22 = vld [vmem:[%s5063_s29 + $0x14] sm:$0xf]  ;;  %v5442_v25 = vcombine.low %v1243_v16, %v1245_v17  ;;  %v1252_v26 = vld [vmem:[%s5063_s29 + $0x18] sm:$0xf] }
 0x321   : > { %1374 = vrot.lane.b32.xlu1 %v4100_v14, %s4919_s17  ;;  %v1389_v23 = vshll.u32 %v4100_v14, 16  ;;  %v5444_v47 = vcombine.low %v1240_v7, %v1241_v15  ;;  %v1254_v28 = vld [vmem:[%s5063_s29 + $0x1c] sm:$0xf]  ;;  %v4104_v4 = vcombine.low %v1250_v11, %v1251_v22  ;;  %v5449_v62 = vcombine.low %v1251_v22, %v1252_v26  ;;  %v1238_v0 = vld [vmem:[%s5056_s13 + $0x4] sm:$0xf]  ;;  %v4741_v17 = vld [vmem:[%s6501_s3 + $0x28] sm:$0xff]  }
 0x322   : > { %1316 = vrot.lane.b32.xlu0 %v4096_v21, %s4920_s6  ;;  %v1331_v29 = vshll.u32 %v4096_v21, 16  ;;  %v5451_v24 = vcombine.low %v1252_v26, %v1254_v28  ;;  %vm1274_vm6 = vsmask.f32 7424  ;;  %v1291_v6 = vshll.u32 %v5437_v20, 16  ;;  %v1239_v38 = vld [vmem:[%s5056_s13 + $0x8] sm:$0xf] }
 0x323   : > { %v1437_v30 = vshll.u32 %v4104_v4, 16  ;;  %v1283_v31 = vshll.u32 %v5444_v47, 16  ;;  %v1287_v12 = vshrl.u32 %v5444_v47, 16  ;;  %v1335_v33 = vshrl.u32 %v4096_v21, 16  ;;  %v1247_v53 = vld [vmem:[%s5063_s29 + $0x4] sm:$0xf] }
 0x324   : > { %v5456_v32 = vrot.slane %v1331_v29, 1  ;;  %v1339_v55 = vshll.u32 %v5442_v25, 16  ;;  %v5459_v8 = vrot.slane %v1389_v23, 1  ;;  %v1293_v19 = vrot.slane %v1291_v6, 1  ;;  %v1248_v54 = vld [vmem:[%s5063_s29 + $0x8] sm:$0xf] }
 0x325   : > { %1422 = vrot.lane.b32.xlu1 %v4104_v4, %s4921_s8  ;;  %v1285_v34 = vrot.slane %v1283_v31, 1  ;;  %v1393_v35 = vshrl.u32 %v4100_v14, 16  ;;  %v1397_v27 = vshll.u32 %v5449_v62, 16  ;;  %v5466_v41 = vcombine.low %v1238_v0, %v1239_v38  ;;  %v4735_v45 = vld [vmem:[%s5056_s13 + $0x1c] ss:$0 sps:$4 sm:$0x11]  }
 0x326   : > { %v1337_v39 = vor.u32 %v1335_v33, %v5456_v32  ;;  %v1341_v40 = vrot.slane %v1339_v55, 1  ;;  %v5468_v18 = vrot.slane %v1437_v30, 1  ;;  %v1441_v37 = vshrl.u32 %v4104_v4, 16  ;;  %v4737_v15 = vld [vmem:[%s5056_s13 + $0x20] ss:$0 sps:$4 sm:$0x11]  }
 0x327   : > { %v1289_v43 = vor.u32 %v1287_v12, %v1285_v34  ;;  %v1395_v42 = vor.u32 %v1393_v35, %v5459_v8  ;;  %v5471_v44 = vrot.slane %v1397_v27, 1  ;;  %v1276_v49 = vshrl.u32 %v5466_v41, 16  ;;  %v4742_v30 = vld [vmem:[%s6501_s3 + $0x20] sm:$0xff]   ;;  %v4739_v6 = vld [vmem:[%s5063_s29 + $0x1c] ss:$0 sps:$4 sm:$0x11]  }
 0x328   : > { %v1342_v46 = vsel %vm1274_vm6, %v1337_v39, %v1341_v40  ;;  %v1278_v48 = vshll.u32 %v5466_v41, 16  ;;  %v1445_v50 = vshll.u32 %v5451_v24, 16  ;;  %v4095_v52 = vcombine.low %v1239_v38, %v1240_v7  ;;  %v4740_v38 = vld [vmem:[%s5063_s29 + $0x20] ss:$0 sps:$4 sm:$0x11]  }
 0x329   : > { %v1294_v51 = vsel %vm1274_vm6, %v1289_v43, %v1293_v19  ;;  %1353 = vrot.lane.b32.xlu1 %v1342_v46, %s4922_s28  ;;  %v1400_v13 = vsel %vm1274_vm6, %v1395_v42, %v5471_v44  ;;  %v1443_v57 = vor.u32 %v1441_v37, %v5468_v18  ;;  %v1295_v60 = vshrl.u32 %v5437_v20, 16 }
 0x32a   : > { %1305 = vrot.lane.b32.xlu0 %v1294_v51, %s4923_s11  ;;  %v1280_v56 = vrot.slane %v1278_v48, 1  ;;  %v5486_v58 = vrot.slane %v1445_v50, 1  ;;  %v1326_v59 = vshll.u32 %v4095_v52, 16  ;;  %v1299_v61 = vshll.u32 %v4735_v45, 16 }
 0x32b   : > { %v1324_v2 = vshrl.u32 %v4095_v52, 16  ;;  %v4099_v3 = vcombine.low %v1247_v53, %v1248_v54  ;;  %v1297_v11 = vor.u32 %v1295_v60, %v1293_v19  ;;  %v1343_v7 = vshrl.u32 %v5442_v25, 16 }
 0x32c   : > { %v1281_v1 = vor.u32 %v1280_v56, %v1276_v49  ;;  %v1328_v5 = vrot.slane %v1326_v59, 1  ;;  %v1448_v36 = vsel %vm1274_vm6, %v1443_v57, %v5486_v58  ;;  %v1301_v14 = vrot.slane %v1299_v61, 1 }
 0x32d   : > { %v1384_v16 = vshll.u32 %v4099_v3, 16  ;;  %v1347_v22 = vshll.u32 %v4737_v15, 16  ;;  %v1382_v23 = vshrl.u32 %v4099_v3, 16  ;;  %v4103_v4 = vcombine.low %v1248_v54, %v5429_v10 }
 0x32e   : > { %1411 = vrot.lane.b32.xlu0 %v1400_v13, %s4924_s9  ;;  %v1286_v9 = vsel %vm1274_vm6, %v1281_v1, %v1285_v34  ;;  %v1329_v63 = vor.u32 %v1328_v5, %v1324_v2  ;;  %v1302_v21 = vsel %vm1274_vm6, %v1297_v11, %v1301_v14  ;;  %v4926_v29 = vmov 0.0  }
 0x32f   : > { %1303 = vrot.lane.b32.xlu1 %v1286_v9, %s4923_s11  ;;  %v1386_v28 = vrot.slane %v1384_v16, 1  ;;  %4526 = vmatprep.subr.bf16.mxu1 %v4926_v29  ;;  %v1345_v31 = vor.u32 %v1343_v7, %v1341_v40  ;;  %v1349_v12 = vrot.slane %v1347_v22, 1  ;;  %vm4927_vm7 = vmmov 0  }
 0x330   : > { %v1334_v26 = vsel %vm1274_vm6, %v1329_v63, %v5456_v32  ;;  %4422 = vmatprep.subr.bf16.mxu0 %v4926_v29  ;;  %4528 = vmatpush3.bf16.msra.mxu1 %v4741_v17  ;;  %v1432_v32 = vshll.u32 %v4103_v4, 16  ;;  %v1401_v55 = vshrl.u32 %v5449_v62, 16  ;;  %v1405_v0 = vshll.u32 %v4739_v6, 16 }
 0x331   : > { %4527 = vmatprep.subr.bf16.mxu1 %v4926_v29  ;;  %v1387_v10 = vor.u32 %v1386_v28, %v1382_v23  ;;  %4430 = vmatprep.mubr.msk.bf16.mxu1 %vm4927_vm7, %v4926_v29  ;;  %v1350_v33 = vsel %vm1274_vm6, %v1345_v31, %v1349_v12  ;;  %v1430_v19 = vshrl.u32 %v4103_v4, 16  ;;  %v1453_v43 = vshll.u32 %v4740_v38, 16 }
 0x332   : > { %1459 = vrot.lane.b32.xlu0 %v1448_v36, %s4925_s12  ;;  %4423 = vmatpush3.bf16.msra.mxu0 %v4741_v17  ;;  %v1434_v35 = vrot.slane %v1432_v32, 1  ;;  %v1407_v27 = vrot.slane %v1405_v0, 1  ;;  %vm1463_vm8 = vcmask 31744   ;;  %vm1470_vm9 = vcmask 64512  }
 0x333   : > { %1314 = vrot.lane.b32.xlu1 %v4095_v52, %s4920_s6  ;;  %4424 = vmatprep.subr.bf16.mxu0 %v4926_v29  ;;  %v1392_v34 = vsel %vm1274_vm6, %v1387_v10, %v5459_v8  ;;  %v1449_v8 = vshrl.u32 %v5451_v24, 16  ;;  %v1455_v37 = vrot.slane %v1453_v43, 1  ;;  %vm1477_vm10 = vcmask 97280  }
 0x334   : > { %4426 = vmatprep.mubr.msk.bf16.mxu0 %vm4927_vm7, %v4926_v29  ;;  %4529 = vmatpush3.bf16.msra.mxu1 %v4742_v30  ;;  %v1435_v39 = vor.u32 %v1434_v35, %v1430_v19  ;;  %vm1484_vm11 = vcmask 130048   ;;  %vm1491_vm12 = vcmask 162816   ;;  %vm1498_vm13 = vcmask 195584  }
 0x335   : > { %vm1505_vm14 = vcmask 228352   ;;  %vm1536_vm15 = vcmask 261120   ;;  %vm1624_vm0 = vcmask 44032  }
 0x336   : > { %1307 = vrot.lane.b32.xlu0 %v1302_v21, %s4923_s11  ;;  %4425 = vmatpush3.bf16.msra.mxu0 %v4742_v30  ;;  %v1440_v42 = vsel %vm1274_vm6, %v1435_v39, %v5468_v18 }
 0x337   : > { %1351 = vrot.lane.b32.xlu1 %v1334_v26, %s4922_s28 }
 0x33a   : > { %1318 = vrot.lane.b32.xlu0 %v5442_v25, %s4920_s6  ;;  %v1403_v25 = vor.u32 %v1401_v55, %v5471_v44  ;;  %v1451_v44 = vor.u32 %v1449_v8, %v5486_v58 }
 0x33b   : > { %1372 = vrot.lane.b32.xlu1 %v4099_v3, %s4919_s17 }
 0x33c   : > { %v1408_v40 = vsel %vm1274_vm6, %v1403_v25, %v1407_v27 }
 0x33e   : > { %1355 = vrot.lane.b32.xlu0 %v1350_v33, %s4922_s28 }
 0x33f   : > { %1409 = vrot.lane.b32.xlu1 %v1392_v34, %s4924_s9 }
 0x342   : > { %1376 = vrot.lane.b32.xlu0 %v5449_v62, %s4919_s17  ;;  %v1456_v62 = vsel %vm1274_vm6, %v1451_v44, %v1455_v37 }
 0x343   : > { %1420 = vrot.lane.b32.xlu1 %v4103_v4, %s4921_s8 }
 0x346   : > { %1413 = vrot.lane.b32.xlu0 %v1408_v40, %s4924_s9 }
 0x347   : > { %1457 = vrot.lane.b32.xlu1 %v1440_v42, %s4925_s12 }
 0x34a   : > { %1424 = vrot.lane.b32.xlu0 %v5451_v24, %s4921_s8 }
 0x34e   : > { %1461 = vrot.lane.b32.xlu0 %v1456_v62, %s4925_s12 }
 0x393   : > { %v1375_v45 = vpop.permute.xlu1 %1374 }
 0x394   : > { %v1317_v46 = vpop.permute.xlu0 %1316 }
 0x397   : > { %v1423_v49 = vpop.permute.xlu1 %1422 }
 0x39b   : > { %v1354_v18 = vpop.permute.xlu1 %1353 }
 0x39c   : > { %v1306_v48 = vpop.permute.xlu0 %1305 }
 0x39d   : > { %v1467_v50 = vsel %vm1463_vm8, %v5444_v47, %v1306_v48 }
 0x39e   : > { %v1474_v51 = vsel %vm1470_vm9, %v1467_v50, %v1317_v46 }
 0x39f   : > { %v1481_v24 = vsel %vm1477_vm10, %v1474_v51, %v1354_v18 }
 0x3a0   : > { %v1488_v52 = vsel %vm1484_vm11, %v1481_v24, %v1375_v45  ;;  %v1412_v53 = vpop.permute.xlu0 %1411 }
 0x3a1   : > { %v1495_v54 = vsel %vm1491_vm12, %v1488_v52, %v1412_v53  ;;  %v1304_v13 = vpop.permute.xlu1 %1303 }
 0x3a2   : > { %v1502_v56 = vsel %vm1498_vm13, %v1495_v54, %v1423_v49  ;;  %v1465_v2 = vsel %vm1463_vm8, %v5466_v41, %v1304_v13 }
 0x3a4   : > { %v1460_v57 = vpop.permute.xlu0 %1459 }
 0x3a5   : > { %v1509_v47 = vsel %vm1505_vm14, %v1502_v56, %v1460_v57  ;;  %v1315_v58 = vpop.permute.xlu1 %1314 }
 0x3a6   : > { %4431 = vmatmul.mubr.msk.bf16.vlgmr.msra.gmra.mxu1 %vm1536_vm15, %v1509_v47  ;;  %v1472_v9 = vsel %vm1470_vm9, %v1465_v2, %v1315_v58 }
 0x3a7   : > { %4434 = vmatprep.mubr.msk.bf16.mxu1 %vm4927_vm7, %v4926_v29 }
 0x3a8   : > { %v1308_v59 = vpop.permute.xlu0 %1307 }
 0x3a9   : > { %v1352_v60 = vpop.permute.xlu1 %1351  ;;  %v1469_v41 = vsel %vm1463_vm8, %v5437_v20, %v1308_v59  ;;  %v4111_v20 = vld [vmem:[%s6502_s4] ss:$0 sm:$0xff] }
 0x3aa   : > { %v1479_v14 = vsel %vm1477_vm10, %v1472_v9, %v1352_v60 }
 0x3ac   : > { %v1319_v61 = vpop.permute.xlu0 %1318 }
 0x3ad   : > { %v1373_v1 = vpop.permute.xlu1 %1372  ;;  %v1476_v22 = vsel %vm1470_vm9, %v1469_v41, %v1319_v61 }
 0x3ae   : > { %v1486_v15 = vsel %vm1484_vm11, %v1479_v14, %v1373_v1 }
 0x3b0   : > { %v1356_v3 = vpop.permute.xlu0 %1355 }
 0x3b1   : > { %v1410_v5 = vpop.permute.xlu1 %1409  ;;  %v1483_v26 = vsel %vm1477_vm10, %v1476_v22, %v1356_v3 }
 0x3b2   : > { %v1493_v63 = vsel %vm1491_vm12, %v1486_v15, %v1410_v5 }
 0x3b4   : > { %v1377_v36 = vpop.permute.xlu0 %1376 }
 0x3b5   : > { %v1421_v11 = vpop.permute.xlu1 %1420  ;;  %v1490_v28 = vsel %vm1484_vm11, %v1483_v26, %v1377_v36 }
 0x3b6   : > { %v1500_v17 = vsel %vm1498_vm13, %v1493_v63, %v1421_v11 }
 0x3b8   : > { %v1414_v16 = vpop.permute.xlu0 %1413 }
 0x3b9   : > { %v1458_v21 = vpop.permute.xlu1 %1457  ;;  %v1497_v4 = vsel %vm1491_vm12, %v1490_v28, %v1414_v16 }
 0x3ba   : > { %v1507_v7 = vsel %vm1505_vm14, %v1500_v17, %v1458_v21 }
 0x3bb   : > { %4427 = vmatmul.mubr.msk.bf16.vlgmr.msra.gmra.mxu0 %vm1536_vm15, %v1507_v7 }
 0x3bc   : > { %v1425_v23 = vpop.permute.xlu0 %1424 }
 0x3bd   : > { %v1504_v29 = vsel %vm1498_vm13, %v1497_v4, %v1425_v23 }
 0x3c0   : > { %v1462_v30 = vpop.permute.xlu0 %1461 }
 0x3c1   : > { %v1511_v31 = vsel %vm1505_vm14, %v1504_v29, %v1462_v30 }
 0x3c2   : > { %4435 = vmatmul.mubr.msk.bf16.gmra.mxu1 %vm1536_vm15, %v1511_v31 }
 0x466   : > { %v1585_v12 = vpop.f32.mrf.mxu1 }
 0x467   : > { %v1586_v6 = vadd.f32 %v4111_v20, %v1585_v12 }
 0x468   : > { %v4432_v10 = vpop.f32.mrf.mxu1 }
 0x469   : > { %v4316_v32 = vpack.c.bf16 %v1586_v6, %v1586_v6 }
 0x46a   : > { %v1588_v33 = vpop.f32.mrf.mxu1 }
 0x46b   : > { %1627 = vst.msk [vmem:[%s5075_s20 + $0x8] sm:$0xf] %vm1624_vm0, %v4316_v32  ;;  %v1589_v55 = vadd.f32 %v4111_v20, %v1588_v33 }
 0x46c   : > { %v4433_v0 = vpop.f32.mrf.mxu1 }
 0x46d   : > { %v4317_v34 = vpack.c.bf16 %v1589_v55, %v1589_v55 }
 0x46f   : > { %1628 = vst.msk [vmem:[%s5075_s20 + $0xc] sm:$0xf] %vm1624_vm0, %v4317_v34 }
 0x47b   : > { %v1577_v19 = vpop.f32.mrf.mxu0 }
 0x47c   : > { %v1578_v35 = vadd.f32 %v4111_v20, %v1577_v19 }
 0x47d   : > { %v4428_v25 = vpop.f32.mrf.mxu0 }
 0x47e   : > { %v4314_v27 = vpack.c.bf16 %v1578_v35, %v1578_v35 }
 0x47f   : > { %v1580_v38 = vpop.f32.mrf.mxu0 }
 0x480   : > { %1625 = vst.msk [vmem:[%s5075_s20] sm:$0xf] %vm1624_vm0, %v4314_v27  ;;  %v1581_v39 = vadd.f32 %v4111_v20, %v1580_v38 }
 0x481   : > { %v4429_v40 = vpop.f32.mrf.mxu0 }
 0x482   : > { %v4315_v8 = vpack.c.bf16 %v1581_v39, %v1581_v39  ;;  %v1593_v43 = vpop.f32.mrf.mxu1 }
 0x483   : > { %v1594_v42 = vadd.f32 %v4111_v20, %v1593_v43 }
 0x484   : > { %1626 = vst.msk [vmem:[%s5075_s20 + $0x4] sm:$0xf] %vm1624_vm0, %v4315_v8  ;;  %v4436_v44 = vpop.f32.mrf.mxu1 }
 0x485   : > { %v4318_v37 = vpack.c.bf16 %v1594_v42, %v1594_v42 }
 0x486   : > { %v1596_v62 = vpop.f32.mrf.mxu1 }
 0x487   : > { %1629 = vst.msk [vmem:[%s5075_s20 + $0x10] sm:$0xf] %vm1624_vm0, %v4318_v37  ;;  %v1597_v45 = vadd.f32 %v4111_v20, %v1596_v62 }
 0x488   : > { %v4437_v46 = vpop.f32.mrf.mxu1 }
 0x489   : > { %v4319_v49 = vpack.c.bf16 %v1597_v45, %v1597_v45 }
 0x48b   : > { %1630 = vst.msk [vmem:[%s5075_s20 + $0x14] sm:$0xf] %vm1624_vm0, %v4319_v49 }
 0x48c PF: > { %p4123_p1 = scmp.ne.s32.totalorder %s4875_s18, 3 }
 0x48d   : > { %s4928_s25 = smov (!%p4123_p1), 8   ;;  %s4929_s26 = smov (!%p4123_p1), 16  }
 0x48e   : > { %1634 = sbr.rel (%p4123_p1) target bundleno = 1553 (0x611), region = 56  ;;  %s4930_s27 = smov (!%p4123_p1), 4  }
 0x48f   : > { %s4931_s30 = smov (!%p4123_p1), 12   ;;  %s4932_s7 = smov (!%p4123_p1), 20  }
 0x490   : > { %s4933_s8 = smov (!%p4123_p1), 24   ;;  %s4935_s9 = smov (!%p4123_p1), 28  }
 0x493   : > { %v1638_v18 = vld [vmem:[%s5056_s13 + $0x10] sm:$0xf]  ;;  %v1639_v48 = vld [vmem:[%s5056_s13 + $0x14] sm:$0xf]  ;;  %v5592_v51 = vld [vmem:[%s5056_s13 + $0xc] sm:$0xf] }
 0x494   : > { %v4130_v50 = vcombine.low %v1638_v18, %v1639_v48  ;;  %v5595_v24 = vld [vmem:[%s5063_s29 + $0xc] sm:$0xf]  ;;  %v1649_v52 = vld [vmem:[%s5063_s29 + $0x10] sm:$0xf]  ;;  %v5599_v53 = vcombine.low %v5592_v51, %v1638_v18  ;;  %v1640_v13 = vld [vmem:[%s5056_s13 + $0x18] sm:$0xf] }
 0x495   : > { %v4135_v54 = vcombine.low %v5595_v24, %v1649_v52  ;;  %v1643_v56 = vld [vmem:[%s5056_s13 + $0x1c] sm:$0xf]  ;;  %v5605_v47 = vcombine.low %v1639_v48, %v1640_v13  ;;  %vm1678_vm1 = vsmask.f32 7424  ;;  %v1650_v23 = vld [vmem:[%s5063_s29 + $0x14] sm:$0xf] }
 0x496   : > { %1727 = vrot.lane.b32.xlu0 %v4130_v50, %s4928_s25  ;;  %v1744_v57 = vshll.u32 %v4130_v50, 16  ;;  %v4131_v58 = vcombine.low %v1640_v13, %v1643_v56  ;;  %v5608_v59 = vld [vmem:[%s5056_s13 + $0x1c] ss:$0 sps:$4 sm:$0x11]   ;;  %v1687_v61 = vshll.u32 %v5599_v53, 16  ;;  %v1691_v1 = vshrl.u32 %v5599_v53, 16 }
 0x497   : > { %1794 = vrot.lane.b32.xlu1 %v4135_v54, %s4929_s26  ;;  %v1811_v60 = vshll.u32 %v4135_v54, 16  ;;  %v1695_v2 = vshll.u32 %v5605_v47, 16  ;;  %v1699_v3 = vshrl.u32 %v5605_v47, 16  ;;  %v1703_v5 = vshll.u32 %v5608_v59, 16  ;;  %v1651_v26 = vld [vmem:[%s5063_s29 + $0x18] sm:$0xf] }
 0x498   : > { %v5616_v9 = vrot.slane %v1744_v57, 1  ;;  %v5618_v36 = vrot.slane %v1687_v61, 1  ;;  %v1748_v11 = vshrl.u32 %v4130_v50, 16  ;;  %v1752_v14 = vshll.u32 %v4131_v58, 16  ;;  %v1654_v20 = vld [vmem:[%s5063_s29 + $0x1c] sm:$0xf] }
 0x499   : > { %v1756_v15 = vshrl.u32 %v4131_v58, 16  ;;  %v1697_v63 = vrot.slane %v1695_v2, 1  ;;  %v1705_v16 = vrot.slane %v1703_v5, 1  ;;  %v5622_v17 = vld [vmem:[%s5056_s13 + $0x20] ss:$0 sps:$4 sm:$0x11]   ;;  %v4136_v30 = vcombine.low %v1650_v23, %v1651_v26 }
 0x49a   : > { %1729 = vrot.lane.b32.xlu0 %v4131_v58, %s4928_s25  ;;  %v5624_v21 = vrot.slane %v1811_v60, 1  ;;  %v1693_v7 = vor.u32 %v1691_v1, %v5618_v36  ;;  %v1750_v41 = vor.u32 %v1748_v11, %v5616_v9  ;;  %v1754_v22 = vrot.slane %v1752_v14, 1  ;;  %v5634_v10 = vld [vmem:[%s5063_s29 + $0x1c] ss:$0 sps:$4 sm:$0x11]  }
 0x49b   : > { %v1815_v28 = vshrl.u32 %v4135_v54, 16  ;;  %v1701_v4 = vor.u32 %v1699_v3, %v1697_v63  ;;  %v1760_v29 = vshll.u32 %v5622_v17, 16  ;;  %v4140_v31 = vcombine.low %v1649_v52, %v1650_v23  ;;  %v5637_v32 = vld [vmem:[%s5056_s13 + $0x8] sm:$0xf]  ;;  %v1642_v19 = vld [vmem:[%s5056_s13 + $0x4] sm:$0xe] }
 0x49c   : > { %v1698_v12 = vsel %vm1678_vm1, %v1693_v7, %v1697_v63  ;;  %v1758_v6 = vor.u32 %v1756_v15, %v1754_v22  ;;  %v1755_v55 = vsel %vm1678_vm1, %v1750_v41, %v1754_v22  ;;  %v1819_v34 = vshll.u32 %v4136_v30, 16  ;;  %v5653_v45 = vld [vmem:[%s5063_s29 + $0x20] ss:$0 sps:$4 sm:$0x11]   ;;  %v1645_v48 = vld [vmem:[%s5056_s13 + $0x8] sm:$0xe] }
 0x49d   : > { %v1706_v33 = vsel %vm1678_vm1, %v1701_v4, %v1705_v16  ;;  %v1762_v0 = vrot.slane %v1760_v29, 1  ;;  %v1817_v35 = vor.u32 %v1815_v28, %v5624_v21  ;;  %v1868_v25 = vshll.u32 %v4140_v31, 16  ;;  %v4763_v61 = vld [vmem:[%s6501_s3 + $0x38] sm:$0xff]   ;;  %v1647_v14 = vld [vmem:[%s5063_s29 + $0x8] sm:$0xf]  ;;  %v4764_v16 = vld [vmem:[%s6501_s3 + $0x30] sm:$0xff]  }
 0x49e   : > { %1711 = vrot.lane.b32.xlu0 %v1698_v12, %s4930_s27  ;;  %1713 = vrot.lane.b32.xlu1 %v1706_v33, %s4930_s27  ;;  %v1823_v27 = vshrl.u32 %v4136_v30, 16  ;;  %v1827_v38 = vshll.u32 %v5634_v10, 16  ;;  %v1821_v40 = vrot.slane %v1819_v34, 1  ;;  %v4141_v8 = vcombine.low %v1651_v26, %v1654_v20  ;;  %v1653_v15 = vld [vmem:[%s5063_s29 + $0x4] sm:$0xe] }
 0x49f   : > { %v1763_v39 = vsel %vm1678_vm1, %v1758_v6, %v1762_v0  ;;  %v4128_v43 = vcombine.low %v1642_v19, %v5637_v32  ;;  %v5650_v37 = vrot.slane %v1868_v25, 1  ;;  %v1872_v62 = vshrl.u32 %v4140_v31, 16  ;;  %v1646_v12 = vld [vmem:[%s5063_s29 + $0x4] sm:$0xf] }
 0x4a0   : > { %v1825_v42 = vor.u32 %v1823_v27, %v1821_v40  ;;  %v1829_v44 = vrot.slane %v1827_v38, 1  ;;  %v1822_v46 = vsel %vm1678_vm1, %v1817_v35, %v1821_v40  ;;  %v1876_v49 = vshll.u32 %v4141_v8, 16 }
 0x4a1   : > { %v1682_v18 = vshll.u32 %v4128_v43, 16  ;;  %v1874_v52 = vor.u32 %v1872_v62, %v5650_v37  ;;  %v1880_v54 = vshrl.u32 %v4141_v8, 16  ;;  %v1884_v13 = vshll.u32 %v5653_v45, 16 }
 0x4a2   : > { %1770 = vrot.lane.b32.xlu0 %v1763_v39, %s4931_s30  ;;  %1768 = vrot.lane.b32.xlu1 %v1755_v55, %s4931_s30  ;;  %v1830_v50 = vsel %vm1678_vm1, %v1825_v42, %v1829_v44  ;;  %v1878_v56 = vrot.slane %v1876_v49, 1  ;;  %v1680_v57 = vshrl.u32 %v4128_v43, 16  ;;  %v4133_v60 = vcombine.low %v1645_v48, %v5592_v51 }
 0x4a3   : > { %v1684_v58 = vrot.slane %v1682_v18, 1  ;;  %v1886_v2 = vrot.slane %v1884_v13, 1  ;;  %v4934_v63 = vmov 0.0   ;;  %v4138_v26 = vcombine.low %v1653_v15, %v1647_v14 }
 0x4a4   : > { %v1882_v1 = vor.u32 %v1880_v54, %v1878_v56  ;;  %v1879_v3 = vsel %vm1678_vm1, %v1874_v52, %v1878_v56  ;;  %v1739_v11 = vshll.u32 %v4133_v60, 16  ;;  %4530 = vmatprep.subr.bf16.mxu1 %v4934_v63  ;;  %4438 = vmatprep.subr.bf16.mxu0 %v4934_v63  ;;  %v1737_v22 = vshrl.u32 %v4133_v60, 16 }
 0x4a5   : > { %v1685_v5 = vor.u32 %v1684_v58, %v1680_v57  ;;  %4532 = vmatpush3.bf16.msra.mxu1 %v4763_v61  ;;  %vm4936_vm2 = vmmov 0   ;;  %4439 = vmatpush3.bf16.msra.mxu0 %v4763_v61  ;;  %v1707_v28 = vshrl.u32 %v5608_v59, 16  ;;  %v1806_v29 = vshll.u32 %v4138_v26, 16 }
 0x4a6   : > { %1796 = vrot.lane.b32.xlu0 %v4136_v30, %s4929_s26  ;;  %1835 = vrot.lane.b32.xlu1 %v1822_v46, %s4932_s7  ;;  %v1887_v7 = vsel %vm1678_vm1, %v1882_v1, %v1886_v2  ;;  %v1741_v23 = vrot.slane %v1739_v11, 1  ;;  %v1656_v30 = vld [vmem:[%s5063_s29 + $0x8] sm:$0xe]  ;;  %v1804_v6 = vshrl.u32 %v4138_v26, 16  ;;  %v4134_v55 = vcombine.low %v1646_v12, %v1647_v14 }
 0x4a7   : > { %4531 = vmatprep.subr.bf16.mxu1 %v4934_v63  ;;  %v1690_v41 = vsel %vm1678_vm1, %v1685_v5, %v5618_v36  ;;  %4446 = vmatprep.mubr.msk.bf16.mxu1 %vm4936_vm2, %v4934_v63  ;;  %v4129_v36 = vcombine.low %v5637_v32, %v5592_v51  ;;  %v1808_v33 = vrot.slane %v1806_v29, 1  ;;  %v1764_v51 = vshrl.u32 %v5622_v17, 16 }
 0x4a8   : > { %4440 = vmatprep.subr.bf16.mxu0 %v4934_v63  ;;  %4442 = vmatprep.mubr.msk.bf16.mxu0 %vm4936_vm2, %v4934_v63  ;;  %v1742_v4 = vor.u32 %v1741_v23, %v1737_v22  ;;  %v1831_v25 = vshrl.u32 %v5634_v10, 16  ;;  %vm1898_vm3 = vcmask 31744   ;;  %vm1908_vm4 = vcmask 64512  }
 0x4a9   : > { %4533 = vmatpush3.bf16.msra.mxu1 %v4764_v16  ;;  %4441 = vmatpush3.bf16.msra.mxu0 %v4764_v16  ;;  %v1809_v0 = vor.u32 %v1808_v33, %v1804_v6  ;;  %vm1917_vm5 = vcmask 97280   ;;  %vm1926_vm6 = vcmask 130048   ;;  %vm1935_vm7 = vcmask 162816  }
 0x4aa   : > { %1837 = vrot.lane.b32.xlu0 %v1830_v50, %s4932_s7  ;;  %1851 = vrot.lane.b32.xlu1 %v4140_v31, %s4933_s8  ;;  %v4143_v31 = vcombine.low %v1656_v30, %v5595_v24  ;;  %v1747_v20 = vsel %vm1678_vm1, %v1742_v4, %v5616_v9  ;;  %vm1944_vm8 = vcmask 195584   ;;  %vm1953_vm9 = vcmask 228352   ;;  %v1635_v4 = vld [vmem:[%s5056_s13 + $0x4] sm:$0xf] }
 0x4ab   : > { %v1814_v9 = vsel %vm1678_vm1, %v1809_v0, %v5624_v21  ;;  %v1888_v21 = vshrl.u32 %v5653_v45, 16  ;;  %vm2010_vm10 = vcmask 261120   ;;  %v4124_v30 = vcombine.low %v1635_v4, %v5637_v32 }
 0x4ac   : > { %v1863_v34 = vshll.u32 %v4143_v31, 16  ;;  %v1861_v19 = vshrl.u32 %v4143_v31, 16  ;;  %vm2101_vm11 = vcmask 44032  }
 0x4ae   : > { %1853 = vrot.lane.b32.xlu0 %v4141_v8, %s4933_s8  ;;  %1892 = vrot.lane.b32.xlu1 %v1879_v3, %s4935_s9  ;;  %v1865_v35 = vrot.slane %v1863_v34, 1 }
 0x4b0   : > { %v1866_v27 = vor.u32 %v1865_v35, %v1861_v19 }
 0x4b2   : > { %1894 = vrot.lane.b32.xlu0 %v1887_v7, %s4935_s9  ;;  %1709 = vrot.lane.b32.xlu1 %v1690_v41, %s4930_s27  ;;  %v1871_v38 = vsel %vm1678_vm1, %v1866_v27, %v5650_v37 }
 0x4b6   : > { %1715 = vrot.lane.b32.xlu0 %v1707_v28, %s4930_s27  ;;  %1725 = vrot.lane.b32.xlu1 %v4129_v36, %s4928_s25 }
 0x4ba   : > { %1731 = vrot.lane.b32.xlu0 %v5622_v17, %s4928_s25  ;;  %1766 = vrot.lane.b32.xlu1 %v1747_v20, %s4931_s30  ;;  %v4139_v17 = vcombine.low %v1647_v14, %v5595_v24 }
 0x4be   : > { %1772 = vrot.lane.b32.xlu0 %v1764_v51, %s4931_s30  ;;  %1792 = vrot.lane.b32.xlu1 %v4134_v55, %s4929_s26 }
 0x4c2   : > { %1798 = vrot.lane.b32.xlu0 %v5634_v10, %s4929_s26  ;;  %1833 = vrot.lane.b32.xlu1 %v1814_v9, %s4932_s7 }
 0x4c6   : > { %1839 = vrot.lane.b32.xlu0 %v1831_v25, %s4932_s7  ;;  %1849 = vrot.lane.b32.xlu1 %v4139_v17, %s4933_s8 }
 0x4ca   : > { %1855 = vrot.lane.b32.xlu0 %v5653_v45, %s4933_s8  ;;  %1890 = vrot.lane.b32.xlu1 %v1871_v38, %s4935_s9 }
 0x4ce   : > { %1896 = vrot.lane.b32.xlu1 %v1888_v21, %s4935_s9 }
 0x508   : > { %v1728_v10 = vpop.permute.xlu0 %1727 }
 0x509   : > { %v1795_v39 = vpop.permute.xlu1 %1794 }
 0x50c   : > { %v1730_v24 = vpop.permute.xlu0 %1729 }
 0x510   : > { %v1712_v40 = vpop.permute.xlu0 %1711  ;;  %v1714_v8 = vpop.permute.xlu1 %1713 }
 0x511   : > { %v1903_v44 = vsel %vm1898_vm3, %v5599_v53, %v1712_v40  ;;  %v1905_v18 = vsel %vm1898_vm3, %v5605_v47, %v1714_v8 }
 0x512   : > { %v1912_v62 = vsel %vm1908_vm4, %v1903_v44, %v1728_v10  ;;  %v1914_v53 = vsel %vm1908_vm4, %v1905_v18, %v1730_v24 }
 0x514   : > { %v1771_v43 = vpop.permute.xlu0 %1770  ;;  %v1769_v42 = vpop.permute.xlu1 %1768 }
 0x515   : > { %v1921_v45 = vsel %vm1917_vm5, %v1912_v62, %v1769_v42  ;;  %v1923_v13 = vsel %vm1917_vm5, %v1914_v53, %v1771_v43 }
 0x516   : > { %v1930_v50 = vsel %vm1926_vm6, %v1921_v45, %v1795_v39  ;;  %v4148_v45 = vld [vmem:[%s6502_s4] ss:$0 sm:$0xff] }
 0x518   : > { %v1797_v37 = vpop.permute.xlu0 %1796  ;;  %v1836_v46 = vpop.permute.xlu1 %1835 }
 0x519   : > { %v1939_v52 = vsel %vm1935_vm7, %v1930_v50, %v1836_v46  ;;  %v1932_v58 = vsel %vm1926_vm6, %v1923_v13, %v1797_v37 }
 0x51c   : > { %v1838_v49 = vpop.permute.xlu0 %1837  ;;  %v1852_v48 = vpop.permute.xlu1 %1851 }
 0x51d   : > { %v1948_v56 = vsel %vm1944_vm8, %v1939_v52, %v1852_v48  ;;  %v1941_v60 = vsel %vm1935_vm7, %v1932_v58, %v1838_v49 }
 0x520   : > { %v1854_v54 = vpop.permute.xlu0 %1853  ;;  %v1893_v57 = vpop.permute.xlu1 %1892 }
 0x521   : > { %v1957_v47 = vsel %vm1953_vm9, %v1948_v56, %v1893_v57  ;;  %v1950_v1 = vsel %vm1944_vm8, %v1941_v60, %v1854_v54 }
 0x522   : > { %v1980_v61 = vshll.u32 %v1957_v47, 16  ;;  %v1984_v14 = vshrl.u32 %v1957_v47, 16 }
 0x524   : > { %v1895_v2 = vpop.permute.xlu0 %1894  ;;  %v1982_v3 = vrot.slane %v1980_v61, 1  ;;  %v1710_v5 = vpop.permute.xlu1 %1709 }
 0x525   : > { %v1959_v11 = vsel %vm1953_vm9, %v1950_v1, %v1895_v2  ;;  %v1901_v12 = vsel %vm1898_vm3, %v4124_v30, %v1710_v5 }
 0x526   : > { %v1987_v15 = vshll.u32 %v1959_v11, 16  ;;  %v1986_v16 = vor.u32 %v1984_v14, %v1982_v3  ;;  %v1991_v8 = vshrl.u32 %v1959_v11, 16 }
 0x528   : > { %v1989_v7 = vrot.slane %v1987_v15, 1  ;;  %v1716_v41 = vpop.permute.xlu0 %1715  ;;  %v1726_v22 = vpop.permute.xlu1 %1725 }
 0x529   : > { %v1910_v33 = vsel %vm1908_vm4, %v1901_v12, %v1726_v22  ;;  %v1907_v55 = vsel %vm1898_vm3, %v5608_v59, %v1716_v41 }
 0x52a   : > { %v1990_v23 = vsel %vm1678_vm1, %v1986_v16, %v1989_v7  ;;  %v1993_v44 = vor.u32 %v1991_v8, %v1989_v7 }
 0x52b   : > { %4447 = vmatmul.mubr.msk.bf16.vlgmr.msra.gmra.mxu1 %vm2010_vm10, %v1990_v23 }
 0x52c   : > { %v1732_v26 = vpop.permute.xlu0 %1731  ;;  %4450 = vmatprep.mubr.msk.bf16.mxu1 %vm4936_vm2, %v4934_v63  ;;  %v1767_v28 = vpop.permute.xlu1 %1766 }
 0x52d   : > { %v1919_v0 = vsel %vm1917_vm5, %v1910_v33, %v1767_v28  ;;  %v1916_v9 = vsel %vm1908_vm4, %v1907_v55, %v1732_v26 }
 0x530   : > { %v1773_v36 = vpop.permute.xlu0 %1772  ;;  %v1793_v29 = vpop.permute.xlu1 %1792 }
 0x531   : > { %v1928_v63 = vsel %vm1926_vm6, %v1919_v0, %v1793_v29  ;;  %v1925_v35 = vsel %vm1917_vm5, %v1916_v9, %v1773_v36 }
 0x534   : > { %v1799_v31 = vpop.permute.xlu0 %1798  ;;  %v1834_v20 = vpop.permute.xlu1 %1833 }
 0x535   : > { %v1937_v34 = vsel %vm1935_vm7, %v1928_v63, %v1834_v20  ;;  %v1934_v27 = vsel %vm1926_vm6, %v1925_v35, %v1799_v31 }
 0x538   : > { %v1840_v6 = vpop.permute.xlu0 %1839  ;;  %v1850_v51 = vpop.permute.xlu1 %1849 }
 0x539   : > { %v1946_v32 = vsel %vm1944_vm8, %v1937_v34, %v1850_v51  ;;  %v1943_v59 = vsel %vm1935_vm7, %v1934_v27, %v1840_v6 }
 0x53c   : > { %v1891_v19 = vpop.permute.xlu1 %1890  ;;  %v1856_v17 = vpop.permute.xlu0 %1855 }
 0x53d   : > { %v1955_v25 = vsel %vm1953_vm9, %v1946_v32, %v1891_v19  ;;  %v1952_v39 = vsel %vm1944_vm8, %v1943_v59, %v1856_v17 }
 0x53e   : > { %v1976_v38 = vshll.u32 %v1955_v25, 16  ;;  %v1974_v21 = vshrl.u32 %v1955_v25, 16 }
 0x540   : > { %v1978_v10 = vrot.slane %v1976_v38, 1  ;;  %v1897_v24 = vpop.permute.xlu1 %1896 }
 0x541   : > { %v1961_v40 = vsel %vm1953_vm9, %v1952_v39, %v1897_v24 }
 0x542   : > { %v1979_v43 = vor.u32 %v1978_v10, %v1974_v21  ;;  %v1994_v42 = vshll.u32 %v1961_v40, 16 }
 0x544   : > { %v1996_v37 = vrot.slane %v1994_v42, 1  ;;  %v1983_v62 = vsel %vm1678_vm1, %v1979_v43, %v1982_v3 }
 0x545   : > { %4443 = vmatmul.mubr.msk.bf16.vlgmr.msra.gmra.mxu0 %vm2010_vm10, %v1983_v62 }
 0x546   : > { %v1997_v46 = vsel %vm1678_vm1, %v1993_v44, %v1996_v37 }
 0x547   : > { %4451 = vmatmul.mubr.msk.bf16.gmra.mxu1 %vm2010_vm10, %v1997_v46 }
 0x5eb   : > { %v2062_v49 = vpop.f32.mrf.mxu1 }
 0x5ec   : > { %v2063_v18 = vadd.f32 %v4148_v45, %v2062_v49 }
 0x5ed   : > { %v4448_v48 = vpop.f32.mrf.mxu1 }
 0x5ee   : > { %v4322_v50 = vpack.c.bf16 %v2063_v18, %v2063_v18 }
 0x5ef   : > { %v2065_v53 = vpop.f32.mrf.mxu1 }
 0x5f0   : > { %2104 = vst.msk [vmem:[%s5075_s20 + $0x8] sm:$0xf] %vm2101_vm11, %v4322_v50  ;;  %v2066_v52 = vadd.f32 %v4148_v45, %v2065_v53 }
 0x5f1   : > { %v4449_v54 = vpop.f32.mrf.mxu1 }
 0x5f2   : > { %v4323_v13 = vpack.c.bf16 %v2066_v52, %v2066_v52 }
 0x5f4   : > { %2105 = vst.msk [vmem:[%s5075_s20 + $0xc] sm:$0xf] %vm2101_vm11, %v4323_v13 }
 0x605   : > { %v2054_v56 = vpop.f32.mrf.mxu0 }
 0x606   : > { %v2055_v57 = vadd.f32 %v4148_v45, %v2054_v56 }
 0x607   : > { %v4444_v58 = vpop.f32.mrf.mxu0  ;;  %v2070_v47 = vpop.f32.mrf.mxu1 }
 0x608   : > { %v4320_v60 = vpack.c.bf16 %v2055_v57, %v2055_v57  ;;  %v2071_v61 = vadd.f32 %v4148_v45, %v2070_v47 }
 0x609   : > { %v2057_v1 = vpop.f32.mrf.mxu0  ;;  %v4452_v2 = vpop.f32.mrf.mxu1 }
 0x60a   : > { %2102 = vst.msk [vmem:[%s5075_s20] sm:$0xf] %vm2101_vm11, %v4320_v60  ;;  %v4324_v3 = vpack.c.bf16 %v2071_v61, %v2071_v61  ;;  %v2058_v5 = vadd.f32 %v4148_v45, %v2057_v1 }
 0x60b   : > { %v4445_v11 = vpop.f32.mrf.mxu0  ;;  %v2073_v14 = vpop.f32.mrf.mxu1 }
 0x60c   : > { %2106 = vst.msk [vmem:[%s5075_s20 + $0x10] sm:$0xf] %vm2101_vm11, %v4324_v3  ;;  %v4321_v15 = vpack.c.bf16 %v2058_v5, %v2058_v5  ;;  %v2074_v16 = vadd.f32 %v4148_v45, %v2073_v14 }
 0x60d   : > { %v4453_v7 = vpop.f32.mrf.mxu1 }
 0x60e   : > { %2103 = vst.msk [vmem:[%s5075_s20 + $0x4] sm:$0xf] %vm2101_vm11, %v4321_v15  ;;  %v4325_v41 = vpack.c.bf16 %v2074_v16, %v2074_v16 }
 0x610   : > { %2107 = vst.msk [vmem:[%s5075_s20 + $0x14] sm:$0xf] %vm2101_vm11, %v4325_v41 }
 0x611 PF: > { %p4160_p2 = scmp.ne.s32.totalorder %s4875_s18, 4 }
 0x612   : > { %s4937_s14 = smov (!%p4160_p2), 16   ;;  %s4938_s16 = smov (!%p4160_p2), 8  }
 0x613   : > { %2111 = sbr.rel (%p4160_p2) target bundleno = 1926 (0x786), region = 60  ;;  %s4939_s15 = smov (!%p4160_p2), 24  }
 0x614   : > { %s4940_s0 = smov (!%p4160_p2), 12   ;;  %s4941_s19 = smov (!%p4160_p2), 4  }
 0x615   : > { %s4942_s23 = smov (!%p4160_p2), 20   ;;  %s4943_s25 = smov (!%p4160_p2), 28  }
 0x618   : > { %v5779_v22 = vld [vmem:[%s5070_s10 + $0x8] sm:$0xf]  ;;  %v2124_v23 = vld [vmem:[%s5070_s10 + $0xc] sm:$0xf]  ;;  %v2116_v36 = vld [vmem:[%s5063_s29 + $0x10] sm:$0xf] }
 0x619   : > { %v4170_v26 = vcombine.low %v5779_v22, %v2124_v23  ;;  %v2115_v28 = vld [vmem:[%s5063_s29 + $0xc] sm:$0xf]  ;;  %v2117_v4 = vld [vmem:[%s5063_s29 + $0x14] sm:$0xf]  ;;  %v2119_v29 = vld [vmem:[%s5063_s29 + $0x18] sm:$0xf] }
 0x61a   : > { %v5787_v30 = vcombine.low %v2116_v36, %v2117_v4  ;;  %v4166_v31 = vcombine.low %v2115_v28, %v2116_v36  ;;  %v2114_v20 = vld [vmem:[%s5063_s29 + $0x8] sm:$0xf]  ;;  %v2125_v12 = vld [vmem:[%s5070_s10 + $0x10] sm:$0xf]  ;;  %v5792_v33 = vcombine.low %v2117_v4, %v2119_v29  ;;  %v2126_v55 = vld [vmem:[%s5070_s10 + $0x14] sm:$0xf] }
 0x61b   : > { %2248 = vrot.lane.b32.xlu1 %v4170_v26, %s4937_s14  ;;  %v2263_v6 = vshll.u32 %v4170_v26, 16  ;;  %v5794_v51 = vcombine.low %v2114_v20, %v2115_v28  ;;  %v2128_v0 = vld [vmem:[%s5070_s10 + $0x18] sm:$0xf]  ;;  %v4174_v63 = vcombine.low %v2124_v23, %v2125_v12  ;;  %v5799_v9 = vcombine.low %v2125_v12, %v2126_v55  ;;  %v2112_v10 = vld [vmem:[%s5063_s29] sm:$0xf]  ;;  %v4781_v29 = vld [vmem:[%s6501_s3 + $0x48] sm:$0xff]  }
 0x61c   : > { %2190 = vrot.lane.b32.xlu0 %v4166_v31, %s4938_s16  ;;  %v2205_v34 = vshll.u32 %v4166_v31, 16  ;;  %v5801_v32 = vcombine.low %v2126_v55, %v2128_v0  ;;  %vm2148_vm12 = vsmask.f32 7424  ;;  %v2165_v17 = vshll.u32 %v5787_v30, 16  ;;  %v2113_v43 = vld [vmem:[%s5063_s29 + $0x4] sm:$0xf] }
 0x61d   : > { %v2311_v19 = vshll.u32 %v4174_v63, 16  ;;  %v2157_v35 = vshll.u32 %v5794_v51, 16  ;;  %v2161_v25 = vshrl.u32 %v5794_v51, 16  ;;  %v2209_v38 = vshrl.u32 %v4166_v31, 16  ;;  %v2121_v57 = vld [vmem:[%s5070_s10] sm:$0xf] }
 0x61e   : > { %v5806_v27 = vrot.slane %v2205_v34, 1  ;;  %v2213_v59 = vshll.u32 %v5792_v33, 16  ;;  %v5809_v21 = vrot.slane %v2263_v6, 1  ;;  %v2167_v24 = vrot.slane %v2165_v17, 1  ;;  %v2122_v58 = vld [vmem:[%s5070_s10 + $0x4] sm:$0xf] }
 0x61f   : > { %2296 = vrot.lane.b32.xlu1 %v4174_v63, %s4939_s15  ;;  %v2159_v39 = vrot.slane %v2157_v35, 1  ;;  %v2267_v40 = vshrl.u32 %v4170_v26, 16  ;;  %v2271_v8 = vshll.u32 %v5799_v9, 16  ;;  %v5816_v37 = vcombine.low %v2112_v10, %v2113_v43  ;;  %v4775_v48 = vld [vmem:[%s5063_s29 + $0x18] ss:$0 sps:$4 sm:$0x11]  }
 0x620   : > { %v2211_v42 = vor.u32 %v2209_v38, %v5806_v27  ;;  %v2215_v44 = vrot.slane %v2213_v59, 1  ;;  %v5818_v62 = vrot.slane %v2311_v19, 1  ;;  %v2315_v18 = vshrl.u32 %v4174_v63, 16  ;;  %v4777_v28 = vld [vmem:[%s5063_s29 + $0x1c] ss:$0 sps:$4 sm:$0x11]  }
 0x621   : > { %v2163_v46 = vor.u32 %v2161_v25, %v2159_v39  ;;  %v2269_v45 = vor.u32 %v2267_v40, %v5809_v21  ;;  %v5821_v49 = vrot.slane %v2271_v8, 1  ;;  %v2150_v53 = vshrl.u32 %v5816_v37, 16  ;;  %v4782_v19 = vld [vmem:[%s6501_s3 + $0x40] sm:$0xff]   ;;  %v4779_v17 = vld [vmem:[%s5070_s10 + $0x18] ss:$0 sps:$4 sm:$0x11]  }
 0x622   : > { %v2216_v50 = vsel %vm2148_vm12, %v2211_v42, %v2215_v44  ;;  %v2152_v52 = vshll.u32 %v5816_v37, 16  ;;  %v2319_v54 = vshll.u32 %v5801_v32, 16  ;;  %v4165_v56 = vcombine.low %v2113_v43, %v2114_v20  ;;  %v4780_v43 = vld [vmem:[%s5070_s10 + $0x1c] ss:$0 sps:$4 sm:$0x11]  }
 0x623   : > { %v2168_v13 = vsel %vm2148_vm12, %v2163_v46, %v2167_v24  ;;  %2227 = vrot.lane.b32.xlu1 %v2216_v50, %s4940_s0  ;;  %v2274_v47 = vsel %vm2148_vm12, %v2269_v45, %v5821_v49  ;;  %v2317_v61 = vor.u32 %v2315_v18, %v5818_v62  ;;  %v2169_v3 = vshrl.u32 %v5787_v30, 16 }
 0x624   : > { %2179 = vrot.lane.b32.xlu0 %v2168_v13, %s4941_s19  ;;  %v2154_v60 = vrot.slane %v2152_v52, 1  ;;  %v5836_v1 = vrot.slane %v2319_v54, 1  ;;  %v2200_v2 = vshll.u32 %v4165_v56, 16  ;;  %v2173_v5 = vshll.u32 %v4775_v48, 16 }
 0x625   : > { %v2198_v14 = vshrl.u32 %v4165_v56, 16  ;;  %v4169_v15 = vcombine.low %v2121_v57, %v2122_v58  ;;  %v2171_v23 = vor.u32 %v2169_v3, %v2167_v24  ;;  %v2217_v20 = vshrl.u32 %v5792_v33, 16 }
 0x626   : > { %v2155_v11 = vor.u32 %v2154_v60, %v2150_v53  ;;  %v2202_v16 = vrot.slane %v2200_v2, 1  ;;  %v2322_v41 = vsel %vm2148_vm12, %v2317_v61, %v5836_v1  ;;  %v2175_v26 = vrot.slane %v2173_v5, 1 }
 0x627   : > { %v2258_v4 = vshll.u32 %v4169_v15, 16  ;;  %v2221_v12 = vshll.u32 %v4777_v28, 16  ;;  %v2256_v6 = vshrl.u32 %v4169_v15, 16  ;;  %v4173_v63 = vcombine.low %v2122_v58, %v5779_v22 }
 0x628   : > { %2285 = vrot.lane.b32.xlu0 %v2274_v47, %s4942_s23  ;;  %v2160_v7 = vsel %vm2148_vm12, %v2155_v11, %v2159_v39  ;;  %v2203_v36 = vor.u32 %v2202_v16, %v2198_v14  ;;  %v2176_v31 = vsel %vm2148_vm12, %v2171_v23, %v2175_v26  ;;  %v4944_v34 = vmov 0.0  }
 0x629   : > { %2177 = vrot.lane.b32.xlu1 %v2160_v7, %s4941_s19  ;;  %v2260_v0 = vrot.slane %v2258_v4, 1  ;;  %4534 = vmatprep.subr.bf16.mxu1 %v4944_v34  ;;  %v2219_v35 = vor.u32 %v2217_v20, %v2215_v44  ;;  %v2223_v25 = vrot.slane %v2221_v12, 1  ;;  %vm4945_vm13 = vmmov 0  }
 0x62a   : > { %v2208_v55 = vsel %vm2148_vm12, %v2203_v36, %v5806_v27  ;;  %4454 = vmatprep.subr.bf16.mxu0 %v4944_v34  ;;  %4536 = vmatpush3.bf16.msra.mxu1 %v4781_v29  ;;  %v2306_v27 = vshll.u32 %v4173_v63, 16  ;;  %v2275_v59 = vshrl.u32 %v5799_v9, 16  ;;  %v2279_v10 = vshll.u32 %v4779_v17, 16 }
 0x62b   : > { %4535 = vmatprep.subr.bf16.mxu1 %v4944_v34  ;;  %v2261_v22 = vor.u32 %v2260_v0, %v2256_v6  ;;  %4462 = vmatprep.mubr.msk.bf16.mxu1 %vm4945_vm13, %v4944_v34  ;;  %v2224_v38 = vsel %vm2148_vm12, %v2219_v35, %v2223_v25  ;;  %v2304_v24 = vshrl.u32 %v4173_v63, 16  ;;  %v2327_v46 = vshll.u32 %v4780_v43, 16 }
 0x62c   : > { %2333 = vrot.lane.b32.xlu0 %v2322_v41, %s4943_s25  ;;  %4455 = vmatpush3.bf16.msra.mxu0 %v4781_v29  ;;  %v2308_v40 = vrot.slane %v2306_v27, 1  ;;  %v2281_v8 = vrot.slane %v2279_v10, 1  ;;  %vm2337_vm14 = vcmask 31744   ;;  %vm2344_vm15 = vcmask 64512  }
 0x62d   : > { %2188 = vrot.lane.b32.xlu1 %v4165_v56, %s4938_s16  ;;  %4456 = vmatprep.subr.bf16.mxu0 %v4944_v34  ;;  %v2266_v39 = vsel %vm2148_vm12, %v2261_v22, %v5809_v21  ;;  %v2323_v21 = vshrl.u32 %v5801_v32, 16  ;;  %v2329_v18 = vrot.slane %v2327_v46, 1  ;;  %vm2351_vm0 = vcmask 97280  }
 0x62e   : > { %4458 = vmatprep.mubr.msk.bf16.mxu0 %vm4945_vm13, %v4944_v34  ;;  %4537 = vmatpush3.bf16.msra.mxu1 %v4782_v19  ;;  %v2309_v42 = vor.u32 %v2308_v40, %v2304_v24  ;;  %vm2358_vm1 = vcmask 130048   ;;  %vm2365_vm2 = vcmask 162816   ;;  %vm2372_vm3 = vcmask 195584  }
 0x62f   : > { %vm2379_vm4 = vcmask 228352   ;;  %vm2410_vm5 = vcmask 261120   ;;  %vm2498_vm6 = vcmask 44032  }
 0x630   : > { %2181 = vrot.lane.b32.xlu0 %v2176_v31, %s4941_s19  ;;  %4457 = vmatpush3.bf16.msra.mxu0 %v4782_v19  ;;  %v2314_v45 = vsel %vm2148_vm12, %v2309_v42, %v5818_v62 }
 0x631   : > { %2225 = vrot.lane.b32.xlu1 %v2208_v55, %s4940_s0 }
 0x634   : > { %2192 = vrot.lane.b32.xlu0 %v5792_v33, %s4938_s16  ;;  %v2277_v33 = vor.u32 %v2275_v59, %v5821_v49  ;;  %v2325_v49 = vor.u32 %v2323_v21, %v5836_v1 }
 0x635   : > { %2246 = vrot.lane.b32.xlu1 %v4169_v15, %s4937_s14 }
 0x636   : > { %v2282_v44 = vsel %vm2148_vm12, %v2277_v33, %v2281_v8 }
 0x638   : > { %2229 = vrot.lane.b32.xlu0 %v2224_v38, %s4940_s0 }
 0x639   : > { %2283 = vrot.lane.b32.xlu1 %v2266_v39, %s4942_s23 }
 0x63c   : > { %2250 = vrot.lane.b32.xlu0 %v5799_v9, %s4937_s14  ;;  %v2330_v9 = vsel %vm2148_vm12, %v2325_v49, %v2329_v18 }
 0x63d   : > { %2294 = vrot.lane.b32.xlu1 %v4173_v63, %s4939_s15 }
 0x640   : > { %2287 = vrot.lane.b32.xlu0 %v2282_v44, %s4942_s23 }
 0x641   : > { %2331 = vrot.lane.b32.xlu1 %v2314_v45, %s4943_s25 }
 0x644   : > { %2298 = vrot.lane.b32.xlu0 %v5801_v32, %s4939_s15 }
 0x648   : > { %2335 = vrot.lane.b32.xlu0 %v2330_v9, %s4943_s25 }
 0x68d   : > { %v2249_v48 = vpop.permute.xlu1 %2248 }
 0x68e   : > { %v2191_v50 = vpop.permute.xlu0 %2190 }
 0x691   : > { %v2297_v53 = vpop.permute.xlu1 %2296 }
 0x695   : > { %v2228_v62 = vpop.permute.xlu1 %2227 }
 0x696   : > { %v2180_v52 = vpop.permute.xlu0 %2179 }
 0x697   : > { %v2341_v54 = vsel %vm2337_vm14, %v5794_v51, %v2180_v52 }
 0x698   : > { %v2348_v13 = vsel %vm2344_vm15, %v2341_v54, %v2191_v50 }
 0x699   : > { %v2355_v32 = vsel %vm2351_vm0, %v2348_v13, %v2228_v62 }
 0x69a   : > { %v2362_v56 = vsel %vm2358_vm1, %v2355_v32, %v2249_v48  ;;  %v2286_v57 = vpop.permute.xlu0 %2285 }
 0x69b   : > { %v2369_v58 = vsel %vm2365_vm2, %v2362_v56, %v2286_v57  ;;  %v2178_v47 = vpop.permute.xlu1 %2177 }
 0x69c   : > { %v2376_v60 = vsel %vm2372_vm3, %v2369_v58, %v2297_v53  ;;  %v2339_v14 = vsel %vm2337_vm14, %v5816_v37, %v2178_v47 }
 0x69e   : > { %v2334_v61 = vpop.permute.xlu0 %2333 }
 0x69f   : > { %v2383_v51 = vsel %vm2379_vm4, %v2376_v60, %v2334_v61  ;;  %v2189_v1 = vpop.permute.xlu1 %2188 }
 0x6a0   : > { %4463 = vmatmul.mubr.msk.bf16.vlgmr.msra.gmra.mxu1 %vm2410_vm5, %v2383_v51  ;;  %v2346_v7 = vsel %vm2344_vm15, %v2339_v14, %v2189_v1 }
 0x6a1   : > { %4466 = vmatprep.mubr.msk.bf16.mxu1 %vm4945_vm13, %v4944_v34 }
 0x6a2   : > { %v2182_v2 = vpop.permute.xlu0 %2181 }
 0x6a3   : > { %v2226_v3 = vpop.permute.xlu1 %2225  ;;  %v2343_v37 = vsel %vm2337_vm14, %v5787_v30, %v2182_v2  ;;  %v4181_v30 = vld [vmem:[%s6502_s4] ss:$0 sm:$0xff] }
 0x6a4   : > { %v2353_v26 = vsel %vm2351_vm0, %v2346_v7, %v2226_v3 }
 0x6a6   : > { %v2193_v5 = vpop.permute.xlu0 %2192 }
 0x6a7   : > { %v2247_v11 = vpop.permute.xlu1 %2246  ;;  %v2350_v12 = vsel %vm2344_vm15, %v2343_v37, %v2193_v5 }
 0x6a8   : > { %v2360_v28 = vsel %vm2358_vm1, %v2353_v26, %v2247_v11 }
 0x6aa   : > { %v2230_v15 = vpop.permute.xlu0 %2229 }
 0x6ab   : > { %v2284_v16 = vpop.permute.xlu1 %2283  ;;  %v2357_v55 = vsel %vm2351_vm0, %v2350_v12, %v2230_v15 }
 0x6ac   : > { %v2367_v36 = vsel %vm2365_vm2, %v2360_v28, %v2284_v16 }
 0x6ae   : > { %v2251_v41 = vpop.permute.xlu0 %2250 }
 0x6af   : > { %v2295_v23 = vpop.permute.xlu1 %2294  ;;  %v2364_v0 = vsel %vm2358_vm1, %v2357_v55, %v2251_v41 }
 0x6b0   : > { %v2374_v29 = vsel %vm2372_vm3, %v2367_v36, %v2295_v23 }
 0x6b2   : > { %v2288_v4 = vpop.permute.xlu0 %2287 }
 0x6b3   : > { %v2332_v31 = vpop.permute.xlu1 %2331  ;;  %v2371_v63 = vsel %vm2365_vm2, %v2364_v0, %v2288_v4 }
 0x6b4   : > { %v2381_v20 = vsel %vm2379_vm4, %v2374_v29, %v2332_v31 }
 0x6b5   : > { %4459 = vmatmul.mubr.msk.bf16.vlgmr.msra.gmra.mxu0 %vm2410_vm5, %v2381_v20 }
 0x6b6   : > { %v2299_v6 = vpop.permute.xlu0 %2298 }
 0x6b7   : > { %v2378_v34 = vsel %vm2372_vm3, %v2371_v63, %v2299_v6 }
 0x6ba   : > { %v2336_v19 = vpop.permute.xlu0 %2335 }
 0x6bb   : > { %v2385_v35 = vsel %vm2379_vm4, %v2378_v34, %v2336_v19 }
 0x6bc   : > { %4467 = vmatmul.mubr.msk.bf16.gmra.mxu1 %vm2410_vm5, %v2385_v35 }
 0x760   : > { %v2459_v25 = vpop.f32.mrf.mxu1 }
 0x761   : > { %v2460_v17 = vadd.f32 %v4181_v30, %v2459_v25 }
 0x762   : > { %v4464_v22 = vpop.f32.mrf.mxu1 }
 0x763   : > { %v4328_v27 = vpack.c.bf16 %v2460_v17, %v2460_v17 }
 0x764   : > { %v2462_v38 = vpop.f32.mrf.mxu1 }
 0x765   : > { %2501 = vst.msk [vmem:[%s5075_s20 + $0x8] sm:$0xf] %vm2498_vm6, %v4328_v27  ;;  %v2463_v59 = vadd.f32 %v4181_v30, %v2462_v38 }
 0x766   : > { %v4465_v10 = vpop.f32.mrf.mxu1 }
 0x767   : > { %v4329_v39 = vpack.c.bf16 %v2463_v59, %v2463_v59 }
 0x769   : > { %2502 = vst.msk [vmem:[%s5075_s20 + $0xc] sm:$0xf] %vm2498_vm6, %v4329_v39 }
 0x775   : > { %v2451_v24 = vpop.f32.mrf.mxu0 }
 0x776   : > { %v2452_v40 = vadd.f32 %v4181_v30, %v2451_v24 }
 0x777   : > { %v4460_v33 = vpop.f32.mrf.mxu0 }
 0x778   : > { %v4326_v8 = vpack.c.bf16 %v2452_v40, %v2452_v40 }
 0x779   : > { %v2454_v43 = vpop.f32.mrf.mxu0 }
 0x77a   : > { %2499 = vst.msk [vmem:[%s5075_s20] sm:$0xf] %vm2498_vm6, %v4326_v8  ;;  %v2455_v42 = vadd.f32 %v4181_v30, %v2454_v43 }
 0x77b   : > { %v4461_v44 = vpop.f32.mrf.mxu0 }
 0x77c   : > { %v4327_v21 = vpack.c.bf16 %v2455_v42, %v2455_v42  ;;  %v2467_v46 = vpop.f32.mrf.mxu1 }
 0x77d   : > { %v2468_v45 = vadd.f32 %v4181_v30, %v2467_v46 }
 0x77e   : > { %2500 = vst.msk [vmem:[%s5075_s20 + $0x4] sm:$0xf] %vm2498_vm6, %v4327_v21  ;;  %v4468_v49 = vpop.f32.mrf.mxu1 }
 0x77f   : > { %v4330_v18 = vpack.c.bf16 %v2468_v45, %v2468_v45 }
 0x780   : > { %v2470_v9 = vpop.f32.mrf.mxu1 }
 0x781   : > { %2503 = vst.msk [vmem:[%s5075_s20 + $0x10] sm:$0xf] %vm2498_vm6, %v4330_v18  ;;  %v2471_v48 = vadd.f32 %v4181_v30, %v2470_v9 }
 0x782   : > { %v4469_v50 = vpop.f32.mrf.mxu1 }
 0x783   : > { %v4331_v53 = vpack.c.bf16 %v2471_v48, %v2471_v48 }
 0x785   : > { %2504 = vst.msk [vmem:[%s5075_s20 + $0x14] sm:$0xf] %vm2498_vm6, %v4331_v53 }
 0x786 PF: > { %p4193_p3 = scmp.ne.s32.totalorder %s4875_s18, 5 }
 0x787   : > { %s4946_s8 = smov (!%p4193_p3), 8   ;;  %s4947_s28 = smov (!%p4193_p3), 16  }
 0x788   : > { %2508 = sbr.rel (%p4193_p3) target bundleno = 2315 (0x90b), region = 64  ;;  %s4948_s11 = smov (!%p4193_p3), 4  }
 0x789   : > { %s4949_s9 = smov (!%p4193_p3), 12   ;;  %s4950_s13 = smov (!%p4193_p3), 20  }
 0x78a   : > { %s4951_s16 = smov (!%p4193_p3), 24   ;;  %s4953_s19 = smov (!%p4193_p3), 28  }
 0x78d   : > { %v2512_v62 = vld [vmem:[%s5063_s29 + $0xc] sm:$0xf]  ;;  %v2513_v52 = vld [vmem:[%s5063_s29 + $0x10] sm:$0xf]  ;;  %v5942_v13 = vld [vmem:[%s5063_s29 + $0x8] sm:$0xf] }
 0x78e   : > { %v4200_v54 = vcombine.low %v2512_v62, %v2513_v52  ;;  %v5945_v32 = vld [vmem:[%s5070_s10 + $0x8] sm:$0xf]  ;;  %v2523_v56 = vld [vmem:[%s5070_s10 + $0xc] sm:$0xf]  ;;  %v5949_v57 = vcombine.low %v5942_v13, %v2512_v62  ;;  %v2514_v47 = vld [vmem:[%s5063_s29 + $0x14] sm:$0xf] }
 0x78f   : > { %v4205_v58 = vcombine.low %v5945_v32, %v2523_v56  ;;  %v2517_v60 = vld [vmem:[%s5063_s29 + $0x18] sm:$0xf]  ;;  %v5955_v51 = vcombine.low %v2513_v52, %v2514_v47  ;;  %vm2552_vm7 = vsmask.f32 7424  ;;  %v2524_v6 = vld [vmem:[%s5070_s10 + $0x10] sm:$0xf] }
 0x790   : > { %2601 = vrot.lane.b32.xlu0 %v4200_v54, %s4946_s8  ;;  %v2618_v61 = vshll.u32 %v4200_v54, 16  ;;  %v4201_v1 = vcombine.low %v2514_v47, %v2517_v60  ;;  %v5958_v2 = vld [vmem:[%s5063_s29 + $0x18] ss:$0 sps:$4 sm:$0x11]   ;;  %v2561_v5 = vshll.u32 %v5949_v57, 16  ;;  %v2565_v11 = vshrl.u32 %v5949_v57, 16 }
 0x791   : > { %2668 = vrot.lane.b32.xlu1 %v4205_v58, %s4947_s28  ;;  %v2685_v3 = vshll.u32 %v4205_v58, 16  ;;  %v2569_v14 = vshll.u32 %v5955_v51, 16  ;;  %v2573_v15 = vshrl.u32 %v5955_v51, 16  ;;  %v2577_v16 = vshll.u32 %v5958_v2, 16  ;;  %v2525_v55 = vld [vmem:[%s5070_s10 + $0x14] sm:$0xf] }
 0x792   : > { %v5966_v7 = vrot.slane %v2618_v61, 1  ;;  %v5968_v41 = vrot.slane %v2561_v5, 1  ;;  %v2622_v23 = vshrl.u32 %v4200_v54, 16  ;;  %v2626_v26 = vshll.u32 %v4201_v1, 16  ;;  %v2528_v30 = vld [vmem:[%s5070_s10 + $0x18] sm:$0xf] }
 0x793   : > { %v2630_v28 = vshrl.u32 %v4201_v1, 16  ;;  %v2571_v36 = vrot.slane %v2569_v14, 1  ;;  %v2579_v4 = vrot.slane %v2577_v16, 1  ;;  %v5972_v29 = vld [vmem:[%s5063_s29 + $0x1c] ss:$0 sps:$4 sm:$0x11]   ;;  %v4206_v19 = vcombine.low %v2524_v6, %v2525_v55 }
 0x794   : > { %2603 = vrot.lane.b32.xlu0 %v4201_v1, %s4946_s8  ;;  %v5974_v31 = vrot.slane %v2685_v3, 1  ;;  %v2567_v20 = vor.u32 %v2565_v11, %v5968_v41  ;;  %v2624_v37 = vor.u32 %v2622_v23, %v5966_v7  ;;  %v2628_v12 = vrot.slane %v2626_v26, 1  ;;  %v5984_v22 = vld [vmem:[%s5070_s10 + $0x18] ss:$0 sps:$4 sm:$0x11]  }
 0x795   : > { %v2689_v0 = vshrl.u32 %v4205_v58, 16  ;;  %v2575_v63 = vor.u32 %v2573_v15, %v2571_v36  ;;  %v2634_v34 = vshll.u32 %v5972_v29, 16  ;;  %v4210_v35 = vcombine.low %v2523_v56, %v2524_v6  ;;  %v5987_v27 = vld [vmem:[%s5063_s29 + $0x4] sm:$0xf]  ;;  %v2516_v24 = vld [vmem:[%s5063_s29] sm:$0xe] }
 0x796   : > { %v2572_v25 = vsel %vm2552_vm7, %v2567_v20, %v2571_v36  ;;  %v2632_v17 = vor.u32 %v2630_v28, %v2628_v12  ;;  %v2629_v59 = vsel %vm2552_vm7, %v2624_v37, %v2628_v12  ;;  %v2693_v39 = vshll.u32 %v4206_v19, 16  ;;  %v6003_v48 = vld [vmem:[%s5070_s10 + $0x1c] ss:$0 sps:$4 sm:$0x11]   ;;  %v2519_v52 = vld [vmem:[%s5063_s29 + $0x4] sm:$0xe] }
 0x797   : > { %v2580_v38 = vsel %vm2552_vm7, %v2575_v63, %v2579_v4  ;;  %v2636_v10 = vrot.slane %v2634_v34, 1  ;;  %v2691_v40 = vor.u32 %v2689_v0, %v5974_v31  ;;  %v2742_v33 = vshll.u32 %v4210_v35, 16  ;;  %v4803_v5 = vld [vmem:[%s6501_s3 + $0x58] sm:$0xff]   ;;  %v2521_v26 = vld [vmem:[%s5070_s10 + $0x4] sm:$0xf]  ;;  %v4804_v4 = vld [vmem:[%s6501_s3 + $0x50] sm:$0xff]  }
 0x798   : > { %2585 = vrot.lane.b32.xlu0 %v2572_v25, %s4948_s11  ;;  %2587 = vrot.lane.b32.xlu1 %v2580_v38, %s4948_s11  ;;  %v2697_v8 = vshrl.u32 %v4206_v19, 16  ;;  %v2701_v43 = vshll.u32 %v5984_v22, 16  ;;  %v2695_v44 = vrot.slane %v2693_v39, 1  ;;  %v4211_v21 = vcombine.low %v2525_v55, %v2528_v30  ;;  %v2527_v28 = vld [vmem:[%s5070_s10] sm:$0xe] }
 0x799   : > { %v2637_v42 = vsel %vm2552_vm7, %v2632_v17, %v2636_v10  ;;  %v4198_v46 = vcombine.low %v2516_v24, %v5987_v27  ;;  %v6000_v18 = vrot.slane %v2742_v33, 1  ;;  %v2746_v9 = vshrl.u32 %v4210_v35, 16  ;;  %v2520_v25 = vld [vmem:[%s5070_s10] sm:$0xf] }
 0x79a   : > { %v2699_v45 = vor.u32 %v2697_v8, %v2695_v44  ;;  %v2703_v49 = vrot.slane %v2701_v43, 1  ;;  %v2696_v50 = vsel %vm2552_vm7, %v2691_v40, %v2695_v44  ;;  %v2750_v53 = vshll.u32 %v4211_v21, 16 }
 0x79b   : > { %v2556_v62 = vshll.u32 %v4198_v46, 16  ;;  %v2748_v56 = vor.u32 %v2746_v9, %v6000_v18  ;;  %v2754_v58 = vshrl.u32 %v4211_v21, 16  ;;  %v2758_v47 = vshll.u32 %v6003_v48, 16 }
 0x79c   : > { %2644 = vrot.lane.b32.xlu0 %v2637_v42, %s4949_s9  ;;  %2642 = vrot.lane.b32.xlu1 %v2629_v59, %s4949_s9  ;;  %v2704_v54 = vsel %vm2552_vm7, %v2699_v45, %v2703_v49  ;;  %v2752_v60 = vrot.slane %v2750_v53, 1  ;;  %v2554_v61 = vshrl.u32 %v4198_v46, 16  ;;  %v4203_v3 = vcombine.low %v2519_v52, %v5942_v13 }
 0x79d   : > { %v2558_v1 = vrot.slane %v2556_v62, 1  ;;  %v2760_v14 = vrot.slane %v2758_v47, 1  ;;  %v4952_v36 = vmov 0.0   ;;  %v4208_v55 = vcombine.low %v2527_v28, %v2521_v26 }
 0x79e   : > { %v2756_v11 = vor.u32 %v2754_v58, %v2752_v60  ;;  %v2753_v15 = vsel %vm2552_vm7, %v2748_v56, %v2752_v60  ;;  %v2613_v23 = vshll.u32 %v4203_v3, 16  ;;  %4538 = vmatprep.subr.bf16.mxu1 %v4952_v36  ;;  %4470 = vmatprep.subr.bf16.mxu0 %v4952_v36  ;;  %v2611_v12 = vshrl.u32 %v4203_v3, 16 }
 0x79f   : > { %v2559_v16 = vor.u32 %v2558_v1, %v2554_v61  ;;  %4540 = vmatpush3.bf16.msra.mxu1 %v4803_v5  ;;  %vm4954_vm8 = vmmov 0   ;;  %4471 = vmatpush3.bf16.msra.mxu0 %v4803_v5  ;;  %v2581_v0 = vshrl.u32 %v5958_v2, 16  ;;  %v2680_v34 = vshll.u32 %v4208_v55, 16 }
 0x7a0   : > { %2670 = vrot.lane.b32.xlu0 %v4206_v19, %s4947_s28  ;;  %2709 = vrot.lane.b32.xlu1 %v2696_v50, %s4950_s13  ;;  %v2761_v20 = vsel %vm2552_vm7, %v2756_v11, %v2760_v14  ;;  %v2615_v6 = vrot.slane %v2613_v23, 1  ;;  %v2530_v19 = vld [vmem:[%s5070_s10 + $0x4] sm:$0xe]  ;;  %v2678_v17 = vshrl.u32 %v4208_v55, 16  ;;  %v4204_v59 = vcombine.low %v2520_v25, %v2521_v26 }
 0x7a1   : > { %4539 = vmatprep.subr.bf16.mxu1 %v4952_v36  ;;  %v2564_v37 = vsel %vm2552_vm7, %v2559_v16, %v5968_v41  ;;  %4478 = vmatprep.mubr.msk.bf16.mxu1 %vm4954_vm8, %v4952_v36  ;;  %v4199_v41 = vcombine.low %v5987_v27, %v5942_v13  ;;  %v2682_v38 = vrot.slane %v2680_v34, 1  ;;  %v2638_v13 = vshrl.u32 %v5972_v29, 16 }
 0x7a2   : > { %4472 = vmatprep.subr.bf16.mxu0 %v4952_v36  ;;  %4474 = vmatprep.mubr.msk.bf16.mxu0 %vm4954_vm8, %v4952_v36  ;;  %v2616_v63 = vor.u32 %v2615_v6, %v2611_v12  ;;  %v2705_v33 = vshrl.u32 %v5984_v22, 16  ;;  %vm2772_vm9 = vcmask 31744   ;;  %vm2782_vm10 = vcmask 64512  }
 0x7a3   : > { %4541 = vmatpush3.bf16.msra.mxu1 %v4804_v4  ;;  %4473 = vmatpush3.bf16.msra.mxu0 %v4804_v4  ;;  %v2683_v10 = vor.u32 %v2682_v38, %v2678_v17  ;;  %vm2791_vm11 = vcmask 97280   ;;  %vm2800_vm12 = vcmask 130048   ;;  %vm2809_vm13 = vcmask 162816  }
 0x7a4   : > { %2711 = vrot.lane.b32.xlu0 %v2704_v54, %s4950_s13  ;;  %2725 = vrot.lane.b32.xlu1 %v4210_v35, %s4951_s16  ;;  %v4213_v35 = vcombine.low %v2530_v19, %v5945_v32  ;;  %v2621_v30 = vsel %vm2552_vm7, %v2616_v63, %v5966_v7  ;;  %vm2818_vm14 = vcmask 195584   ;;  %vm2827_vm15 = vcmask 228352   ;;  %v2509_v63 = vld [vmem:[%s5063_s29] sm:$0xf] }
 0x7a5   : > { %v2688_v7 = vsel %vm2552_vm7, %v2683_v10, %v5974_v31  ;;  %v2762_v31 = vshrl.u32 %v6003_v48, 16  ;;  %vm2884_vm0 = vcmask 261120   ;;  %v4194_v19 = vcombine.low %v2509_v63, %v5987_v27 }
 0x7a6   : > { %v2737_v39 = vshll.u32 %v4213_v35, 16  ;;  %v2735_v24 = vshrl.u32 %v4213_v35, 16  ;;  %vm2975_vm1 = vcmask 44032  }
 0x7a8   : > { %2727 = vrot.lane.b32.xlu0 %v4211_v21, %s4951_s16  ;;  %2766 = vrot.lane.b32.xlu1 %v2753_v15, %s4953_s19  ;;  %v2739_v40 = vrot.slane %v2737_v39, 1 }
 0x7aa   : > { %v2740_v8 = vor.u32 %v2739_v40, %v2735_v24 }
 0x7ac   : > { %2768 = vrot.lane.b32.xlu0 %v2761_v20, %s4953_s19  ;;  %2583 = vrot.lane.b32.xlu1 %v2564_v37, %s4948_s11  ;;  %v2745_v43 = vsel %vm2552_vm7, %v2740_v8, %v6000_v18 }
 0x7b0   : > { %2589 = vrot.lane.b32.xlu0 %v2581_v0, %s4948_s11  ;;  %2599 = vrot.lane.b32.xlu1 %v4199_v41, %s4946_s8 }
 0x7b4   : > { %2605 = vrot.lane.b32.xlu0 %v5972_v29, %s4946_s8  ;;  %2640 = vrot.lane.b32.xlu1 %v2621_v30, %s4949_s9  ;;  %v4209_v29 = vcombine.low %v2521_v26, %v5945_v32 }
 0x7b8   : > { %2646 = vrot.lane.b32.xlu0 %v2638_v13, %s4949_s9  ;;  %2666 = vrot.lane.b32.xlu1 %v4204_v59, %s4947_s28 }
 0x7bc   : > { %2672 = vrot.lane.b32.xlu0 %v5984_v22, %s4947_s28  ;;  %2707 = vrot.lane.b32.xlu1 %v2688_v7, %s4950_s13 }
 0x7c0   : > { %2713 = vrot.lane.b32.xlu0 %v2705_v33, %s4950_s13  ;;  %2723 = vrot.lane.b32.xlu1 %v4209_v29, %s4951_s16 }
 0x7c4   : > { %2729 = vrot.lane.b32.xlu0 %v6003_v48, %s4951_s16  ;;  %2764 = vrot.lane.b32.xlu1 %v2745_v43, %s4953_s19 }
 0x7c8   : > { %2770 = vrot.lane.b32.xlu1 %v2762_v31, %s4953_s19 }
 0x802   : > { %v2602_v22 = vpop.permute.xlu0 %2601 }
 0x803   : > { %v2669_v42 = vpop.permute.xlu1 %2668 }
 0x806   : > { %v2604_v32 = vpop.permute.xlu0 %2603 }
 0x80a   : > { %v2586_v44 = vpop.permute.xlu0 %2585  ;;  %v2588_v21 = vpop.permute.xlu1 %2587 }
 0x80b   : > { %v2777_v49 = vsel %vm2772_vm9, %v5949_v57, %v2586_v44  ;;  %v2779_v62 = vsel %vm2772_vm9, %v5955_v51, %v2588_v21 }
 0x80c   : > { %v2786_v9 = vsel %vm2782_vm10, %v2777_v49, %v2602_v22  ;;  %v2788_v57 = vsel %vm2782_vm10, %v2779_v62, %v2604_v32 }
 0x80e   : > { %v2645_v46 = vpop.permute.xlu0 %2644  ;;  %v2643_v45 = vpop.permute.xlu1 %2642 }
 0x80f   : > { %v2795_v48 = vsel %vm2791_vm11, %v2786_v9, %v2643_v45  ;;  %v2797_v47 = vsel %vm2791_vm11, %v2788_v57, %v2645_v46 }
 0x810   : > { %v2804_v54 = vsel %vm2800_vm12, %v2795_v48, %v2669_v42  ;;  %v4218_v48 = vld [vmem:[%s6502_s4] ss:$0 sm:$0xff] }
 0x812   : > { %v2671_v18 = vpop.permute.xlu0 %2670  ;;  %v2710_v50 = vpop.permute.xlu1 %2709 }
 0x813   : > { %v2813_v56 = vsel %vm2809_vm13, %v2804_v54, %v2710_v50  ;;  %v2806_v1 = vsel %vm2800_vm12, %v2797_v47, %v2671_v18 }
 0x816   : > { %v2712_v53 = vpop.permute.xlu0 %2711  ;;  %v2726_v52 = vpop.permute.xlu1 %2725 }
 0x817   : > { %v2822_v60 = vsel %vm2818_vm14, %v2813_v56, %v2726_v52  ;;  %v2815_v3 = vsel %vm2809_vm13, %v2806_v1, %v2712_v53 }
 0x81a   : > { %v2728_v58 = vpop.permute.xlu0 %2727  ;;  %v2767_v61 = vpop.permute.xlu1 %2766 }
 0x81b   : > { %v2831_v51 = vsel %vm2827_vm15, %v2822_v60, %v2767_v61  ;;  %v2824_v11 = vsel %vm2818_vm14, %v2815_v3, %v2728_v58 }
 0x81c   : > { %v2854_v5 = vshll.u32 %v2831_v51, 16  ;;  %v2858_v26 = vshrl.u32 %v2831_v51, 16 }
 0x81e   : > { %v2769_v14 = vpop.permute.xlu0 %2768  ;;  %v2856_v15 = vrot.slane %v2854_v5, 1  ;;  %v2584_v16 = vpop.permute.xlu1 %2583 }
 0x81f   : > { %v2833_v23 = vsel %vm2827_vm15, %v2824_v11, %v2769_v14  ;;  %v2775_v25 = vsel %vm2772_vm9, %v4194_v19, %v2584_v16 }
 0x820   : > { %v2861_v28 = vshll.u32 %v2833_v23, 16  ;;  %v2860_v4 = vor.u32 %v2858_v26, %v2856_v15  ;;  %v2865_v21 = vshrl.u32 %v2833_v23, 16 }
 0x822   : > { %v2863_v20 = vrot.slane %v2861_v28, 1  ;;  %v2590_v37 = vpop.permute.xlu0 %2589  ;;  %v2600_v12 = vpop.permute.xlu1 %2599 }
 0x823   : > { %v2784_v38 = vsel %vm2782_vm10, %v2775_v25, %v2600_v12  ;;  %v2781_v59 = vsel %vm2772_vm9, %v5958_v2, %v2590_v37 }
 0x824   : > { %v2864_v6 = vsel %vm2552_vm7, %v2860_v4, %v2863_v20  ;;  %v2867_v49 = vor.u32 %v2865_v21, %v2863_v20 }
 0x825   : > { %4479 = vmatmul.mubr.msk.bf16.vlgmr.msra.gmra.mxu1 %vm2884_vm0, %v2864_v6 }
 0x826   : > { %v2606_v55 = vpop.permute.xlu0 %2605  ;;  %4482 = vmatprep.mubr.msk.bf16.mxu1 %vm4954_vm8, %v4952_v36  ;;  %v2641_v0 = vpop.permute.xlu1 %2640 }
 0x827   : > { %v2793_v10 = vsel %vm2791_vm11, %v2784_v38, %v2641_v0  ;;  %v2790_v7 = vsel %vm2782_vm10, %v2781_v59, %v2606_v55 }
 0x82a   : > { %v2647_v41 = vpop.permute.xlu0 %2646  ;;  %v2667_v34 = vpop.permute.xlu1 %2666 }
 0x82b   : > { %v2802_v36 = vsel %vm2800_vm12, %v2793_v10, %v2667_v34  ;;  %v2799_v40 = vsel %vm2791_vm11, %v2790_v7, %v2647_v41 }
 0x82e   : > { %v2673_v35 = vpop.permute.xlu0 %2672  ;;  %v2708_v30 = vpop.permute.xlu1 %2707 }
 0x82f   : > { %v2811_v39 = vsel %vm2809_vm13, %v2802_v36, %v2708_v30  ;;  %v2808_v8 = vsel %vm2800_vm12, %v2799_v40, %v2673_v35 }
 0x832   : > { %v2714_v17 = vpop.permute.xlu0 %2713  ;;  %v2724_v13 = vpop.permute.xlu1 %2723 }
 0x833   : > { %v2820_v27 = vsel %vm2818_vm14, %v2811_v39, %v2724_v13  ;;  %v2817_v2 = vsel %vm2809_vm13, %v2808_v8, %v2714_v17 }
 0x836   : > { %v2765_v24 = vpop.permute.xlu1 %2764  ;;  %v2730_v29 = vpop.permute.xlu0 %2729 }
 0x837   : > { %v2829_v33 = vsel %vm2827_vm15, %v2820_v27, %v2765_v24  ;;  %v2826_v42 = vsel %vm2818_vm14, %v2817_v2, %v2730_v29 }
 0x838   : > { %v2850_v43 = vshll.u32 %v2829_v33, 16  ;;  %v2848_v31 = vshrl.u32 %v2829_v33, 16 }
 0x83a   : > { %v2852_v22 = vrot.slane %v2850_v43, 1  ;;  %v2771_v32 = vpop.permute.xlu1 %2770 }
 0x83b   : > { %v2835_v44 = vsel %vm2827_vm15, %v2826_v42, %v2771_v32 }
 0x83c   : > { %v2853_v46 = vor.u32 %v2852_v22, %v2848_v31  ;;  %v2868_v45 = vshll.u32 %v2835_v44, 16 }
 0x83e   : > { %v2870_v18 = vrot.slane %v2868_v45, 1  ;;  %v2857_v9 = vsel %vm2552_vm7, %v2853_v46, %v2856_v15 }
 0x83f   : > { %4475 = vmatmul.mubr.msk.bf16.vlgmr.msra.gmra.mxu0 %vm2884_vm0, %v2857_v9 }
 0x840   : > { %v2871_v50 = vsel %vm2552_vm7, %v2867_v49, %v2870_v18 }
 0x841   : > { %4483 = vmatmul.mubr.msk.bf16.gmra.mxu1 %vm2884_vm0, %v2871_v50 }
 0x8e5   : > { %v2936_v53 = vpop.f32.mrf.mxu1 }
 0x8e6   : > { %v2937_v62 = vadd.f32 %v4218_v48, %v2936_v53 }
 0x8e7   : > { %v4480_v52 = vpop.f32.mrf.mxu1 }
 0x8e8   : > { %v4334_v54 = vpack.c.bf16 %v2937_v62, %v2937_v62 }
 0x8e9   : > { %v2939_v57 = vpop.f32.mrf.mxu1 }
 0x8ea   : > { %2978 = vst.msk [vmem:[%s5075_s20 + $0x8] sm:$0xf] %vm2975_vm1, %v4334_v54  ;;  %v2940_v56 = vadd.f32 %v4218_v48, %v2939_v57 }
 0x8eb   : > { %v4481_v58 = vpop.f32.mrf.mxu1 }
 0x8ec   : > { %v4335_v47 = vpack.c.bf16 %v2940_v56, %v2940_v56 }
 0x8ee   : > { %2979 = vst.msk [vmem:[%s5075_s20 + $0xc] sm:$0xf] %vm2975_vm1, %v4335_v47 }
 0x8ff   : > { %v2928_v60 = vpop.f32.mrf.mxu0 }
 0x900   : > { %v2929_v61 = vadd.f32 %v4218_v48, %v2928_v60 }
 0x901   : > { %v4476_v1 = vpop.f32.mrf.mxu0  ;;  %v2944_v51 = vpop.f32.mrf.mxu1 }
 0x902   : > { %v4332_v3 = vpack.c.bf16 %v2929_v61, %v2929_v61  ;;  %v2945_v5 = vadd.f32 %v4218_v48, %v2944_v51 }
 0x903   : > { %v2931_v11 = vpop.f32.mrf.mxu0  ;;  %v4484_v14 = vpop.f32.mrf.mxu1 }
 0x904   : > { %2976 = vst.msk [vmem:[%s5075_s20] sm:$0xf] %vm2975_vm1, %v4332_v3  ;;  %v4336_v15 = vpack.c.bf16 %v2945_v5, %v2945_v5  ;;  %v2932_v16 = vadd.f32 %v4218_v48, %v2931_v11 }
 0x905   : > { %v4477_v23 = vpop.f32.mrf.mxu0  ;;  %v2947_v26 = vpop.f32.mrf.mxu1 }
 0x906   : > { %2980 = vst.msk [vmem:[%s5075_s20 + $0x10] sm:$0xf] %vm2975_vm1, %v4336_v15  ;;  %v4333_v28 = vpack.c.bf16 %v2932_v16, %v2932_v16  ;;  %v2948_v4 = vadd.f32 %v4218_v48, %v2947_v26 }
 0x907   : > { %v4485_v20 = vpop.f32.mrf.mxu1 }
 0x908   : > { %2977 = vst.msk [vmem:[%s5075_s20 + $0x4] sm:$0xf] %vm2975_vm1, %v4333_v28  ;;  %v4337_v37 = vpack.c.bf16 %v2948_v4, %v2948_v4 }
 0x90a   : > { %2981 = vst.msk [vmem:[%s5075_s20 + $0x14] sm:$0xf] %vm2975_vm1, %v4337_v37 }
 0x90b PF: > { %p4230_p4 = scmp.ne.s32.totalorder %s4875_s18, 6 }
 0x90c   : > { %s4955_s26 = smov (!%p4230_p4), 16   ;;  %s4956_s27 = smov (!%p4230_p4), 8  }
 0x90d   : > { %2985 = sbr.rel (%p4230_p4) target bundleno = 2688 (0xa80), region = 68  ;;  %s4957_s30 = smov (!%p4230_p4), 24  }
 0x90e   : > { %s4958_s7 = smov (!%p4230_p4), 12   ;;  %s4959_s17 = smov (!%p4230_p4), 4  }
 0x90f   : > { %s4960_s6 = smov (!%p4230_p4), 20   ;;  %s4961_s8 = smov (!%p4230_p4), 28  }
 0x912   : > { %v6129_v12 = vld [vmem:[%s5070_s10 + $0xc] sm:$0xf]  ;;  %v2998_v6 = vld [vmem:[%s5070_s10 + $0x10] sm:$0xf]  ;;  %v2990_v41 = vld [vmem:[%s5063_s29 + $0x14] sm:$0xf] }
 0x913   : > { %v4240_v55 = vcombine.low %v6129_v12, %v2998_v6  ;;  %v2989_v0 = vld [vmem:[%s5063_s29 + $0x10] sm:$0xf]  ;;  %v2991_v63 = vld [vmem:[%s5063_s29 + $0x18] sm:$0xf]  ;;  %v2993_v34 = vld [vmem:[%s5063_s29 + $0x1c] sm:$0xf] }
 0x914   : > { %v6137_v19 = vcombine.low %v2990_v41, %v2991_v63  ;;  %v4236_v35 = vcombine.low %v2989_v0, %v2990_v41  ;;  %v2988_v30 = vld [vmem:[%s5063_s29 + $0xc] sm:$0xf]  ;;  %v2999_v25 = vld [vmem:[%s5070_s10 + $0x14] sm:$0xf]  ;;  %v6142_v38 = vcombine.low %v2991_v63, %v2993_v34  ;;  %v3000_v59 = vld [vmem:[%s5070_s10 + $0x18] sm:$0xf] }
 0x915   : > { %3122 = vrot.lane.b32.xlu1 %v4240_v55, %s4955_s26  ;;  %v3137_v17 = vshll.u32 %v4240_v55, 16  ;;  %v6144_v13 = vcombine.low %v2988_v30, %v2989_v0  ;;  %v3002_v10 = vld [vmem:[%s5070_s10 + $0x1c] sm:$0xf]  ;;  %v4244_v36 = vcombine.low %v2998_v6, %v2999_v25  ;;  %v6149_v7 = vcombine.low %v2999_v25, %v3000_v59  ;;  %v2986_v22 = vld [vmem:[%s5063_s29 + $0x4] sm:$0xf]  ;;  %v4821_v34 = vld [vmem:[%s6501_s3 + $0x68] sm:$0xff]  }
 0x916   : > { %3064 = vrot.lane.b32.xlu0 %v4236_v35, %s4956_s27  ;;  %v3079_v39 = vshll.u32 %v4236_v35, 16  ;;  %v6151_v27 = vcombine.low %v3000_v59, %v3002_v10  ;;  %vm3022_vm2 = vsmask.f32 7424  ;;  %v3039_v29 = vshll.u32 %v6137_v19, 16  ;;  %v2987_v46 = vld [vmem:[%s5063_s29 + $0x8] sm:$0xf] }
 0x917   : > { %v3185_v24 = vshll.u32 %v4244_v36, 16  ;;  %v3031_v40 = vshll.u32 %v6144_v13, 16  ;;  %v3035_v33 = vshrl.u32 %v6144_v13, 16  ;;  %v3083_v43 = vshrl.u32 %v4236_v35, 16  ;;  %v2995_v61 = vld [vmem:[%s5070_s10 + $0x4] sm:$0xf] }
 0x918   : > { %v6156_v8 = vrot.slane %v3079_v39, 1  ;;  %v3087_v2 = vshll.u32 %v6142_v38, 16  ;;  %v6159_v31 = vrot.slane %v3137_v17, 1  ;;  %v3041_v32 = vrot.slane %v3039_v29, 1  ;;  %v2996_v1 = vld [vmem:[%s5070_s10 + $0x8] sm:$0xf] }
 0x919   : > { %3170 = vrot.lane.b32.xlu1 %v4244_v36, %s4957_s30  ;;  %v3033_v42 = vrot.slane %v3031_v40, 1  ;;  %v3141_v44 = vshrl.u32 %v4240_v55, 16  ;;  %v3145_v21 = vshll.u32 %v6149_v7, 16  ;;  %v6166_v18 = vcombine.low %v2986_v22, %v2987_v46  ;;  %v4815_v52 = vld [vmem:[%s5063_s29 + $0x1c] ss:$0 sps:$4 sm:$0x11]  }
 0x91a   : > { %v3085_v45 = vor.u32 %v3083_v43, %v6156_v8  ;;  %v3089_v49 = vrot.slane %v3087_v2, 1  ;;  %v6168_v9 = vrot.slane %v3185_v24, 1  ;;  %v3189_v62 = vshrl.u32 %v4244_v36, 16  ;;  %v4817_v0 = vld [vmem:[%s5063_s29 + $0x20] ss:$0 sps:$4 sm:$0x11]  }
 0x91b   : > { %v3037_v50 = vor.u32 %v3035_v33, %v3033_v42  ;;  %v3143_v48 = vor.u32 %v3141_v44, %v6159_v31  ;;  %v6171_v53 = vrot.slane %v3145_v21, 1  ;;  %v3024_v57 = vshrl.u32 %v6166_v18, 16  ;;  %v4822_v24 = vld [vmem:[%s6501_s3 + $0x60] sm:$0xff]   ;;  %v4819_v29 = vld [vmem:[%s5070_s10 + $0x1c] ss:$0 sps:$4 sm:$0x11]  }
 0x91c   : > { %v3090_v54 = vsel %vm3022_vm2, %v3085_v45, %v3089_v49  ;;  %v3026_v56 = vshll.u32 %v6166_v18, 16  ;;  %v3193_v58 = vshll.u32 %v6151_v27, 16  ;;  %v4235_v60 = vcombine.low %v2987_v46, %v2988_v30  ;;  %v4820_v46 = vld [vmem:[%s5070_s10 + $0x20] ss:$0 sps:$4 sm:$0x11]  }
 0x91d   : > { %v3042_v47 = vsel %vm3022_vm2, %v3037_v50, %v3041_v32  ;;  %3101 = vrot.lane.b32.xlu1 %v3090_v54, %s4958_s7  ;;  %v3148_v51 = vsel %vm3022_vm2, %v3143_v48, %v6171_v53  ;;  %v3191_v5 = vor.u32 %v3189_v62, %v6168_v9  ;;  %v3043_v15 = vshrl.u32 %v6137_v19, 16 }
 0x91e   : > { %3053 = vrot.lane.b32.xlu0 %v3042_v47, %s4959_s17  ;;  %v3028_v3 = vrot.slane %v3026_v56, 1  ;;  %v6186_v11 = vrot.slane %v3193_v58, 1  ;;  %v3074_v14 = vshll.u32 %v4235_v60, 16  ;;  %v3047_v16 = vshll.u32 %v4815_v52, 16 }
 0x91f   : > { %v3072_v26 = vshrl.u32 %v4235_v60, 16  ;;  %v4239_v28 = vcombine.low %v2995_v61, %v2996_v1  ;;  %v3045_v6 = vor.u32 %v3043_v15, %v3041_v32  ;;  %v3091_v30 = vshrl.u32 %v6142_v38, 16 }
 0x920   : > { %v3029_v23 = vor.u32 %v3028_v3, %v3024_v57  ;;  %v3076_v4 = vrot.slane %v3074_v14, 1  ;;  %v3196_v37 = vsel %vm3022_vm2, %v3191_v5, %v6186_v11  ;;  %v3049_v55 = vrot.slane %v3047_v16, 1 }
 0x921   : > { %v3132_v63 = vshll.u32 %v4239_v28, 16  ;;  %v3095_v25 = vshll.u32 %v4817_v0, 16  ;;  %v3130_v17 = vshrl.u32 %v4239_v28, 16  ;;  %v4243_v36 = vcombine.low %v2996_v1, %v6129_v12 }
 0x922   : > { %3159 = vrot.lane.b32.xlu0 %v3148_v51, %s4960_s6  ;;  %v3034_v20 = vsel %vm3022_vm2, %v3029_v23, %v3033_v42  ;;  %v3077_v41 = vor.u32 %v3076_v4, %v3072_v26  ;;  %v3050_v35 = vsel %vm3022_vm2, %v3045_v6, %v3049_v55  ;;  %v4962_v39 = vmov 0.0  }
 0x923   : > { %3051 = vrot.lane.b32.xlu1 %v3034_v20, %s4959_s17  ;;  %v3134_v10 = vrot.slane %v3132_v63, 1  ;;  %4542 = vmatprep.subr.bf16.mxu1 %v4962_v39  ;;  %v3093_v40 = vor.u32 %v3091_v30, %v3089_v49  ;;  %v3097_v33 = vrot.slane %v3095_v25, 1  ;;  %vm4963_vm3 = vmmov 0  }
 0x924   : > { %v3082_v59 = vsel %vm3022_vm2, %v3077_v41, %v6156_v8  ;;  %4486 = vmatprep.subr.bf16.mxu0 %v4962_v39  ;;  %4544 = vmatpush3.bf16.msra.mxu1 %v4821_v34  ;;  %v3180_v8 = vshll.u32 %v4243_v36, 16  ;;  %v3149_v2 = vshrl.u32 %v6149_v7, 16  ;;  %v3153_v22 = vshll.u32 %v4819_v29, 16 }
 0x925   : > { %4543 = vmatprep.subr.bf16.mxu1 %v4962_v39  ;;  %v3135_v12 = vor.u32 %v3134_v10, %v3130_v17  ;;  %4494 = vmatprep.mubr.msk.bf16.mxu1 %vm4963_vm3, %v4962_v39  ;;  %v3098_v43 = vsel %vm3022_vm2, %v3093_v40, %v3097_v33  ;;  %v3178_v32 = vshrl.u32 %v4243_v36, 16  ;;  %v3201_v50 = vshll.u32 %v4820_v46, 16 }
 0x926   : > { %3207 = vrot.lane.b32.xlu0 %v3196_v37, %s4961_s8  ;;  %4487 = vmatpush3.bf16.msra.mxu0 %v4821_v34  ;;  %v3182_v44 = vrot.slane %v3180_v8, 1  ;;  %v3155_v21 = vrot.slane %v3153_v22, 1  ;;  %vm3211_vm4 = vcmask 31744   ;;  %vm3218_vm5 = vcmask 64512  }
 0x927   : > { %3062 = vrot.lane.b32.xlu1 %v4235_v60, %s4956_s27  ;;  %4488 = vmatprep.subr.bf16.mxu0 %v4962_v39  ;;  %v3140_v42 = vsel %vm3022_vm2, %v3135_v12, %v6159_v31  ;;  %v3197_v31 = vshrl.u32 %v6151_v27, 16  ;;  %v3203_v62 = vrot.slane %v3201_v50, 1  ;;  %vm3225_vm6 = vcmask 97280  }
 0x928   : > { %4490 = vmatprep.mubr.msk.bf16.mxu0 %vm4963_vm3, %v4962_v39  ;;  %4545 = vmatpush3.bf16.msra.mxu1 %v4822_v24  ;;  %v3183_v45 = vor.u32 %v3182_v44, %v3178_v32  ;;  %vm3232_vm7 = vcmask 130048   ;;  %vm3239_vm8 = vcmask 162816   ;;  %vm3246_vm9 = vcmask 195584  }
 0x929   : > { %vm3253_vm10 = vcmask 228352   ;;  %vm3284_vm11 = vcmask 261120   ;;  %vm3372_vm12 = vcmask 44032  }
 0x92a   : > { %3055 = vrot.lane.b32.xlu0 %v3050_v35, %s4959_s17  ;;  %4489 = vmatpush3.bf16.msra.mxu0 %v4822_v24  ;;  %v3188_v48 = vsel %vm3022_vm2, %v3183_v45, %v6168_v9 }
 0x92b   : > { %3099 = vrot.lane.b32.xlu1 %v3082_v59, %s4958_s7 }
 0x92e   : > { %3066 = vrot.lane.b32.xlu0 %v6142_v38, %s4956_s27  ;;  %v3151_v38 = vor.u32 %v3149_v2, %v6171_v53  ;;  %v3199_v53 = vor.u32 %v3197_v31, %v6186_v11 }
 0x92f   : > { %3120 = vrot.lane.b32.xlu1 %v4239_v28, %s4955_s26 }
 0x930   : > { %v3156_v49 = vsel %vm3022_vm2, %v3151_v38, %v3155_v21 }
 0x932   : > { %3103 = vrot.lane.b32.xlu0 %v3098_v43, %s4958_s7 }
 0x933   : > { %3157 = vrot.lane.b32.xlu1 %v3140_v42, %s4960_s6 }
 0x936   : > { %3124 = vrot.lane.b32.xlu0 %v6149_v7, %s4955_s26  ;;  %v3204_v7 = vsel %vm3022_vm2, %v3199_v53, %v3203_v62 }
 0x937   : > { %3168 = vrot.lane.b32.xlu1 %v4243_v36, %s4957_s30 }
 0x93a   : > { %3161 = vrot.lane.b32.xlu0 %v3156_v49, %s4960_s6 }
 0x93b   : > { %3205 = vrot.lane.b32.xlu1 %v3188_v48, %s4961_s8 }
 0x93e   : > { %3172 = vrot.lane.b32.xlu0 %v6151_v27, %s4957_s30 }
 0x942   : > { %3209 = vrot.lane.b32.xlu0 %v3204_v7, %s4961_s8 }
 0x987   : > { %v3123_v52 = vpop.permute.xlu1 %3122 }
 0x988   : > { %v3065_v54 = vpop.permute.xlu0 %3064 }
 0x98b   : > { %v3171_v57 = vpop.permute.xlu1 %3170 }
 0x98f   : > { %v3102_v9 = vpop.permute.xlu1 %3101 }
 0x990   : > { %v3054_v56 = vpop.permute.xlu0 %3053 }
 0x991   : > { %v3215_v58 = vsel %vm3211_vm4, %v6144_v13, %v3054_v56 }
 0x992   : > { %v3222_v47 = vsel %vm3218_vm5, %v3215_v58, %v3065_v54 }
 0x993   : > { %v3229_v27 = vsel %vm3225_vm6, %v3222_v47, %v3102_v9 }
 0x994   : > { %v3236_v60 = vsel %vm3232_vm7, %v3229_v27, %v3123_v52  ;;  %v3160_v61 = vpop.permute.xlu0 %3159 }
 0x995   : > { %v3243_v1 = vsel %vm3239_vm8, %v3236_v60, %v3160_v61  ;;  %v3052_v51 = vpop.permute.xlu1 %3051 }
 0x996   : > { %v3250_v3 = vsel %vm3246_vm9, %v3243_v1, %v3171_v57  ;;  %v3213_v26 = vsel %vm3211_vm4, %v6166_v18, %v3052_v51 }
 0x998   : > { %v3208_v5 = vpop.permute.xlu0 %3207 }
 0x999   : > { %v3257_v13 = vsel %vm3253_vm10, %v3250_v3, %v3208_v5  ;;  %v3063_v11 = vpop.permute.xlu1 %3062 }
 0x99a   : > { %4495 = vmatmul.mubr.msk.bf16.vlgmr.msra.gmra.mxu1 %vm3284_vm11, %v3257_v13  ;;  %v3220_v20 = vsel %vm3218_vm5, %v3213_v26, %v3063_v11 }
 0x99b   : > { %4498 = vmatprep.mubr.msk.bf16.mxu1 %vm4963_vm3, %v4962_v39 }
 0x99c   : > { %v3056_v14 = vpop.permute.xlu0 %3055 }
 0x99d   : > { %v3100_v15 = vpop.permute.xlu1 %3099  ;;  %v3217_v18 = vsel %vm3211_vm4, %v6137_v19, %v3056_v14  ;;  %v4251_v19 = vld [vmem:[%s6502_s4] ss:$0 sm:$0xff] }
 0x99e   : > { %v3227_v55 = vsel %vm3225_vm6, %v3220_v20, %v3100_v15 }
 0x9a0   : > { %v3067_v16 = vpop.permute.xlu0 %3066 }
 0x9a1   : > { %v3121_v23 = vpop.permute.xlu1 %3120  ;;  %v3224_v25 = vsel %vm3218_vm5, %v3217_v18, %v3067_v16 }
 0x9a2   : > { %v3234_v0 = vsel %vm3232_vm7, %v3227_v55, %v3121_v23 }
 0x9a4   : > { %v3104_v28 = vpop.permute.xlu0 %3103 }
 0x9a5   : > { %v3158_v4 = vpop.permute.xlu1 %3157  ;;  %v3231_v59 = vsel %vm3225_vm6, %v3224_v25, %v3104_v28 }
 0x9a6   : > { %v3241_v41 = vsel %vm3239_vm8, %v3234_v0, %v3158_v4 }
 0x9a8   : > { %v3125_v37 = vpop.permute.xlu0 %3124 }
 0x9a9   : > { %v3169_v6 = vpop.permute.xlu1 %3168  ;;  %v3238_v10 = vsel %vm3232_vm7, %v3231_v59, %v3125_v37 }
 0x9aa   : > { %v3248_v34 = vsel %vm3246_vm9, %v3241_v41, %v3169_v6 }
 0x9ac   : > { %v3162_v63 = vpop.permute.xlu0 %3161 }
 0x9ad   : > { %v3206_v35 = vpop.permute.xlu1 %3205  ;;  %v3245_v36 = vsel %vm3239_vm8, %v3238_v10, %v3162_v63 }
 0x9ae   : > { %v3255_v30 = vsel %vm3253_vm10, %v3248_v34, %v3206_v35 }
 0x9af   : > { %4491 = vmatmul.mubr.msk.bf16.vlgmr.msra.gmra.mxu0 %vm3284_vm11, %v3255_v30 }
 0x9b0   : > { %v3173_v17 = vpop.permute.xlu0 %3172 }
 0x9b1   : > { %v3252_v39 = vsel %vm3246_vm9, %v3245_v36, %v3173_v17 }
 0x9b4   : > { %v3210_v24 = vpop.permute.xlu0 %3209 }
 0x9b5   : > { %v3259_v40 = vsel %vm3253_vm10, %v3252_v39, %v3210_v24 }
 0x9b6   : > { %4499 = vmatmul.mubr.msk.bf16.gmra.mxu1 %vm3284_vm11, %v3259_v40 }
 0xa5a   : > { %v3333_v33 = vpop.f32.mrf.mxu1 }
 0xa5b   : > { %v3334_v29 = vadd.f32 %v4251_v19, %v3333_v33 }
 0xa5c   : > { %v4496_v12 = vpop.f32.mrf.mxu1 }
 0xa5d   : > { %v4340_v8 = vpack.c.bf16 %v3334_v29, %v3334_v29 }
 0xa5e   : > { %v3336_v43 = vpop.f32.mrf.mxu1 }
 0xa5f   : > { %3375 = vst.msk [vmem:[%s5075_s20 + $0x8] sm:$0xf] %vm3372_vm12, %v4340_v8  ;;  %v3337_v2 = vadd.f32 %v4251_v19, %v3336_v43 }
 0xa60   : > { %v4497_v22 = vpop.f32.mrf.mxu1 }
 0xa61   : > { %v4341_v42 = vpack.c.bf16 %v3337_v2, %v3337_v2 }
 0xa63   : > { %3376 = vst.msk [vmem:[%s5075_s20 + $0xc] sm:$0xf] %vm3372_vm12, %v4341_v42 }
 0xa6f   : > { %v3325_v32 = vpop.f32.mrf.mxu0 }
 0xa70   : > { %v3326_v44 = vadd.f32 %v4251_v19, %v3325_v32 }
 0xa71   : > { %v4492_v38 = vpop.f32.mrf.mxu0 }
 0xa72   : > { %v4338_v21 = vpack.c.bf16 %v3326_v44, %v3326_v44 }
 0xa73   : > { %v3328_v46 = vpop.f32.mrf.mxu0 }
 0xa74   : > { %3373 = vst.msk [vmem:[%s5075_s20] sm:$0xf] %vm3372_vm12, %v4338_v21  ;;  %v3329_v45 = vadd.f32 %v4251_v19, %v3328_v46 }
 0xa75   : > { %v4493_v49 = vpop.f32.mrf.mxu0 }
 0xa76   : > { %v4339_v31 = vpack.c.bf16 %v3329_v45, %v3329_v45  ;;  %v3341_v50 = vpop.f32.mrf.mxu1 }
 0xa77   : > { %v3342_v48 = vadd.f32 %v4251_v19, %v3341_v50 }
 0xa78   : > { %3374 = vst.msk [vmem:[%s5075_s20 + $0x4] sm:$0xf] %vm3372_vm12, %v4339_v31  ;;  %v4500_v53 = vpop.f32.mrf.mxu1 }
 0xa79   : > { %v4342_v62 = vpack.c.bf16 %v3342_v48, %v3342_v48 }
 0xa7a   : > { %v3344_v7 = vpop.f32.mrf.mxu1 }
 0xa7b   : > { %3377 = vst.msk [vmem:[%s5075_s20 + $0x10] sm:$0xf] %vm3372_vm12, %v4342_v62  ;;  %v3345_v52 = vadd.f32 %v4251_v19, %v3344_v7 }
 0xa7c   : > { %v4501_v54 = vpop.f32.mrf.mxu1 }
 0xa7d   : > { %v4343_v57 = vpack.c.bf16 %v3345_v52, %v3345_v52 }
 0xa7f   : > { %3378 = vst.msk [vmem:[%s5075_s20 + $0x14] sm:$0xf] %vm3372_vm12, %v4343_v57 }
 0xa80 PF: > { %p4263_p5 = scmp.ne.s32.totalorder %s4875_s18, 7 }
 0xa81   : > { %s4964_s18 = smov (!%p4263_p5), 8   ;;  %s4965_s16 = smov (!%p4263_p5), 16  }
 0xa82   : > { %3382 = sbr.rel (%p4263_p5) target bundleno = 3077 (0xc05), region = 72  ;;  %s4966_s15 = smov (!%p4263_p5), 4  }
 0xa83   : > { %s4967_s0 = smov (!%p4263_p5), 12   ;;  %s4968_s19 = smov (!%p4263_p5), 20  }
 0xa84   : > { %s4969_s26 = smov (!%p4263_p5), 24   ;;  %s4971_s7 = smov (!%p4263_p5), 28  }
 0xa87   : > { %v3386_v9 = vld [vmem:[%s5063_s29 + $0x10] sm:$0xf]  ;;  %v3387_v56 = vld [vmem:[%s5063_s29 + $0x14] sm:$0xf]  ;;  %v6292_v47 = vld [vmem:[%s5063_s29 + $0xc] sm:$0xf] }
 0xa88   : > { %v4270_v58 = vcombine.low %v3386_v9, %v3387_v56  ;;  %v6295_v27 = vld [vmem:[%s5070_s10 + $0xc] sm:$0xf]  ;;  %v3397_v60 = vld [vmem:[%s5070_s10 + $0x10] sm:$0xf]  ;;  %v6299_v61 = vcombine.low %v6292_v47, %v3386_v9  ;;  %v3388_v51 = vld [vmem:[%s5063_s29 + $0x18] sm:$0xf] }
 0xa89   : > { %v4275_v1 = vcombine.low %v6295_v27, %v3397_v60  ;;  %v3391_v3 = vld [vmem:[%s5063_s29 + $0x1c] sm:$0xf]  ;;  %v6305_v13 = vcombine.low %v3387_v56, %v3388_v51  ;;  %vm3426_vm13 = vsmask.f32 7424  ;;  %v3398_v17 = vld [vmem:[%s5070_s10 + $0x14] sm:$0xf] }
 0xa8a   : > { %3475 = vrot.lane.b32.xlu0 %v4270_v58, %s4964_s18  ;;  %v3492_v5 = vshll.u32 %v4270_v58, 16  ;;  %v4271_v11 = vcombine.low %v3388_v51, %v3391_v3  ;;  %v6308_v14 = vld [vmem:[%s5063_s29 + $0x1c] ss:$0 sps:$4 sm:$0x11]   ;;  %v3435_v16 = vshll.u32 %v6299_v61, 16  ;;  %v3439_v23 = vshrl.u32 %v6299_v61, 16 }
 0xa8b   : > { %3542 = vrot.lane.b32.xlu1 %v4275_v1, %s4965_s16  ;;  %v3559_v15 = vshll.u32 %v4275_v1, 16  ;;  %v3443_v26 = vshll.u32 %v6305_v13, 16  ;;  %v3447_v28 = vshrl.u32 %v6305_v13, 16  ;;  %v3451_v4 = vshll.u32 %v6308_v14, 16  ;;  %v3399_v59 = vld [vmem:[%s5070_s10 + $0x18] sm:$0xf] }
 0xa8c   : > { %v6316_v20 = vrot.slane %v3492_v5, 1  ;;  %v6318_v37 = vrot.slane %v3435_v16, 1  ;;  %v3496_v6 = vshrl.u32 %v4270_v58, 16  ;;  %v3500_v55 = vshll.u32 %v4271_v11, 16  ;;  %v3402_v19 = vld [vmem:[%s5070_s10 + $0x1c] sm:$0xf] }
 0xa8d   : > { %v3504_v0 = vshrl.u32 %v4271_v11, 16  ;;  %v3445_v41 = vrot.slane %v3443_v26, 1  ;;  %v3453_v63 = vrot.slane %v3451_v4, 1  ;;  %v6322_v34 = vld [vmem:[%s5063_s29 + $0x20] ss:$0 sps:$4 sm:$0x11]   ;;  %v4276_v24 = vcombine.low %v3398_v17, %v3399_v59 }
 0xa8e   : > { %3477 = vrot.lane.b32.xlu0 %v4271_v11, %s4964_s18  ;;  %v6324_v35 = vrot.slane %v3559_v15, 1  ;;  %v3441_v30 = vor.u32 %v3439_v23, %v6318_v37  ;;  %v3498_v18 = vor.u32 %v3496_v6, %v6316_v20  ;;  %v3502_v25 = vrot.slane %v3500_v55, 1  ;;  %v6334_v12 = vld [vmem:[%s5070_s10 + $0x1c] ss:$0 sps:$4 sm:$0x11]  }
 0xa8f   : > { %v3563_v10 = vshrl.u32 %v4275_v1, 16  ;;  %v3449_v36 = vor.u32 %v3447_v28, %v3445_v41  ;;  %v3508_v39 = vshll.u32 %v6322_v34, 16  ;;  %v4280_v40 = vcombine.low %v3397_v60, %v3398_v17  ;;  %v6337_v8 = vld [vmem:[%s5063_s29 + $0x8] sm:$0xf]  ;;  %v3390_v32 = vld [vmem:[%s5063_s29 + $0x4] sm:$0xe] }
 0xa90   : > { %v3446_v33 = vsel %vm3426_vm13, %v3441_v30, %v3445_v41  ;;  %v3506_v29 = vor.u32 %v3504_v0, %v3502_v25  ;;  %v3503_v2 = vsel %vm3426_vm13, %v3498_v18, %v3502_v25  ;;  %v3567_v42 = vshll.u32 %v4276_v24, 16  ;;  %v6353_v52 = vld [vmem:[%s5070_s10 + $0x20] ss:$0 sps:$4 sm:$0x11]   ;;  %v3393_v56 = vld [vmem:[%s5063_s29 + $0x8] sm:$0xe] }
 0xa91   : > { %v3454_v43 = vsel %vm3426_vm13, %v3449_v36, %v3453_v63  ;;  %v3510_v22 = vrot.slane %v3508_v39, 1  ;;  %v3565_v44 = vor.u32 %v3563_v10, %v6324_v35  ;;  %v3616_v38 = vshll.u32 %v4280_v40, 16  ;;  %v4843_v16 = vld [vmem:[%s6501_s3 + $0x78] sm:$0xff]   ;;  %v3395_v55 = vld [vmem:[%s5070_s10 + $0x8] sm:$0xf]  ;;  %v4844_v63 = vld [vmem:[%s6501_s3 + $0x70] sm:$0xff]  }
 0xa92   : > { %3459 = vrot.lane.b32.xlu0 %v3446_v33, %s4966_s15  ;;  %3461 = vrot.lane.b32.xlu1 %v3454_v43, %s4966_s15  ;;  %v3571_v21 = vshrl.u32 %v4276_v24, 16  ;;  %v3575_v46 = vshll.u32 %v6334_v12, 16  ;;  %v3569_v49 = vrot.slane %v3567_v42, 1  ;;  %v4281_v31 = vcombine.low %v3399_v59, %v3402_v19  ;;  %v3401_v0 = vld [vmem:[%s5070_s10 + $0x4] sm:$0xe] }
 0xa93   : > { %v3511_v45 = vsel %vm3426_vm13, %v3506_v29, %v3510_v22  ;;  %v4268_v50 = vcombine.low %v3390_v32, %v6337_v8  ;;  %v6350_v62 = vrot.slane %v3616_v38, 1  ;;  %v3620_v7 = vshrl.u32 %v4280_v40, 16  ;;  %v3394_v33 = vld [vmem:[%s5070_s10 + $0x4] sm:$0xf] }
 0xa94   : > { %v3573_v48 = vor.u32 %v3571_v21, %v3569_v49  ;;  %v3577_v53 = vrot.slane %v3575_v46, 1  ;;  %v3570_v54 = vsel %vm3426_vm13, %v3565_v44, %v3569_v49  ;;  %v3624_v57 = vshll.u32 %v4281_v31, 16 }
 0xa95   : > { %v3430_v9 = vshll.u32 %v4268_v50, 16  ;;  %v3622_v60 = vor.u32 %v3620_v7, %v6350_v62  ;;  %v3628_v1 = vshrl.u32 %v4281_v31, 16  ;;  %v3632_v51 = vshll.u32 %v6353_v52, 16 }
 0xa96   : > { %3518 = vrot.lane.b32.xlu0 %v3511_v45, %s4967_s0  ;;  %3516 = vrot.lane.b32.xlu1 %v3503_v2, %s4967_s0  ;;  %v3578_v58 = vsel %vm3426_vm13, %v3573_v48, %v3577_v53  ;;  %v3626_v3 = vrot.slane %v3624_v57, 1  ;;  %v3428_v5 = vshrl.u32 %v4268_v50, 16  ;;  %v4273_v15 = vcombine.low %v3393_v56, %v6292_v47 }
 0xa97   : > { %v3432_v11 = vrot.slane %v3430_v9, 1  ;;  %v3634_v26 = vrot.slane %v3632_v51, 1  ;;  %v4970_v41 = vmov 0.0   ;;  %v4278_v59 = vcombine.low %v3401_v0, %v3395_v55 }
 0xa98   : > { %v3630_v23 = vor.u32 %v3628_v1, %v3626_v3  ;;  %v3627_v28 = vsel %vm3426_vm13, %v3622_v60, %v3626_v3  ;;  %v3487_v6 = vshll.u32 %v4273_v15, 16  ;;  %4546 = vmatprep.subr.bf16.mxu1 %v4970_v41  ;;  %4502 = vmatprep.subr.bf16.mxu0 %v4970_v41  ;;  %v3485_v25 = vshrl.u32 %v4273_v15, 16 }
 0xa99   : > { %v3433_v4 = vor.u32 %v3432_v11, %v3428_v5  ;;  %4548 = vmatpush3.bf16.msra.mxu1 %v4843_v16  ;;  %vm4972_vm14 = vmmov 0   ;;  %4503 = vmatpush3.bf16.msra.mxu0 %v4843_v16  ;;  %v3455_v10 = vshrl.u32 %v6308_v14, 16  ;;  %v3554_v39 = vshll.u32 %v4278_v59, 16 }
 0xa9a   : > { %3544 = vrot.lane.b32.xlu0 %v4276_v24, %s4965_s16  ;;  %3583 = vrot.lane.b32.xlu1 %v3570_v54, %s4968_s19  ;;  %v3635_v30 = vsel %vm3426_vm13, %v3630_v23, %v3634_v26  ;;  %v3489_v17 = vrot.slane %v3487_v6, 1  ;;  %v3404_v24 = vld [vmem:[%s5070_s10 + $0x8] sm:$0xe]  ;;  %v3552_v29 = vshrl.u32 %v4278_v59, 16  ;;  %v4274_v2 = vcombine.low %v3394_v33, %v3395_v55 }
 0xa9b   : > { %4547 = vmatprep.subr.bf16.mxu1 %v4970_v41  ;;  %v3438_v18 = vsel %vm3426_vm13, %v3433_v4, %v6318_v37  ;;  %4510 = vmatprep.mubr.msk.bf16.mxu1 %vm4972_vm14, %v4970_v41  ;;  %v4269_v37 = vcombine.low %v6337_v8, %v6292_v47  ;;  %v3556_v43 = vrot.slane %v3554_v39, 1  ;;  %v3512_v47 = vshrl.u32 %v6322_v34, 16 }
 0xa9c   : > { %4504 = vmatprep.subr.bf16.mxu0 %v4970_v41  ;;  %4506 = vmatprep.mubr.msk.bf16.mxu0 %vm4972_vm14, %v4970_v41  ;;  %v3490_v36 = vor.u32 %v3489_v17, %v3485_v25  ;;  %v3579_v38 = vshrl.u32 %v6334_v12, 16  ;;  %vm3646_vm15 = vcmask 31744   ;;  %vm3656_vm0 = vcmask 64512  }
 0xa9d   : > { %4549 = vmatpush3.bf16.msra.mxu1 %v4844_v63  ;;  %4505 = vmatpush3.bf16.msra.mxu0 %v4844_v63  ;;  %v3557_v22 = vor.u32 %v3556_v43, %v3552_v29  ;;  %vm3665_vm1 = vcmask 97280   ;;  %vm3674_vm2 = vcmask 130048   ;;  %vm3683_vm3 = vcmask 162816  }
 0xa9e   : > { %3585 = vrot.lane.b32.xlu0 %v3578_v58, %s4968_s19  ;;  %3599 = vrot.lane.b32.xlu1 %v4280_v40, %s4969_s26  ;;  %v4283_v40 = vcombine.low %v3404_v24, %v6295_v27  ;;  %v3495_v19 = vsel %vm3426_vm13, %v3490_v36, %v6316_v20  ;;  %vm3692_vm4 = vcmask 195584   ;;  %vm3701_vm5 = vcmask 228352   ;;  %v3383_v36 = vld [vmem:[%s5063_s29 + $0x4] sm:$0xf] }
 0xa9f   : > { %v3562_v20 = vsel %vm3426_vm13, %v3557_v22, %v6324_v35  ;;  %v3636_v35 = vshrl.u32 %v6353_v52, 16  ;;  %vm3758_vm6 = vcmask 261120   ;;  %v4264_v24 = vcombine.low %v3383_v36, %v6337_v8 }
 0xaa0   : > { %v3611_v42 = vshll.u32 %v4283_v40, 16  ;;  %v3609_v32 = vshrl.u32 %v4283_v40, 16  ;;  %vm3849_vm7 = vcmask 44032  }
 0xaa2   : > { %3601 = vrot.lane.b32.xlu0 %v4281_v31, %s4969_s26  ;;  %3640 = vrot.lane.b32.xlu1 %v3627_v28, %s4971_s7  ;;  %v3613_v44 = vrot.slane %v3611_v42, 1 }
 0xaa4   : > { %v3614_v21 = vor.u32 %v3613_v44, %v3609_v32 }
 0xaa6   : > { %3642 = vrot.lane.b32.xlu0 %v3635_v30, %s4971_s7  ;;  %3457 = vrot.lane.b32.xlu1 %v3438_v18, %s4966_s15  ;;  %v3619_v46 = vsel %vm3426_vm13, %v3614_v21, %v6350_v62 }
 0xaaa   : > { %3463 = vrot.lane.b32.xlu0 %v3455_v10, %s4966_s15  ;;  %3473 = vrot.lane.b32.xlu1 %v4269_v37, %s4964_s18 }
 0xaae   : > { %3479 = vrot.lane.b32.xlu0 %v6322_v34, %s4964_s18  ;;  %3514 = vrot.lane.b32.xlu1 %v3495_v19, %s4967_s0  ;;  %v4279_v34 = vcombine.low %v3395_v55, %v6295_v27 }
 0xab2   : > { %3520 = vrot.lane.b32.xlu0 %v3512_v47, %s4967_s0  ;;  %3540 = vrot.lane.b32.xlu1 %v4274_v2, %s4965_s16 }
 0xab6   : > { %3546 = vrot.lane.b32.xlu0 %v6334_v12, %s4965_s16  ;;  %3581 = vrot.lane.b32.xlu1 %v3562_v20, %s4968_s19 }
 0xaba   : > { %3587 = vrot.lane.b32.xlu0 %v3579_v38, %s4968_s19  ;;  %3597 = vrot.lane.b32.xlu1 %v4279_v34, %s4969_s26 }
 0xabe   : > { %3603 = vrot.lane.b32.xlu0 %v6353_v52, %s4969_s26  ;;  %3638 = vrot.lane.b32.xlu1 %v3619_v46, %s4971_s7 }
 0xac2   : > { %3644 = vrot.lane.b32.xlu1 %v3636_v35, %s4971_s7 }
 0xafc   : > { %v3476_v12 = vpop.permute.xlu0 %3475 }
 0xafd   : > { %v3543_v45 = vpop.permute.xlu1 %3542 }
 0xb00   : > { %v3478_v27 = vpop.permute.xlu0 %3477 }
 0xb04   : > { %v3460_v49 = vpop.permute.xlu0 %3459  ;;  %v3462_v31 = vpop.permute.xlu1 %3461 }
 0xb05   : > { %v3651_v53 = vsel %vm3646_vm15, %v6299_v61, %v3460_v49  ;;  %v3653_v9 = vsel %vm3646_vm15, %v6305_v13, %v3462_v31 }
 0xb06   : > { %v3660_v7 = vsel %vm3656_vm0, %v3651_v53, %v3476_v12  ;;  %v3662_v61 = vsel %vm3656_vm0, %v3653_v9, %v3478_v27 }
 0xb08   : > { %v3519_v50 = vpop.permute.xlu0 %3518  ;;  %v3517_v48 = vpop.permute.xlu1 %3516 }
 0xb09   : > { %v3669_v52 = vsel %vm3665_vm1, %v3660_v7, %v3517_v48  ;;  %v3671_v51 = vsel %vm3665_vm1, %v3662_v61, %v3519_v50 }
 0xb0a   : > { %v3678_v58 = vsel %vm3674_vm2, %v3669_v52, %v3543_v45  ;;  %v4288_v52 = vld [vmem:[%s6502_s4] ss:$0 sm:$0xff] }
 0xb0c   : > { %v3545_v62 = vpop.permute.xlu0 %3544  ;;  %v3584_v54 = vpop.permute.xlu1 %3583 }
 0xb0d   : > { %v3687_v60 = vsel %vm3683_vm3, %v3678_v58, %v3584_v54  ;;  %v3680_v11 = vsel %vm3674_vm2, %v3671_v51, %v3545_v62 }
 0xb10   : > { %v3586_v57 = vpop.permute.xlu0 %3585  ;;  %v3600_v56 = vpop.permute.xlu1 %3599 }
 0xb11   : > { %v3696_v3 = vsel %vm3692_vm4, %v3687_v60, %v3600_v56  ;;  %v3689_v15 = vsel %vm3683_vm3, %v3680_v11, %v3586_v57 }
 0xb14   : > { %v3602_v1 = vpop.permute.xlu0 %3601  ;;  %v3641_v5 = vpop.permute.xlu1 %3640 }
 0xb15   : > { %v3705_v13 = vsel %vm3701_vm5, %v3696_v3, %v3641_v5  ;;  %v3698_v23 = vsel %vm3692_vm4, %v3689_v15, %v3602_v1 }
 0xb16   : > { %v3728_v16 = vshll.u32 %v3705_v13, 16  ;;  %v3732_v55 = vshrl.u32 %v3705_v13, 16 }
 0xb18   : > { %v3643_v26 = vpop.permute.xlu0 %3642  ;;  %v3730_v28 = vrot.slane %v3728_v16, 1  ;;  %v3458_v4 = vpop.permute.xlu1 %3457 }
 0xb19   : > { %v3707_v6 = vsel %vm3701_vm5, %v3698_v23, %v3643_v26  ;;  %v3649_v33 = vsel %vm3646_vm15, %v4264_v24, %v3458_v4 }
 0xb1a   : > { %v3735_v0 = vshll.u32 %v3707_v6, 16  ;;  %v3734_v63 = vor.u32 %v3732_v55, %v3730_v28  ;;  %v3739_v31 = vshrl.u32 %v3707_v6, 16 }
 0xb1c   : > { %v3737_v30 = vrot.slane %v3735_v0, 1  ;;  %v3464_v18 = vpop.permute.xlu0 %3463  ;;  %v3474_v25 = vpop.permute.xlu1 %3473 }
 0xb1d   : > { %v3658_v43 = vsel %vm3656_vm0, %v3649_v33, %v3474_v25  ;;  %v3655_v2 = vsel %vm3646_vm15, %v6308_v14, %v3464_v18 }
 0xb1e   : > { %v3738_v17 = vsel %vm3426_vm13, %v3734_v63, %v3737_v30  ;;  %v3741_v53 = vor.u32 %v3739_v31, %v3737_v30 }
 0xb1f   : > { %4511 = vmatmul.mubr.msk.bf16.vlgmr.msra.gmra.mxu1 %vm3758_vm6, %v3738_v17 }
 0xb20   : > { %v3480_v59 = vpop.permute.xlu0 %3479  ;;  %4514 = vmatprep.mubr.msk.bf16.mxu1 %vm4972_vm14, %v4970_v41  ;;  %v3515_v10 = vpop.permute.xlu1 %3514 }
 0xb21   : > { %v3667_v22 = vsel %vm3665_vm1, %v3658_v43, %v3515_v10  ;;  %v3664_v20 = vsel %vm3656_vm0, %v3655_v2, %v3480_v59 }
 0xb24   : > { %v3521_v37 = vpop.permute.xlu0 %3520  ;;  %v3541_v39 = vpop.permute.xlu1 %3540 }
 0xb25   : > { %v3676_v41 = vsel %vm3674_vm2, %v3667_v22, %v3541_v39  ;;  %v3673_v44 = vsel %vm3665_vm1, %v3664_v20, %v3521_v37 }
 0xb28   : > { %v3547_v40 = vpop.permute.xlu0 %3546  ;;  %v3582_v19 = vpop.permute.xlu1 %3581 }
 0xb29   : > { %v3685_v42 = vsel %vm3683_vm3, %v3676_v41, %v3582_v19  ;;  %v3682_v21 = vsel %vm3674_vm2, %v3673_v44, %v3547_v40 }
 0xb2c   : > { %v3588_v29 = vpop.permute.xlu0 %3587  ;;  %v3598_v47 = vpop.permute.xlu1 %3597 }
 0xb2d   : > { %v3694_v8 = vsel %vm3692_vm4, %v3685_v42, %v3598_v47  ;;  %v3691_v14 = vsel %vm3683_vm3, %v3682_v21, %v3588_v29 }
 0xb30   : > { %v3639_v32 = vpop.permute.xlu1 %3638  ;;  %v3604_v34 = vpop.permute.xlu0 %3603 }
 0xb31   : > { %v3703_v38 = vsel %vm3701_vm5, %v3694_v8, %v3639_v32  ;;  %v3700_v45 = vsel %vm3692_vm4, %v3691_v14, %v3604_v34 }
 0xb32   : > { %v3724_v46 = vshll.u32 %v3703_v38, 16  ;;  %v3722_v35 = vshrl.u32 %v3703_v38, 16 }
 0xb34   : > { %v3726_v12 = vrot.slane %v3724_v46, 1  ;;  %v3645_v27 = vpop.permute.xlu1 %3644 }
 0xb35   : > { %v3709_v49 = vsel %vm3701_vm5, %v3700_v45, %v3645_v27 }
 0xb36   : > { %v3727_v50 = vor.u32 %v3726_v12, %v3722_v35  ;;  %v3742_v48 = vshll.u32 %v3709_v49, 16 }
 0xb38   : > { %v3744_v62 = vrot.slane %v3742_v48, 1  ;;  %v3731_v7 = vsel %vm3426_vm13, %v3727_v50, %v3730_v28 }
 0xb39   : > { %4507 = vmatmul.mubr.msk.bf16.vlgmr.msra.gmra.mxu0 %vm3758_vm6, %v3731_v7 }
 0xb3a   : > { %v3745_v54 = vsel %vm3426_vm13, %v3741_v53, %v3744_v62 }
 0xb3b   : > { %4515 = vmatmul.mubr.msk.bf16.gmra.mxu1 %vm3758_vm6, %v3745_v54 }
 0xbdf   : > { %v3810_v57 = vpop.f32.mrf.mxu1 }
 0xbe0   : > { %v3811_v9 = vadd.f32 %v4288_v52, %v3810_v57 }
 0xbe1   : > { %v4512_v56 = vpop.f32.mrf.mxu1 }
 0xbe2   : > { %v4346_v58 = vpack.c.bf16 %v3811_v9, %v3811_v9 }
 0xbe3   : > { %v3813_v61 = vpop.f32.mrf.mxu1 }
 0xbe4   : > { %3852 = vst.msk [vmem:[%s5075_s20 + $0x8] sm:$0xf] %vm3849_vm7, %v4346_v58  ;;  %v3814_v60 = vadd.f32 %v4288_v52, %v3813_v61 }
 0xbe5   : > { %v4513_v1 = vpop.f32.mrf.mxu1 }
 0xbe6   : > { %v4347_v51 = vpack.c.bf16 %v3814_v60, %v3814_v60 }
 0xbe8   : > { %3853 = vst.msk [vmem:[%s5075_s20 + $0xc] sm:$0xf] %vm3849_vm7, %v4347_v51 }
 0xbf9   : > { %v3802_v3 = vpop.f32.mrf.mxu0 }
 0xbfa   : > { %v3803_v5 = vadd.f32 %v4288_v52, %v3802_v3 }
 0xbfb   : > { %v4508_v11 = vpop.f32.mrf.mxu0  ;;  %v3818_v13 = vpop.f32.mrf.mxu1 }
 0xbfc   : > { %v4344_v15 = vpack.c.bf16 %v3803_v5, %v3803_v5  ;;  %v3819_v16 = vadd.f32 %v4288_v52, %v3818_v13 }
 0xbfd   : > { %v3805_v23 = vpop.f32.mrf.mxu0  ;;  %v4516_v26 = vpop.f32.mrf.mxu1 }
 0xbfe   : > { %3850 = vst.msk [vmem:[%s5075_s20] sm:$0xf] %vm3849_vm7, %v4344_v15  ;;  %v4348_v28 = vpack.c.bf16 %v3819_v16, %v3819_v16  ;;  %v3806_v4 = vadd.f32 %v4288_v52, %v3805_v23 }
 0xbff   : > { %v4509_v6 = vpop.f32.mrf.mxu0  ;;  %v3821_v55 = vpop.f32.mrf.mxu1 }
 0xc00   : > { %3854 = vst.msk [vmem:[%s5075_s20 + $0x10] sm:$0xf] %vm3849_vm7, %v4348_v28  ;;  %v4345_v0 = vpack.c.bf16 %v3806_v4, %v3806_v4  ;;  %v3822_v63 = vadd.f32 %v4288_v52, %v3821_v55 }
 0xc01   : > { %v4517_v30 = vpop.f32.mrf.mxu1 }
 0xc02   : > { %3851 = vst.msk [vmem:[%s5075_s20 + $0x4] sm:$0xf] %vm3849_vm7, %v4345_v0  ;;  %v4349_v18 = vpack.c.bf16 %v3822_v63, %v3822_v63 }
 0xc04   : > { %3855 = vst.msk [vmem:[%s5075_s20 + $0x14] sm:$0xf] %vm3849_vm7, %v4349_v18 }
 0xc05 PF: > { %s15_s24 = sadd.s32 1, %s4899_s24   ;;  %s6511_s20 = sld [smem:[#allocation2_spill]] }
 0xc06   : > { %p12_p6 = scmp.ge.s32.totalorder %s15_s24, 66   ;;  %s6512_s17 = sld [smem:[#allocation3_spill]] }
 0xc07   : > { %s6513_s6 = sld [smem:[#allocation4_spill]]  ;;  %s6515_s18 = smov %s4887_s21 }
 0xc08   : > { %s6514_s23 = sld [smem:[#allocation5_spill]]  ;;  %s6516_s19 = smov %s4891_s22 }
 0xc09   :  { %14 = sbr.rel (!%p12_p6) target bundleno = 4 (0x4), region = 115 }
 0xc0c   : > { %s6517_s21 = smov %s6512_s17 }
 0xc0d   : > { %s6518_s22 = smov %s6513_s6 }

</bundles_post_ra>
